<compile_context>
chip_gen: v7x
topology: tpu7x:2x2x1
jax: 0.10.0
libtpu: 0.0.40
codegen_flags: <defaults>
</compile_context>

<pallas_src>
import functools

import jax
import jax.numpy as jnp
from jax import lax
from jax.experimental import pallas as pl
from jax.experimental.pallas import tpu as pltpu

# dtype used for MXU inputs and for carrying conv activations between layers.
# Accumulation and all element-wise epilogues are float32.
_MM_DTYPE = jnp.bfloat16


# ---------------------------------------------------------------------------
# Pallas kernels
# ---------------------------------------------------------------------------
def _mm_bias_leaky_kernel(x_ref, w_ref, b_ref, o_ref):
    """Fused  X @ W + b  followed by LeakyReLU(0.1).  f32 accumulate, bf16 store."""
    acc = jnp.dot(x_ref[...], w_ref[...], preferred_element_type=jnp.float32)
    acc = acc + b_ref[...]                       # (1, N) broadcast over rows, f32
    acc = jnp.where(acc >= 0, acc, 0.1 * acc)    # LeakyReLU in f32
    o_ref[...] = acc.astype(o_ref.dtype)


def _head_kernel(*refs, n_c_disc, dim_c_disc, dim_c_cont):
    """Entire FC head in one kernel.

    out    = leaky(feat @ Ws + bs)                      (B, 128)
    [d|q'] = out @ [Wd|Wq] + [bd|bq]                    (B, 1+128)
    prob   = sigmoid(d);   q = leaky(q')
    [c|l]  = q @ [Wc|Wl] + [bc|bl]                      (B, dim_c_cont + n_c_disc*dim_c_disc)
    c_cont = c;  c_disc = softmax(l) per group of dim_c_disc
    """
    if n_c_disc != 0:
        (feat_ref, ws_ref, bs_ref, wdq_ref, bdq_ref, wcl_ref, bcl_ref,
         prob_ref, cont_ref, disc_ref) = refs
    else:
        (feat_ref, ws_ref, bs_ref, wdq_ref, bdq_ref, wcl_ref, bcl_ref,
         prob_ref, cont_ref) = refs

    def leaky(a):
        return jnp.where(a >= 0, a, 0.1 * a)

    # fc_shared + LeakyReLU
    out = leaky(jnp.dot(feat_ref[...], ws_ref[...],
                        preferred_element_type=jnp.float32) + bs_ref[...])

    # fc_D and fc_Q in a single lane-concatenated dot
    dq = jnp.dot(out.astype(_MM_DTYPE), wdq_ref[...],
                 preferred_element_type=jnp.float32) + bdq_ref[...]
    d = dq[:, 0:1]                                   # (B, 1) D logit
    prob_ref[...] = (1.0 / (1.0 + jnp.exp(-d))).astype(prob_ref.dtype)
    q = leaky(dq[:, 1:])                             # (B, 128) internal_Q

    # fc_cont and fc_disc in a single lane-concatenated dot
    cl = jnp.dot(q.astype(_MM_DTYPE), wcl_ref[...],
                 preferred_element_type=jnp.float32) + bcl_ref[...]
    cont_ref[...] = cl[:, 0:dim_c_cont].astype(cont_ref.dtype)

    if n_c_disc != 0:
        logits = cl[:, dim_c_cont:]                  # (B, n_c_disc * dim_c_disc)
        segs = []
        for g in range(n_c_disc):                    # unrolled, tiny
            s = logits[:, g * dim_c_disc:(g + 1) * dim_c_disc]
            m = jnp.max(s, axis=-1, keepdims=True)
            e = jnp.exp(s - m)
            segs.append(e / jnp.sum(e, axis=-1, keepdims=True))
        disc_ref[...] = jnp.concatenate(segs, axis=-1).astype(disc_ref.dtype)


# ---------------------------------------------------------------------------
# Pallas wrappers
# ---------------------------------------------------------------------------
def conv_mm_leaky(col, wmat, b, tm_max=1024):
    """col: (M, K) bf16 patches, wmat: (K, N) bf16, b: (1, N) f32 -> (M, N) bf16."""
    M, K = col.shape
    N = wmat.shape[1]
    tm = min(M, tm_max)
    if M % tm != 0:
        # Tiny network: fall back to a single whole-M block instead of padding.
        tm = M
    grid = (M // tm,)
    return pl.pallas_call(
        _mm_bias_leaky_kernel,
        out_shape=jax.ShapeDtypeStruct((M, N), _MM_DTYPE),
        grid=grid,
        in_specs=[
            pl.BlockSpec((tm, K), lambda i: (i, 0)),
            pl.BlockSpec((K, N), lambda i: (0, 0)),
            pl.BlockSpec((1, N), lambda i: (0, 0)),
        ],
        out_specs=pl.BlockSpec((tm, N), lambda i: (i, 0)),
        compiler_params=pltpu.CompilerParams(
            # Independent row tiles: lets v7x shard across its 2 TensorCores.
            dimension_semantics=("parallel",)),
    )(col, wmat, b)


def fused_head(feat, params, n_c_disc, dim_c_disc, dim_c_cont):
    """feat: (B, 1024) bf16 (NHWC-flattened conv feature) -> (prob, c_cont[, c_disc])."""
    B = feat.shape[0]
    kernel = functools.partial(_head_kernel, n_c_disc=n_c_disc,
                               dim_c_disc=dim_c_disc, dim_c_cont=dim_c_cont)
    out_shape = [jax.ShapeDtypeStruct((B, 1), jnp.float32),
                 jax.ShapeDtypeStruct((B, dim_c_cont), jnp.float32)]
    if n_c_disc != 0:
        out_shape.append(jax.ShapeDtypeStruct((B, n_c_disc * dim_c_disc), jnp.float32))
    # No grid: every operand is a single whole-array VMEM block (all tiny).
    return pl.pallas_call(kernel, out_shape=tuple(out_shape))(
        feat, params["w_shared"], params["b_shared"],
        params["w_dq"], params["b_dq"], params["w_cl"], params["b_cl"])


# ---------------------------------------------------------------------------
# Glue: NHWC im2col, spectral normalization, parameter construction
# ---------------------------------------------------------------------------
def im2col_nhwc(x, kh, kw, stride, pad):
    """NHWC input -> patch matrix (B*Ho*Wo, kh*kw*C), feature order (kh, kw, C)."""
    B, H, W, C = x.shape
    xp = jnp.pad(x, ((0, 0), (pad, pad), (pad, pad), (0, 0)))
    Ho = (H + 2 * pad - kh) // stride + 1
    Wo = (W + 2 * pad - kw) // stride + 1
    cols = []
    for i in range(kh):
        for j in range(kw):
            cols.append(xp[:, i:i + stride * Ho:stride, j:j + stride * Wo:stride, :])
    col = jnp.concatenate(cols, axis=-1)            # (B, Ho, Wo, kh*kw*C)
    return col.reshape(B * Ho * Wo, kh * kw * C), Ho, Wo


def spectral_normalize(w, n_iter=30, eps=1e-12):
    """Divide torch-layout weight by its largest singular value (power iteration).

    torch.nn.utils.spectral_norm uses 1 iteration per training forward with a
    persistent random `u`; here we run power iteration to convergence
    deterministically (documented deviation for synthetic parameters).
    """
    wm = w.reshape(w.shape[0], -1)
    u0 = jnp.ones((wm.shape[0],), jnp.float32) / jnp.sqrt(jnp.float32(wm.shape[0]))

    def body(_, u):
        v = wm.T @ u
        v = v / (jnp.linalg.norm(v) + eps)
        u = wm @ v
        u = u / (jnp.linalg.norm(u) + eps)
        return u

    u = lax.fori_loop(0, n_iter, body, u0)
    v = wm.T @ u
    v = v / (jnp.linalg.norm(v) + eps)
    sigma = u @ (wm @ v)
    return w / sigma


def make_params(key, n_c_disc, dim_c_disc, dim_c_cont):
    """Deterministic synthetic parameters (torch shapes), pre-reordered for NHWC matmuls."""
    keys = jax.random.split(key, 20)
    ki = iter(range(20))

    def norm(k, shape, scale=0.05):
        return scale * jax.random.normal(k, shape, dtype=jnp.float32)

    p = {}

    # Convs: torch weight (Cout, Cin, 4, 4) -> matmul weight (KH*KW*Cin, Cout), bf16.
    conv_cfg = [(1, 32), (32, 32), (32, 64), (64, 64)]
    p["convs"] = []
    for cin, cout in conv_cfg:
        w = spectral_normalize(norm(keys[next(ki)], (cout, cin, 4, 4)))
        b = norm(keys[next(ki)], (cout,))
        wmat = w.transpose(2, 3, 1, 0).reshape(4 * 4 * cin, cout).astype(_MM_DTYPE)
        p["convs"].append((wmat, b.reshape(1, cout)))

    def lin(out_f, in_f):
        w = spectral_normalize(norm(keys[next(ki)], (out_f, in_f)))
        b = norm(keys[next(ki)], (out_f,))
        return w, b

    # fc_shared: permute input rows (C,H,W) -> (H,W,C) so it eats the NHWC feature.
    ws, bs = lin(128, 64 * 4 * 4)
    ws_r = ws.reshape(128, 64, 4, 4).transpose(2, 3, 1, 0).reshape(64 * 4 * 4, 128)
    p["w_shared"] = ws_r.astype(_MM_DTYPE)
    p["b_shared"] = bs.reshape(1, 128)

    # fc_D and fc_Q concatenated along N: (128, 1+128).
    wd, bd = lin(1, 128)
    wq, bq = lin(128, 128)
    p["w_dq"] = jnp.concatenate([wd.T, wq.T], axis=1).astype(_MM_DTYPE)
    p["b_dq"] = jnp.concatenate([bd, bq]).reshape(1, 1 + 128)

    # fc_cont and fc_disc concatenated along N.
    wc, bc = lin(dim_c_cont, 128)
    if n_c_disc != 0:
        wl, bl = lin(n_c_disc * dim_c_disc, 128)
        p["w_cl"] = jnp.concatenate([wc.T, wl.T], axis=1).astype(_MM_DTYPE)
        p["b_cl"] = jnp.concatenate([bc, bl]).reshape(1, dim_c_cont + n_c_disc * dim_c_disc)
    else:
        p["w_cl"] = wc.T.astype(_MM_DTYPE)
        p["b_cl"] = bc.reshape(1, dim_c_cont)
    return p


# ---------------------------------------------------------------------------
# Forward pass
# ---------------------------------------------------------------------------
def discriminator_forward(params, z, n_c_disc, dim_c_disc, dim_c_cont):
    """z: (B, 1, 64, 64) f32 NCHW -> (probability, c_disc, c_cont)."""
    B = z.shape[0]
    # One-time layout conversion; everything downstream is NHWC.
    x = jnp.transpose(z, (0, 2, 3, 1)).astype(_MM_DTYPE)

    # module_shared: 4x [conv4x4 s2 p1 + LeakyReLU(0.1)], each as im2col + fused Pallas matmul.
    for wmat, b in params["convs"]:
        col, Ho, Wo = im2col_nhwc(x, 4, 4, stride=2, pad=1)
        y = conv_mm_leaky(col, wmat, b)                   # (B*Ho*Wo, Cout)  [Pallas]
        x = y.reshape(B, Ho, Wo, wmat.shape[1])           # still NHWC, no transpose

    feat = x.reshape(B, 64 * 4 * 4)                       # consumed by reordered w_shared

    outs = fused_head(feat, params, n_c_disc, dim_c_disc, dim_c_cont)   # [single Pallas call]

    if n_c_disc != 0:
        prob, c_cont, disc = outs
        c_disc = disc.reshape(B, n_c_disc, dim_c_disc)
        return prob.squeeze(), c_disc, c_cont
    prob, c_cont = outs
    return prob.squeeze(), c_cont


# ---------------------------------------------------------------------------
if __name__ == "__main__":
    n_c_disc, dim_c_disc, dim_c_cont = 2, 5, 3
    B = 2  # input spatial must be 64x64: four stride-2 convs -> 4x4, then Reshape(-1, 64*4*4)

    key = jax.random.PRNGKey(0)
    k_params, k_input = jax.random.split(key)
    params = make_params(k_params, n_c_disc, dim_c_disc, dim_c_cont)
    z = jax.random.normal(k_input, (B, 1, 64, 64), dtype=jnp.float32)

    fwd = jax.jit(functools.partial(
        discriminator_forward,
        n_c_disc=n_c_disc, dim_c_disc=dim_c_disc, dim_c_cont=dim_c_cont))
    probability, c_disc, c_cont = fwd(params, z)
    jax.block_until_ready((probability, c_disc, c_cont))

    assert probability.shape == (B,)
    assert c_disc.shape == (B, n_c_disc, dim_c_disc)
    assert c_cont.shape == (B, dim_c_cont)
    print("KERNEL_OK")
</pallas_src>

<mosaic_0001>
module attributes {stable_mosaic.version = 11 : i64} {
  func.func @_mm_bias_leaky_kernel(%arg0: i32, %arg1: memref<1024x16xbf16, #tpu.memory_space<vmem>>, %arg2: memref<16x32xbf16, #tpu.memory_space<vmem>>, %arg3: memref<1x32xf32, #tpu.memory_space<vmem>>, %arg4: memref<1024x32xbf16, #tpu.memory_space<vmem>>) attributes {dimension_semantics = [#tpu.dimension_semantics<parallel>], iteration_bounds = array<i64: 2>, scalar_prefetch = 0 : i64, scratch_operands = 0 : i64, tpu.core_type = #tpu.core_type<tc>, window_params = [{transform_indices = @transform_0, window_bounds = array<i64: 1024, 16>}, {pipeline_mode = #tpu.pipeline_mode<synchronous>, transform_indices = @transform_1, window_bounds = array<i64: 16, 32>}, {pipeline_mode = #tpu.pipeline_mode<synchronous>, transform_indices = @transform_2, window_bounds = array<i64: 1, 32>}, {transform_indices = @transform_3, window_bounds = array<i64: 1024, 32>}]} {
    %c0 = arith.constant 0 : index
    %c0_0 = arith.constant 0 : index
    %0 = vector.load %arg1[%c0, %c0_0] : memref<1024x16xbf16, #tpu.memory_space<vmem>>, vector<1024x16xbf16>
    %c0_1 = arith.constant 0 : index
    %c0_2 = arith.constant 0 : index
    %1 = vector.load %arg2[%c0_1, %c0_2] : memref<16x32xbf16, #tpu.memory_space<vmem>>, vector<16x32xbf16>
    %cst = arith.constant dense<0.000000e+00> : vector<1024x32xf32>
    %2 = tpu.matmul %0, %1, %cst {dimension_numbers = #tpu.dot_dimension_numbers<[1], [0], [0], [1], [0, 0, 1, 1], [], []>} : vector<1024x16xbf16>, vector<16x32xbf16>, vector<1024x32xf32> -> vector<1024x32xf32>
    %c0_3 = arith.constant 0 : index
    %c0_4 = arith.constant 0 : index
    %3 = vector.load %arg3[%c0_3, %c0_4] : memref<1x32xf32, #tpu.memory_space<vmem>>, vector<1x32xf32>
    %4 = vector.broadcast %3 : vector<1x32xf32> to vector<1024x32xf32>
    %5 = arith.addf %2, %4 : vector<1024x32xf32>
    %cst_5 = arith.constant 0.000000e+00 : f32
    %6 = vector.broadcast %cst_5 : f32 to vector<1024x32xf32>
    %7 = arith.cmpf oge, %5, %6 : vector<1024x32xf32>
    %cst_6 = arith.constant 1.000000e-01 : f32
    %8 = vector.broadcast %cst_6 : f32 to vector<1024x32xf32>
    %9 = arith.mulf %8, %5 : vector<1024x32xf32>
    %10 = arith.select %7, %5, %9 : vector<1024x32xi1>, vector<1024x32xf32>
    %11 = arith.truncf %10 : vector<1024x32xf32> to vector<1024x32xbf16>
    %c0_7 = arith.constant 0 : index
    %c0_8 = arith.constant 0 : index
    %12 = vector.load %arg4[%c0_7, %c0_8] : memref<1024x32xbf16, #tpu.memory_space<vmem>>, vector<1024x32xbf16>
    tpu.vector_store %arg4[%c0_7, %c0_8], %11 {strides = array<i32>} : memref<1024x32xbf16, #tpu.memory_space<vmem>>, vector<1024x32xbf16>,
    return
  }
  func.func @transform_0(%arg0: i32) -> (i32, i32) {
    %c0_i32 = arith.constant 0 : i32
    %c0_i32_0 = arith.constant 0 : i32
    return %arg0, %c0_i32 : i32, i32
  }
  func.func @transform_1(%arg0: i32) -> (i32, i32) {
    %c0_i32 = arith.constant 0 : i32
    %c0_i32_0 = arith.constant 0 : i32
    %c0_i32_1 = arith.constant 0 : i32
    return %c0_i32, %c0_i32_0 : i32, i32
  }
  func.func @transform_2(%arg0: i32) -> (i32, i32) {
    %c0_i32 = arith.constant 0 : i32
    %c0_i32_0 = arith.constant 0 : i32
    %c0_i32_1 = arith.constant 0 : i32
    return %c0_i32, %c0_i32_0 : i32, i32
  }
  func.func @transform_3(%arg0: i32) -> (i32, i32) {
    %c0_i32 = arith.constant 0 : i32
    %c0_i32_0 = arith.constant 0 : i32
    return %arg0, %c0_i32 : i32, i32
  }
}

module attributes {stable_mosaic.version = 11 : i64} {
  func.func @_mm_bias_leaky_kernel(%arg0: i32, %arg1: memref<512x512xbf16, #tpu.memory_space<vmem>>, %arg2: memref<512x32xbf16, #tpu.memory_space<vmem>>, %arg3: memref<1x32xf32, #tpu.memory_space<vmem>>, %arg4: memref<512x32xbf16, #tpu.memory_space<vmem>>) attributes {dimension_semantics = [#tpu.dimension_semantics<parallel>], iteration_bounds = array<i64: 1>, scalar_prefetch = 0 : i64, scratch_operands = 0 : i64, tpu.core_type = #tpu.core_type<tc>, window_params = [{transform_indices = @transform_0, window_bounds = array<i64: 512, 512>}, {pipeline_mode = #tpu.pipeline_mode<synchronous>, transform_indices = @transform_1, window_bounds = array<i64: 512, 32>}, {pipeline_mode = #tpu.pipeline_mode<synchronous>, transform_indices = @transform_2, window_bounds = array<i64: 1, 32>}, {transform_indices = @transform_3, window_bounds = array<i64: 512, 32>}]} {
    %c0 = arith.constant 0 : index
    %c0_0 = arith.constant 0 : index
    %0 = vector.load %arg1[%c0, %c0_0] : memref<512x512xbf16, #tpu.memory_space<vmem>>, vector<512x512xbf16>
    %c0_1 = arith.constant 0 : index
    %c0_2 = arith.constant 0 : index
    %1 = vector.load %arg2[%c0_1, %c0_2] : memref<512x32xbf16, #tpu.memory_space<vmem>>, vector<512x32xbf16>
    %cst = arith.constant dense<0.000000e+00> : vector<512x32xf32>
    %2 = tpu.matmul %0, %1, %cst {dimension_numbers = #tpu.dot_dimension_numbers<[1], [0], [0], [1], [0, 0, 1, 1], [], []>} : vector<512x512xbf16>, vector<512x32xbf16>, vector<512x32xf32> -> vector<512x32xf32>
    %c0_3 = arith.constant 0 : index
    %c0_4 = arith.constant 0 : index
    %3 = vector.load %arg3[%c0_3, %c0_4] : memref<1x32xf32, #tpu.memory_space<vmem>>, vector<1x32xf32>
    %4 = vector.broadcast %3 : vector<1x32xf32> to vector<512x32xf32>
    %5 = arith.addf %2, %4 : vector<512x32xf32>
    %cst_5 = arith.constant 0.000000e+00 : f32
    %6 = vector.broadcast %cst_5 : f32 to vector<512x32xf32>
    %7 = arith.cmpf oge, %5, %6 : vector<512x32xf32>
    %cst_6 = arith.constant 1.000000e-01 : f32
    %8 = vector.broadcast %cst_6 : f32 to vector<512x32xf32>
    %9 = arith.mulf %8, %5 : vector<512x32xf32>
    %10 = arith.select %7, %5, %9 : vector<512x32xi1>, vector<512x32xf32>
    %11 = arith.truncf %10 : vector<512x32xf32> to vector<512x32xbf16>
    %c0_7 = arith.constant 0 : index
    %c0_8 = arith.constant 0 : index
    %12 = vector.load %arg4[%c0_7, %c0_8] : memref<512x32xbf16, #tpu.memory_space<vmem>>, vector<512x32xbf16>
    tpu.vector_store %arg4[%c0_7, %c0_8], %11 {strides = array<i32>} : memref<512x32xbf16, #tpu.memory_space<vmem>>, vector<512x32xbf16>,
    return
  }
  func.func @transform_0(%arg0: i32) -> (i32, i32) {
    %c0_i32 = arith.constant 0 : i32
    %c0_i32_0 = arith.constant 0 : i32
    return %arg0, %c0_i32 : i32, i32
  }
  func.func @transform_1(%arg0: i32) -> (i32, i32) {
    %c0_i32 = arith.constant 0 : i32
    %c0_i32_0 = arith.constant 0 : i32
    %c0_i32_1 = arith.constant 0 : i32
    return %c0_i32, %c0_i32_0 : i32, i32
  }
  func.func @transform_2(%arg0: i32) -> (i32, i32) {
    %c0_i32 = arith.constant 0 : i32
    %c0_i32_0 = arith.constant 0 : i32
    %c0_i32_1 = arith.constant 0 : i32
    return %c0_i32, %c0_i32_0 : i32, i32
  }
  func.func @transform_3(%arg0: i32) -> (i32, i32) {
    %c0_i32 = arith.constant 0 : i32
    %c0_i32_0 = arith.constant 0 : i32
    return %arg0, %c0_i32 : i32, i32
  }
}

module attributes {stable_mosaic.version = 11 : i64} {
  func.func @_mm_bias_leaky_kernel(%arg0: i32, %arg1: memref<128x512xbf16, #tpu.memory_space<vmem>>, %arg2: memref<512x64xbf16, #tpu.memory_space<vmem>>, %arg3: memref<1x64xf32, #tpu.memory_space<vmem>>, %arg4: memref<128x64xbf16, #tpu.memory_space<vmem>>) attributes {dimension_semantics = [#tpu.dimension_semantics<parallel>], iteration_bounds = array<i64: 1>, scalar_prefetch = 0 : i64, scratch_operands = 0 : i64, tpu.core_type = #tpu.core_type<tc>, window_params = [{transform_indices = @transform_0, window_bounds = array<i64: 128, 512>}, {pipeline_mode = #tpu.pipeline_mode<synchronous>, transform_indices = @transform_1, window_bounds = array<i64: 512, 64>}, {pipeline_mode = #tpu.pipeline_mode<synchronous>, transform_indices = @transform_2, window_bounds = array<i64: 1, 64>}, {transform_indices = @transform_3, window_bounds = array<i64: 128, 64>}]} {
    %c0 = arith.constant 0 : index
    %c0_0 = arith.constant 0 : index
    %0 = vector.load %arg1[%c0, %c0_0] : memref<128x512xbf16, #tpu.memory_space<vmem>>, vector<128x512xbf16>
    %c0_1 = arith.constant 0 : index
    %c0_2 = arith.constant 0 : index
    %1 = vector.load %arg2[%c0_1, %c0_2] : memref<512x64xbf16, #tpu.memory_space<vmem>>, vector<512x64xbf16>
    %cst = arith.constant dense<0.000000e+00> : vector<128x64xf32>
    %2 = tpu.matmul %0, %1, %cst {dimension_numbers = #tpu.dot_dimension_numbers<[1], [0], [0], [1], [0, 0, 1, 1], [], []>} : vector<128x512xbf16>, vector<512x64xbf16>, vector<128x64xf32> -> vector<128x64xf32>
    %c0_3 = arith.constant 0 : index
    %c0_4 = arith.constant 0 : index
    %3 = vector.load %arg3[%c0_3, %c0_4] : memref<1x64xf32, #tpu.memory_space<vmem>>, vector<1x64xf32>
    %4 = vector.broadcast %3 : vector<1x64xf32> to vector<128x64xf32>
    %5 = arith.addf %2, %4 : vector<128x64xf32>
    %cst_5 = arith.constant 0.000000e+00 : f32
    %6 = vector.broadcast %cst_5 : f32 to vector<128x64xf32>
    %7 = arith.cmpf oge, %5, %6 : vector<128x64xf32>
    %cst_6 = arith.constant 1.000000e-01 : f32
    %8 = vector.broadcast %cst_6 : f32 to vector<128x64xf32>
    %9 = arith.mulf %8, %5 : vector<128x64xf32>
    %10 = arith.select %7, %5, %9 : vector<128x64xi1>, vector<128x64xf32>
    %11 = arith.truncf %10 : vector<128x64xf32> to vector<128x64xbf16>
    %c0_7 = arith.constant 0 : index
    %c0_8 = arith.constant 0 : index
    %12 = vector.load %arg4[%c0_7, %c0_8] : memref<128x64xbf16, #tpu.memory_space<vmem>>, vector<128x64xbf16>
    tpu.vector_store %arg4[%c0_7, %c0_8], %11 {strides = array<i32>} : memref<128x64xbf16, #tpu.memory_space<vmem>>, vector<128x64xbf16>,
    return
  }
  func.func @transform_0(%arg0: i32) -> (i32, i32) {
    %c0_i32 = arith.constant 0 : i32
    %c0_i32_0 = arith.constant 0 : i32
    return %arg0, %c0_i32 : i32, i32
  }
  func.func @transform_1(%arg0: i32) -> (i32, i32) {
    %c0_i32 = arith.constant 0 : i32
    %c0_i32_0 = arith.constant 0 : i32
    %c0_i32_1 = arith.constant 0 : i32
    return %c0_i32, %c0_i32_0 : i32, i32
  }
  func.func @transform_2(%arg0: i32) -> (i32, i32) {
    %c0_i32 = arith.constant 0 : i32
    %c0_i32_0 = arith.constant 0 : i32
    %c0_i32_1 = arith.constant 0 : i32
    return %c0_i32, %c0_i32_0 : i32, i32
  }
  func.func @transform_3(%arg0: i32) -> (i32, i32) {
    %c0_i32 = arith.constant 0 : i32
    %c0_i32_0 = arith.constant 0 : i32
    return %arg0, %c0_i32 : i32, i32
  }
}

module attributes {stable_mosaic.version = 11 : i64} {
  func.func @_mm_bias_leaky_kernel(%arg0: i32, %arg1: memref<32x1024xbf16, #tpu.memory_space<vmem>>, %arg2: memref<1024x64xbf16, #tpu.memory_space<vmem>>, %arg3: memref<1x64xf32, #tpu.memory_space<vmem>>, %arg4: memref<32x64xbf16, #tpu.memory_space<vmem>>) attributes {dimension_semantics = [#tpu.dimension_semantics<parallel>], iteration_bounds = array<i64: 1>, scalar_prefetch = 0 : i64, scratch_operands = 0 : i64, tpu.core_type = #tpu.core_type<tc>, window_params = [{transform_indices = @transform_0, window_bounds = array<i64: 32, 1024>}, {pipeline_mode = #tpu.pipeline_mode<synchronous>, transform_indices = @transform_1, window_bounds = array<i64: 1024, 64>}, {pipeline_mode = #tpu.pipeline_mode<synchronous>, transform_indices = @transform_2, window_bounds = array<i64: 1, 64>}, {transform_indices = @transform_3, window_bounds = array<i64: 32, 64>}]} {
    %c0 = arith.constant 0 : index
    %c0_0 = arith.constant 0 : index
    %0 = vector.load %arg1[%c0, %c0_0] : memref<32x1024xbf16, #tpu.memory_space<vmem>>, vector<32x1024xbf16>
    %c0_1 = arith.constant 0 : index
    %c0_2 = arith.constant 0 : index
    %1 = vector.load %arg2[%c0_1, %c0_2] : memref<1024x64xbf16, #tpu.memory_space<vmem>>, vector<1024x64xbf16>
    %cst = arith.constant dense<0.000000e+00> : vector<32x64xf32>
    %2 = tpu.matmul %0, %1, %cst {dimension_numbers = #tpu.dot_dimension_numbers<[1], [0], [0], [1], [0, 0, 1, 1], [], []>} : vector<32x1024xbf16>, vector<1024x64xbf16>, vector<32x64xf32> -> vector<32x64xf32>
    %c0_3 = arith.constant 0 : index
    %c0_4 = arith.constant 0 : index
    %3 = vector.load %arg3[%c0_3, %c0_4] : memref<1x64xf32, #tpu.memory_space<vmem>>, vector<1x64xf32>
    %4 = vector.broadcast %3 : vector<1x64xf32> to vector<32x64xf32>
    %5 = arith.addf %2, %4 : vector<32x64xf32>
    %cst_5 = arith.constant 0.000000e+00 : f32
    %6 = vector.broadcast %cst_5 : f32 to vector<32x64xf32>
    %7 = arith.cmpf oge, %5, %6 : vector<32x64xf32>
    %cst_6 = arith.constant 1.000000e-01 : f32
    %8 = vector.broadcast %cst_6 : f32 to vector<32x64xf32>
    %9 = arith.mulf %8, %5 : vector<32x64xf32>
    %10 = arith.select %7, %5, %9 : vector<32x64xi1>, vector<32x64xf32>
    %11 = arith.truncf %10 : vector<32x64xf32> to vector<32x64xbf16>
    %c0_7 = arith.constant 0 : index
    %c0_8 = arith.constant 0 : index
    %12 = vector.load %arg4[%c0_7, %c0_8] : memref<32x64xbf16, #tpu.memory_space<vmem>>, vector<32x64xbf16>
    tpu.vector_store %arg4[%c0_7, %c0_8], %11 {strides = array<i32>} : memref<32x64xbf16, #tpu.memory_space<vmem>>, vector<32x64xbf16>,
    return
  }
  func.func @transform_0(%arg0: i32) -> (i32, i32) {
    %c0_i32 = arith.constant 0 : i32
    %c0_i32_0 = arith.constant 0 : i32
    return %arg0, %c0_i32 : i32, i32
  }
  func.func @transform_1(%arg0: i32) -> (i32, i32) {
    %c0_i32 = arith.constant 0 : i32
    %c0_i32_0 = arith.constant 0 : i32
    %c0_i32_1 = arith.constant 0 : i32
    return %c0_i32, %c0_i32_0 : i32, i32
  }
  func.func @transform_2(%arg0: i32) -> (i32, i32) {
    %c0_i32 = arith.constant 0 : i32
    %c0_i32_0 = arith.constant 0 : i32
    %c0_i32_1 = arith.constant 0 : i32
    return %c0_i32, %c0_i32_0 : i32, i32
  }
  func.func @transform_3(%arg0: i32) -> (i32, i32) {
    %c0_i32 = arith.constant 0 : i32
    %c0_i32_0 = arith.constant 0 : i32
    return %arg0, %c0_i32 : i32, i32
  }
}

module attributes {stable_mosaic.version = 11 : i64} {
  func.func @_head_kernel(%arg0: memref<2x1024xbf16, #tpu.memory_space<vmem>>, %arg1: memref<1024x128xbf16, #tpu.memory_space<vmem>>, %arg2: memref<1x128xf32, #tpu.memory_space<vmem>>, %arg3: memref<128x129xbf16, #tpu.memory_space<vmem>>, %arg4: memref<1x129xf32, #tpu.memory_space<vmem>>, %arg5: memref<128x13xbf16, #tpu.memory_space<vmem>>, %arg6: memref<1x13xf32, #tpu.memory_space<vmem>>, %arg7: memref<2x1xf32, #tpu.memory_space<vmem>>, %arg8: memref<2x3xf32, #tpu.memory_space<vmem>>, %arg9: memref<2x10xf32, #tpu.memory_space<vmem>>) attributes {dimension_semantics = [], scalar_prefetch = 0 : i64, scratch_operands = 0 : i64, tpu.core_type = #tpu.core_type<tc>} {
    %c0 = arith.constant 0 : index
    %c0_0 = arith.constant 0 : index
    %0 = vector.load %arg0[%c0, %c0_0] : memref<2x1024xbf16, #tpu.memory_space<vmem>>, vector<2x1024xbf16>
    %c0_1 = arith.constant 0 : index
    %c0_2 = arith.constant 0 : index
    %1 = vector.load %arg1[%c0_1, %c0_2] : memref<1024x128xbf16, #tpu.memory_space<vmem>>, vector<1024x128xbf16>
    %cst = arith.constant dense<0.000000e+00> : vector<2x128xf32>
    %2 = tpu.matmul %0, %1, %cst {dimension_numbers = #tpu.dot_dimension_numbers<[1], [0], [0], [1], [0, 0, 1, 1], [], []>} : vector<2x1024xbf16>, vector<1024x128xbf16>, vector<2x128xf32> -> vector<2x128xf32>
    %c0_3 = arith.constant 0 : index
    %c0_4 = arith.constant 0 : index
    %3 = vector.load %arg2[%c0_3, %c0_4] : memref<1x128xf32, #tpu.memory_space<vmem>>, vector<1x128xf32>
    %4 = vector.broadcast %3 : vector<1x128xf32> to vector<2x128xf32>
    %5 = arith.addf %2, %4 : vector<2x128xf32>
    %cst_5 = arith.constant 0.000000e+00 : f32
    %6 = vector.broadcast %cst_5 : f32 to vector<2x128xf32>
    %7 = arith.cmpf oge, %5, %6 : vector<2x128xf32>
    %cst_6 = arith.constant 1.000000e-01 : f32
    %8 = vector.broadcast %cst_6 : f32 to vector<2x128xf32>
    %9 = arith.mulf %8, %5 : vector<2x128xf32>
    %10 = arith.select %7, %5, %9 : vector<2x128xi1>, vector<2x128xf32>
    %11 = arith.truncf %10 : vector<2x128xf32> to vector<2x128xbf16>
    %c0_7 = arith.constant 0 : index
    %c0_8 = arith.constant 0 : index
    %12 = vector.load %arg3[%c0_7, %c0_8] : memref<128x129xbf16, #tpu.memory_space<vmem>>, vector<128x129xbf16>
    %cst_9 = arith.constant dense<0.000000e+00> : vector<2x129xf32>
    %13 = tpu.matmul %11, %12, %cst_9 {dimension_numbers = #tpu.dot_dimension_numbers<[1], [0], [0], [1], [0, 0, 1, 1], [], []>} : vector<2x128xbf16>, vector<128x129xbf16>, vector<2x129xf32> -> vector<2x129xf32>
    %c0_10 = arith.constant 0 : index
    %c0_11 = arith.constant 0 : index
    %14 = vector.load %arg4[%c0_10, %c0_11] : memref<1x129xf32, #tpu.memory_space<vmem>>, vector<1x129xf32>
    %15 = vector.broadcast %14 : vector<1x129xf32> to vector<2x129xf32>
    %16 = arith.addf %13, %15 : vector<2x129xf32>
    %17 = vector.extract_strided_slice %16 {offsets = [0, 0], sizes = [2, 1], strides = [1, 1]} : vector<2x129xf32> to vector<2x1xf32>
    %cst_12 = arith.constant 0.000000e+00 : f32
    %18 = vector.broadcast %cst_12 : f32 to vector<2x1xf32>
    %19 = arith.subf %18, %17 : vector<2x1xf32>
    %20 = math.exp %19 : vector<2x1xf32>
    %cst_13 = arith.constant 1.000000e+00 : f32
    %21 = vector.broadcast %cst_13 : f32 to vector<2x1xf32>
    %22 = arith.addf %21, %20 : vector<2x1xf32>
    %cst_14 = arith.constant 1.000000e+00 : f32
    %23 = vector.broadcast %cst_14 : f32 to vector<2x1xf32>
    %24 = arith.divf %23, %22 : vector<2x1xf32>
    %c0_15 = arith.constant 0 : index
    %c0_16 = arith.constant 0 : index
    %25 = vector.load %arg7[%c0_15, %c0_16] : memref<2x1xf32, #tpu.memory_space<vmem>>, vector<2x1xf32>
    tpu.vector_store %arg7[%c0_15, %c0_16], %24 {strides = array<i32>} : memref<2x1xf32, #tpu.memory_space<vmem>>, vector<2x1xf32>,
    %26 = vector.extract_strided_slice %16 {offsets = [0, 1], sizes = [2, 128], strides = [1, 1]} : vector<2x129xf32> to vector<2x128xf32>
    %cst_17 = arith.constant 0.000000e+00 : f32
    %27 = vector.broadcast %cst_17 : f32 to vector<2x128xf32>
    %28 = arith.cmpf oge, %26, %27 : vector<2x128xf32>
    %cst_18 = arith.constant 1.000000e-01 : f32
    %29 = vector.broadcast %cst_18 : f32 to vector<2x128xf32>
    %30 = arith.mulf %29, %26 : vector<2x128xf32>
    %31 = arith.select %28, %26, %30 : vector<2x128xi1>, vector<2x128xf32>
    %32 = arith.truncf %31 : vector<2x128xf32> to vector<2x128xbf16>
    %c0_19 = arith.constant 0 : index
    %c0_20 = arith.constant 0 : index
    %33 = vector.load %arg5[%c0_19, %c0_20] : memref<128x13xbf16, #tpu.memory_space<vmem>>, vector<128x13xbf16>
    %cst_21 = arith.constant dense<0.000000e+00> : vector<2x13xf32>
    %34 = tpu.matmul %32, %33, %cst_21 {dimension_numbers = #tpu.dot_dimension_numbers<[1], [0], [0], [1], [0, 0, 1, 1], [], []>} : vector<2x128xbf16>, vector<128x13xbf16>, vector<2x13xf32> -> vector<2x13xf32>
    %c0_22 = arith.constant 0 : index
    %c0_23 = arith.constant 0 : index
    %35 = vector.load %arg6[%c0_22, %c0_23] : memref<1x13xf32, #tpu.memory_space<vmem>>, vector<1x13xf32>
    %36 = vector.broadcast %35 : vector<1x13xf32> to vector<2x13xf32>
    %37 = arith.addf %34, %36 : vector<2x13xf32>
    %38 = vector.extract_strided_slice %37 {offsets = [0, 0], sizes = [2, 3], strides = [1, 1]} : vector<2x13xf32> to vector<2x3xf32>
    %c0_24 = arith.constant 0 : index
    %c0_25 = arith.constant 0 : index
    %39 = vector.load %arg8[%c0_24, %c0_25] : memref<2x3xf32, #tpu.memory_space<vmem>>, vector<2x3xf32>
    tpu.vector_store %arg8[%c0_24, %c0_25], %38 {strides = array<i32>} : memref<2x3xf32, #tpu.memory_space<vmem>>, vector<2x3xf32>,
    %40 = vector.extract_strided_slice %37 {offsets = [0, 3], sizes = [2, 10], strides = [1, 1]} : vector<2x13xf32> to vector<2x10xf32>
    %41 = vector.extract_strided_slice %40 {offsets = [0, 0], sizes = [2, 5], strides = [1, 1]} : vector<2x10xf32> to vector<2x5xf32>
    %cst_26 = arith.constant dense<0xFF800000> : vector<2xf32>
    %42 = vector.multi_reduction <maximumf>, %41, %cst_26 [1] : vector<2x5xf32> to vector<2xf32>
    %43 = vector.shape_cast %42 : vector<2xf32> to vector<2x1xf32>
    %44 = vector.broadcast %43 : vector<2x1xf32> to vector<2x5xf32>
    %45 = arith.subf %41, %44 : vector<2x5xf32>
    %46 = math.exp %45 : vector<2x5xf32>
    %cst_27 = arith.constant dense<0.000000e+00> : vector<2xf32>
    %47 = vector.multi_reduction <add>, %46, %cst_27 [1] : vector<2x5xf32> to vector<2xf32>
    %48 = vector.shape_cast %47 : vector<2xf32> to vector<2x1xf32>
    %49 = vector.broadcast %48 : vector<2x1xf32> to vector<2x5xf32>
    %50 = arith.divf %46, %49 : vector<2x5xf32>
    %51 = vector.extract_strided_slice %40 {offsets = [0, 5], sizes = [2, 5], strides = [1, 1]} : vector<2x10xf32> to vector<2x5xf32>
    %cst_28 = arith.constant dense<0xFF800000> : vector<2xf32>
    %52 = vector.multi_reduction <maximumf>, %51, %cst_28 [1] : vector<2x5xf32> to vector<2xf32>
    %53 = vector.shape_cast %52 : vector<2xf32> to vector<2x1xf32>
    %54 = vector.broadcast %53 : vector<2x1xf32> to vector<2x5xf32>
    %55 = arith.subf %51, %54 : vector<2x5xf32>
    %56 = math.exp %55 : vector<2x5xf32>
    %cst_29 = arith.constant dense<0.000000e+00> : vector<2xf32>
    %57 = vector.multi_reduction <add>, %56, %cst_29 [1] : vector<2x5xf32> to vector<2xf32>
    %58 = vector.shape_cast %57 : vector<2xf32> to vector<2x1xf32>
    %59 = vector.broadcast %58 : vector<2x1xf32> to vector<2x5xf32>
    %60 = arith.divf %56, %59 : vector<2x5xf32>
    %61 = tpu.concatenate %50, %60 in 1 : vector<2x5xf32>, vector<2x5xf32> -> vector<2x10xf32>
    %c0_30 = arith.constant 0 : index
    %c0_31 = arith.constant 0 : index
    %62 = vector.load %arg9[%c0_30, %c0_31] : memref<2x10xf32, #tpu.memory_space<vmem>>, vector<2x10xf32>
    tpu.vector_store %arg9[%c0_30, %c0_31], %61 {strides = array<i32>} : memref<2x10xf32, #tpu.memory_space<vmem>>, vector<2x10xf32>,
    return
  }
}

</mosaic_0001>

<bundles_post_ra>
// kernel: discriminator_forward.5
= control target key start
LH: loop header
LB: loop body
LE: loop exit
PB: predicated region body
PF: predicated region fallthrough
CT: control target
= control target key end

     0   :  { %s3153_s12 = smov 0   ;;  %s3969_s0 = inlined_call_operand.vmem [shape: bf16[2048,16], index: 0, kind: input, shape index: {}]   ;;  %s3970_s1 = inlined_call_operand.vmem [shape: bf16[16,32], index: 1, kind: input, shape index: {}]   ;;  %s3971_s2 = inlined_call_operand.vmem [shape: f32[1,32], index: 2, kind: input, shape index: {}]   ;;  %s3972_s3 = inlined_call_operand.vmem [shape: bf16[2048,32], index: 3, kind: output, shape index: {}]  }
   0x1 LB: > { %s2457_s13 = sadd.s32 4294967295, %s3131_s12   ;;  %p2461_p0 = scmp.ge.s32.totalorder %s3131_s12, 1  ;;  %s3131_s12 = sphi %s3153_s12, %s13_s12  }
   0x2   : > { %p138_p1 = scmp.lt.s32.totalorder %s3131_s12, 3 }
   0x4   : > { %p139_p2 = pnand %p2461_p0, %p138_p1 }
   0x5   : > { %v3059_v0 = vld [vmem:[%s3970_s1] sm:$0xff] (!%p139_p2)   ;;  %s2462_s16 = sshll.u32 (!%p139_p2), %s2457_s13, 7  ;;  %vm638_vm0 = vcmask (!%p139_p2), 130048   ;;  %vm2272_vm1 = vcmask (!%p139_p2), 257024  }
   0x6   : > { %142 = sbr.rel (%p139_p2) target bundleno = 397 (0x18d), region = 32  ;;  %p163_p3 = scmp.lt.s32.totalorder (!%p139_p2), %s2462_s16, 255  ;;  %2919 = vmatprep.subr.bf16.mxu0 (!%p139_p2), %v3059_v0  ;;  %3049 = vmatprep.subr.bf16.mxu1 (!%p139_p2), %v3059_v0 }
   0x7   : > { %2920 = vmatpush3.bf16.msra.mxu0 (!%p139_p2), %v3059_v0  ;;  %3050 = vmatpush3.bf16.msra.mxu1 (!%p139_p2), %v3059_v0 }
   0xd   : > { %s3974_s16 = smov (!%p163_p3, %s2462_s16), 255 }
   0xe   : > { %s2463_s17 = sshll.u32 %s3974_s16, 2 }
   0xf   : > { %s3172_s20 = scalar_lea.vmem %s3969_s0, %s2463_s17  ;;  %s3317_s25 = scalar_lea.vmem %s3972_s3, %s2463_s17 }
  0x10   : > { %v3060_v1 = vld [vmem:[%s3172_s20] sm:$0xff]   ;;  %v3062_v3 = vld [vmem:[%s3172_s20 + $0x8] sm:$0xff]   ;;  %v3064_v5 = vld [vmem:[%s3172_s20 + $0x10] sm:$0xff]  }
  0x11   : > { %v3061_v2 = vld [vmem:[%s3172_s20 + $0x100] sm:$0xff]   ;;  %2921 = vmatprep.mubr.msk.bf16.mxu0 %vm638_vm0, %v3060_v1  ;;  %v3063_v4 = vld [vmem:[%s3172_s20 + $0x108] sm:$0xff]   ;;  %v3065_v6 = vld [vmem:[%s3172_s20 + $0x110] sm:$0xff]  }
  0x12   : > { %2985 = vmatprep.mubr.msk.bf16.mxu1 %vm638_vm0, %v3061_v2  ;;  %2922 = vmatmul.mubr.msk.bf16.vlgmr.msra.gmra.mrb[0].mxu0 %vm638_vm0, %v3062_v3  ;;  %v3066_v7 = vld [vmem:[%s3172_s20 + $0x18] sm:$0xff]   ;;  %v3068_v9 = vld [vmem:[%s3172_s20 + $0x20] sm:$0xff]   ;;  %v3070_v11 = vld [vmem:[%s3172_s20 + $0x28] sm:$0xff]  }
  0x13   : > { %2986 = vmatmul.mubr.msk.bf16.vlgmr.msra.gmra.mrb[0].mxu1 %vm638_vm0, %v3063_v4  ;;  %2925 = vmatprep.mubr.msk.bf16.mxu0 %vm638_vm0, %v3064_v5  ;;  %v3067_v8 = vld [vmem:[%s3172_s20 + $0x118] sm:$0xff]   ;;  %v3069_v10 = vld [vmem:[%s3172_s20 + $0x120] sm:$0xff]   ;;  %v3071_v12 = vld [vmem:[%s3172_s20 + $0x128] sm:$0xff]  }
  0x14   : > { %2989 = vmatprep.mubr.msk.bf16.mxu1 %vm638_vm0, %v3065_v6  ;;  %v3072_v13 = vld [vmem:[%s3172_s20 + $0x30] sm:$0xff]   ;;  %v3074_v15 = vld [vmem:[%s3172_s20 + $0x38] sm:$0xff]   ;;  %v3076_v17 = vld [vmem:[%s3172_s20 + $0x40] sm:$0xff]  }
  0x15   : > { %v3073_v14 = vld [vmem:[%s3172_s20 + $0x130] sm:$0xff]   ;;  %v3075_v16 = vld [vmem:[%s3172_s20 + $0x138] sm:$0xff]   ;;  %v3077_v18 = vld [vmem:[%s3172_s20 + $0x140] sm:$0xff]  }
  0x16   : > { %v3078_v19 = vld [vmem:[%s3172_s20 + $0x48] sm:$0xff]   ;;  %v3080_v21 = vld [vmem:[%s3172_s20 + $0x50] sm:$0xff]   ;;  %v3082_v23 = vld [vmem:[%s3172_s20 + $0x58] sm:$0xff]  }
  0x17   : > { %v3079_v20 = vld [vmem:[%s3172_s20 + $0x148] sm:$0xff]   ;;  %v3081_v22 = vld [vmem:[%s3172_s20 + $0x150] sm:$0xff]   ;;  %v3083_v24 = vld [vmem:[%s3172_s20 + $0x158] sm:$0xff]  }
  0x18   : > { %v3084_v25 = vld [vmem:[%s3172_s20 + $0x60] sm:$0xff]   ;;  %v3086_v27 = vld [vmem:[%s3172_s20 + $0x68] sm:$0xff]   ;;  %v3088_v29 = vld [vmem:[%s3172_s20 + $0x70] sm:$0xff]  }
  0x19   : > { %v3085_v26 = vld [vmem:[%s3172_s20 + $0x160] sm:$0xff]   ;;  %v3087_v28 = vld [vmem:[%s3172_s20 + $0x168] sm:$0xff]   ;;  %v3089_v30 = vld [vmem:[%s3172_s20 + $0x170] sm:$0xff]  }
  0x1a   : > { %2926 = vmatmul.mubr.msk.bf16.gmra.mrb[4].mxu0 %vm638_vm0, %v3066_v7  ;;  %v3090_v31 = vld [vmem:[%s3172_s20 + $0x78] sm:$0xff]   ;;  %v3092_v33 = vld [vmem:[%s3172_s20 + $0x80] sm:$0xff]   ;;  %v3094_v35 = vld [vmem:[%s3172_s20 + $0x88] sm:$0xff]  }
  0x1b   : > { %2990 = vmatmul.mubr.msk.bf16.gmra.mrb[4].mxu1 %vm638_vm0, %v3067_v8  ;;  %2929 = vmatprep.mubr.msk.bf16.mxu0 %vm638_vm0, %v3068_v9  ;;  %v3091_v32 = vld [vmem:[%s3172_s20 + $0x178] sm:$0xff]   ;;  %v3093_v34 = vld [vmem:[%s3172_s20 + $0x180] sm:$0xff]   ;;  %v3095_v36 = vld [vmem:[%s3172_s20 + $0x188] sm:$0xff]  }
  0x1c   : > { %2993 = vmatprep.mubr.msk.bf16.mxu1 %vm638_vm0, %v3069_v10  ;;  %v3096_v37 = vld [vmem:[%s3172_s20 + $0x90] sm:$0xff]   ;;  %v3098_v39 = vld [vmem:[%s3172_s20 + $0x98] sm:$0xff]   ;;  %v3100_v41 = vld [vmem:[%s3172_s20 + $0xa0] sm:$0xff]  }
  0x1d   : > { %v3097_v38 = vld [vmem:[%s3172_s20 + $0x190] sm:$0xff]   ;;  %v3099_v40 = vld [vmem:[%s3172_s20 + $0x198] sm:$0xff]   ;;  %v3101_v42 = vld [vmem:[%s3172_s20 + $0x1a0] sm:$0xff]  }
  0x1e   : > { %v3102_v43 = vld [vmem:[%s3172_s20 + $0xa8] sm:$0xff]   ;;  %v3104_v45 = vld [vmem:[%s3172_s20 + $0xb0] sm:$0xff]   ;;  %v3106_v47 = vld [vmem:[%s3172_s20 + $0xb8] sm:$0xff]  }
  0x1f   : > { %v3103_v44 = vld [vmem:[%s3172_s20 + $0x1a8] sm:$0xff]   ;;  %v3105_v46 = vld [vmem:[%s3172_s20 + $0x1b0] sm:$0xff]   ;;  %v3107_v48 = vld [vmem:[%s3172_s20 + $0x1b8] sm:$0xff]  }
  0x20   : > { %v3108_v49 = vld [vmem:[%s3172_s20 + $0xc0] sm:$0xff]   ;;  %v3110_v51 = vld [vmem:[%s3172_s20 + $0xc8] sm:$0xff]   ;;  %v3112_v53 = vld [vmem:[%s3172_s20 + $0xd0] sm:$0xff]  }
  0x21   : > { %v3109_v50 = vld [vmem:[%s3172_s20 + $0x1c0] sm:$0xff]   ;;  %v3111_v52 = vld [vmem:[%s3172_s20 + $0x1c8] sm:$0xff]   ;;  %v3113_v54 = vld [vmem:[%s3172_s20 + $0x1d0] sm:$0xff]  }
  0x22   : > { %2930 = vmatmul.mubr.msk.bf16.gmra.mrb[8].mxu0 %vm638_vm0, %v3070_v11  ;;  %v3114_v55 = vld [vmem:[%s3172_s20 + $0xd8] sm:$0xff]   ;;  %v3116_v57 = vld [vmem:[%s3172_s20 + $0xe0] sm:$0xff]   ;;  %v3118_v59 = vld [vmem:[%s3172_s20 + $0xe8] sm:$0xff]  }
  0x23   : > { %2994 = vmatmul.mubr.msk.bf16.gmra.mrb[8].mxu1 %vm638_vm0, %v3071_v12  ;;  %2933 = vmatprep.mubr.msk.bf16.mxu0 %vm638_vm0, %v3072_v13  ;;  %v3115_v56 = vld [vmem:[%s3172_s20 + $0x1d8] sm:$0xff]   ;;  %v3117_v58 = vld [vmem:[%s3172_s20 + $0x1e0] sm:$0xff]   ;;  %v3119_v60 = vld [vmem:[%s3172_s20 + $0x1e8] sm:$0xff]  }
  0x24   : > { %2997 = vmatprep.mubr.msk.bf16.mxu1 %vm638_vm0, %v3073_v14  ;;  %v3120_v61 = vld [vmem:[%s3172_s20 + $0xf0] sm:$0xff]   ;;  %v3122_v63 = vld [vmem:[%s3172_s20 + $0xf8] sm:$0xff]   ;;  %v3305_v1 = vld [vmem:[%s3971_s2] ss:$0 sm:$0xff] }
  0x25   : > { %v3121_v62 = vld [vmem:[%s3172_s20 + $0x1f0] sm:$0xff]   ;;  %v3123_v0 = vld [vmem:[%s3172_s20 + $0x1f8] sm:$0xff]  }
  0x2a   : > { %2934 = vmatmul.mubr.msk.bf16.gmra.mrb[12].mxu0 %vm638_vm0, %v3074_v15 }
  0x2b   : > { %2998 = vmatmul.mubr.msk.bf16.gmra.mrb[12].mxu1 %vm638_vm0, %v3075_v16  ;;  %2937 = vmatprep.mubr.msk.bf16.mxu0 %vm638_vm0, %v3076_v17 }
  0x2c   : > { %3001 = vmatprep.mubr.msk.bf16.mxu1 %vm638_vm0, %v3077_v18 }
  0x32   : > { %2938 = vmatmul.mubr.msk.bf16.gmra.mrb[16].mxu0 %vm638_vm0, %v3078_v19 }
  0x33   : > { %3002 = vmatmul.mubr.msk.bf16.gmra.mrb[16].mxu1 %vm638_vm0, %v3079_v20  ;;  %2941 = vmatprep.mubr.msk.bf16.mxu0 %vm638_vm0, %v3080_v21 }
  0x34   : > { %3005 = vmatprep.mubr.msk.bf16.mxu1 %vm638_vm0, %v3081_v22 }
  0x3a   : > { %2942 = vmatmul.mubr.msk.bf16.gmra.mrb[20].mxu0 %vm638_vm0, %v3082_v23 }
  0x3b   : > { %3006 = vmatmul.mubr.msk.bf16.gmra.mrb[20].mxu1 %vm638_vm0, %v3083_v24  ;;  %2945 = vmatprep.mubr.msk.bf16.mxu0 %vm638_vm0, %v3084_v25 }
  0x3c   : > { %3009 = vmatprep.mubr.msk.bf16.mxu1 %vm638_vm0, %v3085_v26 }
  0x42   : > { %2946 = vmatmul.mubr.msk.bf16.gmra.mrb[24].mxu0 %vm638_vm0, %v3086_v27 }
  0x43   : > { %3010 = vmatmul.mubr.msk.bf16.gmra.mrb[24].mxu1 %vm638_vm0, %v3087_v28  ;;  %2949 = vmatprep.mubr.msk.bf16.mxu0 %vm638_vm0, %v3088_v29 }
  0x44   : > { %3013 = vmatprep.mubr.msk.bf16.mxu1 %vm638_vm0, %v3089_v30 }
  0x4a   : > { %2950 = vmatmul.mubr.msk.bf16.gmra.mrb[28].mxu0 %vm638_vm0, %v3090_v31 }
  0x4b   : > { %3014 = vmatmul.mubr.msk.bf16.gmra.mrb[28].mxu1 %vm638_vm0, %v3091_v32  ;;  %2953 = vmatprep.mubr.msk.bf16.mxu0 %vm638_vm0, %v3092_v33 }
  0x4c   : > { %3017 = vmatprep.mubr.msk.bf16.mxu1 %vm638_vm0, %v3093_v34 }
  0x52   : > { %2954 = vmatmul.mubr.msk.bf16.gmra.mrb[32].mxu0 %vm638_vm0, %v3094_v35 }
  0x53   : > { %3018 = vmatmul.mubr.msk.bf16.gmra.mrb[32].mxu1 %vm638_vm0, %v3095_v36  ;;  %2957 = vmatprep.mubr.msk.bf16.mxu0 %vm638_vm0, %v3096_v37 }
  0x54   : > { %3021 = vmatprep.mubr.msk.bf16.mxu1 %vm638_vm0, %v3097_v38 }
  0x5a   : > { %2958 = vmatmul.mubr.msk.bf16.gmra.mrb[36].mxu0 %vm638_vm0, %v3098_v39 }
  0x5b   : > { %3022 = vmatmul.mubr.msk.bf16.gmra.mrb[36].mxu1 %vm638_vm0, %v3099_v40  ;;  %2961 = vmatprep.mubr.msk.bf16.mxu0 %vm638_vm0, %v3100_v41 }
  0x5c   : > { %3025 = vmatprep.mubr.msk.bf16.mxu1 %vm638_vm0, %v3101_v42 }
  0x62   : > { %2962 = vmatmul.mubr.msk.bf16.gmra.mrb[40].mxu0 %vm638_vm0, %v3102_v43 }
  0x63   : > { %3026 = vmatmul.mubr.msk.bf16.gmra.mrb[40].mxu1 %vm638_vm0, %v3103_v44  ;;  %2965 = vmatprep.mubr.msk.bf16.mxu0 %vm638_vm0, %v3104_v45 }
  0x64   : > { %3029 = vmatprep.mubr.msk.bf16.mxu1 %vm638_vm0, %v3105_v46 }
  0x6a   : > { %2966 = vmatmul.mubr.msk.bf16.gmra.mrb[44].mxu0 %vm638_vm0, %v3106_v47 }
  0x6b   : > { %3030 = vmatmul.mubr.msk.bf16.gmra.mrb[44].mxu1 %vm638_vm0, %v3107_v48  ;;  %2969 = vmatprep.mubr.msk.bf16.mxu0 %vm638_vm0, %v3108_v49 }
  0x6c   : > { %3033 = vmatprep.mubr.msk.bf16.mxu1 %vm638_vm0, %v3109_v50 }
  0x72   : > { %2970 = vmatmul.mubr.msk.bf16.gmra.mrb[48].mxu0 %vm638_vm0, %v3110_v51 }
  0x73   : > { %3034 = vmatmul.mubr.msk.bf16.gmra.mrb[48].mxu1 %vm638_vm0, %v3111_v52  ;;  %2973 = vmatprep.mubr.msk.bf16.mxu0 %vm638_vm0, %v3112_v53 }
  0x74   : > { %3037 = vmatprep.mubr.msk.bf16.mxu1 %vm638_vm0, %v3113_v54 }
  0x7a   : > { %2974 = vmatmul.mubr.msk.bf16.gmra.mrb[52].mxu0 %vm638_vm0, %v3114_v55 }
  0x7b   : > { %3038 = vmatmul.mubr.msk.bf16.gmra.mrb[52].mxu1 %vm638_vm0, %v3115_v56  ;;  %2977 = vmatprep.mubr.msk.bf16.mxu0 %vm638_vm0, %v3116_v57 }
  0x7c   : > { %3041 = vmatprep.mubr.msk.bf16.mxu1 %vm638_vm0, %v3117_v58 }
  0x82   : > { %2978 = vmatmul.mubr.msk.bf16.gmra.mrb[56].mxu0 %vm638_vm0, %v3118_v59 }
  0x83   : > { %3042 = vmatmul.mubr.msk.bf16.gmra.mrb[56].mxu1 %vm638_vm0, %v3119_v60  ;;  %2981 = vmatprep.mubr.msk.bf16.mxu0 %vm638_vm0, %v3120_v61 }
  0x84   : > { %3045 = vmatprep.mubr.msk.bf16.mxu1 %vm638_vm0, %v3121_v62 }
  0x8a   : > { %2982 = vmatmul.mubr.msk.bf16.gmra.mrb[60].mxu0 %vm638_vm0, %v3122_v63 }
  0x8b   : > { %3046 = vmatmul.mubr.msk.bf16.gmra.mrb[60].mxu1 %vm638_vm0, %v3123_v0 }
  0xe5   : > { %v2923_v2 = vpop.f32.mrb[0].mxu0 }
  0xe6   : > { %v874_v3 = vadd.f32 %v2923_v2, %v3305_v1  ;;  %v2987_v4 = vpop.f32.mrb[0].mxu1  ;;  %v865_v5 = vpop.f32.mrb[1].mxu0 }
  0xe7   : > { %v1130_v6 = vadd.f32 %v2987_v4, %v3305_v1  ;;  %v866_v7 = vadd.f32 %v3305_v1, %v865_v5  ;;  %v1121_v8 = vpop.f32.mrb[1].mxu1  ;;  %v2924_v9 = vpop.f32.mrb[2].mxu0 }
  0xe8   : > { %vm1378_vm2 = vcmp.ge.f32.partialorder %v874_v3, 0.0  ;;  %v1506_v10 = vmul.f32 0.1, %v874_v3  ;;  %v1122_v11 = vadd.f32 %v3305_v1, %v1121_v8  ;;  %v877_v12 = vadd.f32 %v2924_v9, %v3305_v1  ;;  %v2988_v13 = vpop.f32.mrb[2].mxu1  ;;  %v868_v14 = vpop.f32.mrb[3].mxu0 }
  0xe9   : > { %vm1442_vm3 = vcmp.ge.f32.partialorder %v1130_v6, 0.0  ;;  %v1570_v15 = vmul.f32 0.1, %v1130_v6  ;;  %vm1376_vm4 = vcmp.ge.f32.partialorder %v866_v7, 0.0  ;;  %v1504_v16 = vmul.f32 0.1, %v866_v7 }
  0xea   : > { %v1634_v17 = vsel %vm1378_vm2, %v874_v3, %v1506_v10  ;;  %vm1440_vm5 = vcmp.ge.f32.partialorder %v1122_v11, 0.0  ;;  %v1568_v18 = vmul.f32 0.1, %v1122_v11  ;;  %vm1379_vm6 = vcmp.ge.f32.partialorder %v877_v12, 0.0  ;;  %v1124_v19 = vpop.f32.mrb[3].mxu1 }
  0xeb   : > { %v2728_v20 = vpack.c.bf16 %v1634_v17, %v1634_v17  ;;  %v1698_v21 = vsel %vm1442_vm3, %v1130_v6, %v1570_v15  ;;  %v1632_v22 = vsel %vm1376_vm4, %v866_v7, %v1504_v16  ;;  %v1507_v23 = vmul.f32 0.1, %v877_v12 }
  0xec   : > { %v2792_v24 = vpack.c.bf16 %v1698_v21, %v1698_v21  ;;  %v2726_v25 = vpack.c.bf16 %v1632_v22, %v1632_v22  ;;  %v1696_v26 = vsel %vm1440_vm5, %v1122_v11, %v1568_v18  ;;  %v1133_v27 = vadd.f32 %v2988_v13, %v3305_v1 }
  0xed   : > { %2275 = vst.msk [vmem:[%s3317_s25 + $0x8] sm:$0xf] %vm2272_vm1, %v2728_v20  ;;  %v2790_v28 = vpack.c.bf16 %v1696_v26, %v1696_v26  ;;  %v1635_v29 = vsel %vm1379_vm6, %v877_v12, %v1507_v23  ;;  %v869_v30 = vadd.f32 %v3305_v1, %v868_v14  ;;  %v1125_v31 = vadd.f32 %v3305_v1, %v1124_v19  ;;  %v2927_v32 = vpop.f32.mrb[4].mxu0 }
  0xee   : > { %2339 = vst.msk [vmem:[%s3317_s25 + $0x108] sm:$0xf] %vm2272_vm1, %v2792_v24  ;;  %2273 = vst.msk [vmem:[%s3317_s25] sm:$0xf] %vm2272_vm1, %v2726_v25  ;;  %v2729_v33 = vpack.c.bf16 %v1635_v29, %v1635_v29  ;;  %vm1443_vm7 = vcmp.ge.f32.partialorder %v1133_v27, 0.0  ;;  %v890_v35 = vadd.f32 %v2927_v32, %v3305_v1  ;;  %v2991_v36 = vpop.f32.mrb[4].mxu1 }
  0xef   : > { %v1571_v34 = vmul.f32 0.1, %v1133_v27  ;;  %v881_v37 = vpop.f32.mrb[5].mxu0  ;;  %2337 = vst.msk [vmem:[%s3317_s25 + $0x100] sm:$0xf] %vm2272_vm1, %v2790_v28  ;;  %vm1377_vm8 = vcmp.ge.f32.partialorder %v869_v30, 0.0  ;;  %v1146_v42 = vadd.f32 %v2991_v36, %v3305_v1 }
  0xf0   : > { %v1505_v38 = vmul.f32 0.1, %v869_v30  ;;  %vm1441_vm9 = vcmp.ge.f32.partialorder %v1125_v31, 0.0  ;;  %v1569_v39 = vmul.f32 0.1, %v1125_v31  ;;  %vm1382_vm10 = vcmp.ge.f32.partialorder %v890_v35, 0.0 }
  0xf1   : > { %2276 = vst.msk [vmem:[%s3317_s25 + $0xc] sm:$0xf] %vm2272_vm1, %v2729_v33  ;;  %v1699_v40 = vsel %vm1443_vm7, %v1133_v27, %v1571_v34  ;;  %v1510_v41 = vmul.f32 0.1, %v890_v35  ;;  %v1137_v43 = vpop.f32.mrb[5].mxu1  ;;  %v2928_v44 = vpop.f32.mrb[6].mxu0  ;;  %v882_v48 = vadd.f32 %v3305_v1, %v881_v37 }
  0xf2   : > { %v2793_v45 = vpack.c.bf16 %v1699_v40, %v1699_v40  ;;  %v1633_v46 = vsel %vm1377_vm8, %v869_v30, %v1505_v38  ;;  %v1697_v47 = vsel %vm1441_vm9, %v1125_v31, %v1569_v39  ;;  %v2992_v49 = vpop.f32.mrb[6].mxu1  ;;  %v884_v50 = vpop.f32.mrb[7].mxu0  ;;  %vm1446_vm11 = vcmp.ge.f32.partialorder %v1146_v42, 0.0 }
  0xf3   : > { %v2727_v51 = vpack.c.bf16 %v1633_v46, %v1633_v46  ;;  %v2791_v52 = vpack.c.bf16 %v1697_v47, %v1697_v47  ;;  %v1638_v53 = vsel %vm1382_vm10, %v890_v35, %v1510_v41  ;;  %v1140_v54 = vpop.f32.mrb[7].mxu1  ;;  %v1574_v56 = vmul.f32 0.1, %v1146_v42 }
  0xf4   : > { %2340 = vst.msk [vmem:[%s3317_s25 + $0x10c] sm:$0xf] %vm2272_vm1, %v2793_v45  ;;  %v2732_v55 = vpack.c.bf16 %v1638_v53, %v1638_v53  ;;  %vm1380_vm12 = vcmp.ge.f32.partialorder %v882_v48, 0.0  ;;  %v1508_v57 = vmul.f32 0.1, %v882_v48  ;;  %v1138_v58 = vadd.f32 %v3305_v1, %v1137_v43 }
  0xf5   : > { %2274 = vst.msk [vmem:[%s3317_s25 + $0x4] sm:$0xf] %vm2272_vm1, %v2727_v51  ;;  %2338 = vst.msk [vmem:[%s3317_s25 + $0x104] sm:$0xf] %vm2272_vm1, %v2791_v52  ;;  %v893_v59 = vadd.f32 %v2928_v44, %v3305_v1  ;;  %v1149_v60 = vadd.f32 %v2992_v49, %v3305_v1  ;;  %v885_v61 = vadd.f32 %v3305_v1, %v884_v50  ;;  %v2931_v2 = vpop.f32.mrb[8].mxu0 }
  0xf6   : > { %2279 = vst.msk [vmem:[%s3317_s25 + $0x18] sm:$0xf] %vm2272_vm1, %v2732_v55  ;;  %v1702_v62 = vsel %vm1446_vm11, %v1146_v42, %v1574_v56  ;;  %v1636_v63 = vsel %vm1380_vm12, %v882_v48, %v1508_v57  ;;  %v1141_v0 = vadd.f32 %v3305_v1, %v1140_v54  ;;  %vm1444_vm13 = vcmp.ge.f32.partialorder %v1138_v58, 0.0  ;;  %v2995_v6 = vpop.f32.mrb[8].mxu1  ;;  %v897_v7 = vpop.f32.mrb[9].mxu0 }
  0xf7   : > { %v2796_v3 = vpack.c.bf16 %v1702_v62, %v1702_v62  ;;  %v2730_v4 = vpack.c.bf16 %v1636_v63, %v1636_v63  ;;  %v1572_v5 = vmul.f32 0.1, %v1138_v58  ;;  %vm1383_vm14 = vcmp.ge.f32.partialorder %v893_v59, 0.0  ;;  %v1153_v12 = vpop.f32.mrb[9].mxu1  ;;  %v2932_v13 = vpop.f32.mrb[10].mxu0 }
  0xf8   : > { %v1511_v8 = vmul.f32 0.1, %v893_v59  ;;  %vm1447_vm15 = vcmp.ge.f32.partialorder %v1149_v60, 0.0  ;;  %v1575_v9 = vmul.f32 0.1, %v1149_v60  ;;  %vm1381_vm0 = vcmp.ge.f32.partialorder %v885_v61, 0.0 }
  0xf9   : > { %2343 = vst.msk [vmem:[%s3317_s25 + $0x118] sm:$0xf] %vm2272_vm1, %v2796_v3  ;;  %2277 = vst.msk [vmem:[%s3317_s25 + $0x10] sm:$0xf] %vm2272_vm1, %v2730_v4  ;;  %v1700_v10 = vsel %vm1444_vm13, %v1138_v58, %v1572_v5  ;;  %v1509_v11 = vmul.f32 0.1, %v885_v61  ;;  %v906_v23 = vadd.f32 %v2931_v2, %v3305_v1  ;;  %v1162_v27 = vadd.f32 %v2995_v6, %v3305_v1 }
  0xfa   : > { %vm1445_vm2 = vcmp.ge.f32.partialorder %v1141_v0, 0.0  ;;  %v2794_v14 = vpack.c.bf16 %v1700_v10, %v1700_v10  ;;  %v1639_v15 = vsel %vm1383_vm14, %v893_v59, %v1511_v8  ;;  %v1703_v16 = vsel %vm1447_vm15, %v1149_v60, %v1575_v9  ;;  %v2996_v18 = vpop.f32.mrb[10].mxu1  ;;  %v900_v19 = vpop.f32.mrb[11].mxu0 }
  0xfb   : > { %v1573_v17 = vmul.f32 0.1, %v1141_v0  ;;  %v2733_v20 = vpack.c.bf16 %v1639_v15, %v1639_v15  ;;  %v2797_v21 = vpack.c.bf16 %v1703_v16, %v1703_v16  ;;  %v1637_v22 = vsel %vm1381_vm0, %v885_v61, %v1509_v11  ;;  %v1156_v24 = vpop.f32.mrb[11].mxu1 }
  0xfc   : > { %2341 = vst.msk [vmem:[%s3317_s25 + $0x110] sm:$0xf] %vm2272_vm1, %v2794_v14  ;;  %v2731_v25 = vpack.c.bf16 %v1637_v22, %v1637_v22  ;;  %v898_v28 = vadd.f32 %v3305_v1, %v897_v7  ;;  %vm1386_vm3 = vcmp.ge.f32.partialorder %v906_v23, 0.0  ;;  %v1514_v30 = vmul.f32 0.1, %v906_v23 }
  0xfd   : > { %v1701_v26 = vsel %vm1445_vm2, %v1141_v0, %v1573_v17  ;;  %2280 = vst.msk [vmem:[%s3317_s25 + $0x1c] sm:$0xf] %vm2272_vm1, %v2733_v20  ;;  %2344 = vst.msk [vmem:[%s3317_s25 + $0x11c] sm:$0xf] %vm2272_vm1, %v2797_v21  ;;  %v1154_v31 = vadd.f32 %v3305_v1, %v1153_v12  ;;  %vm1450_vm4 = vcmp.ge.f32.partialorder %v1162_v27, 0.0  ;;  %v909_v36 = vadd.f32 %v2932_v13, %v3305_v1  ;;  %v2935_v37 = vpop.f32.mrb[12].mxu0 }
  0xfe   : > { %v2795_v29 = vpack.c.bf16 %v1701_v26, %v1701_v26  ;;  %2278 = vst.msk [vmem:[%s3317_s25 + $0x14] sm:$0xf] %vm2272_vm1, %v2731_v25  ;;  %v1578_v32 = vmul.f32 0.1, %v1162_v27  ;;  %vm1384_vm5 = vcmp.ge.f32.partialorder %v898_v28, 0.0  ;;  %v1642_v34 = vsel %vm1386_vm3, %v906_v23, %v1514_v30  ;;  %v2999_v38 = vpop.f32.mrb[12].mxu1 }
  0xff   : > { %v1512_v33 = vmul.f32 0.1, %v898_v28  ;;  %vm1448_vm6 = vcmp.ge.f32.partialorder %v1154_v31, 0.0  ;;  %v1576_v35 = vmul.f32 0.1, %v1154_v31  ;;  %v2736_v39 = vpack.c.bf16 %v1642_v34, %v1642_v34  ;;  %v913_v43 = vpop.f32.mrb[13].mxu0 }
 0x100   : > { %2342 = vst.msk [vmem:[%s3317_s25 + $0x114] sm:$0xf] %vm2272_vm1, %v2795_v29  ;;  %v1706_v40 = vsel %vm1450_vm4, %v1162_v27, %v1578_v32  ;;  %v1165_v42 = vadd.f32 %v2996_v18, %v3305_v1  ;;  %v1169_v44 = vpop.f32.mrb[13].mxu1  ;;  %vm1387_vm7 = vcmp.ge.f32.partialorder %v909_v36, 0.0  ;;  %v2936_v48 = vpop.f32.mrb[14].mxu0  ;;  %v901_v54 = vadd.f32 %v3305_v1, %v900_v19 }
 0x101   : > { %v1640_v41 = vsel %vm1384_vm5, %v898_v28, %v1512_v33  ;;  %v2800_v45 = vpack.c.bf16 %v1706_v40, %v1706_v40  ;;  %v1704_v47 = vsel %vm1448_vm6, %v1154_v31, %v1576_v35  ;;  %v3000_v49 = vpop.f32.mrb[14].mxu1  ;;  %2283 = vst.msk [vmem:[%s3317_s25 + $0x28] sm:$0xf] %vm2272_vm1, %v2736_v39  ;;  %v1515_v51 = vmul.f32 0.1, %v909_v36  ;;  %v916_v53 = vpop.f32.mrb[15].mxu0 }
 0x102   : > { %v2734_v46 = vpack.c.bf16 %v1640_v41, %v1640_v41  ;;  %v2798_v50 = vpack.c.bf16 %v1704_v47, %v1704_v47  ;;  %vm1451_vm8 = vcmp.ge.f32.partialorder %v1165_v42, 0.0  ;;  %v1579_v52 = vmul.f32 0.1, %v1165_v42  ;;  %v1172_v58 = vpop.f32.mrb[15].mxu1 }
 0x103   : > { %2347 = vst.msk [vmem:[%s3317_s25 + $0x128] sm:$0xf] %vm2272_vm1, %v2800_v45  ;;  %v1157_v55 = vadd.f32 %v3305_v1, %v1156_v24  ;;  %v922_v56 = vadd.f32 %v2935_v37, %v3305_v1  ;;  %v1178_v57 = vadd.f32 %v2999_v38, %v3305_v1  ;;  %v1643_v59 = vsel %vm1387_vm7, %v909_v36, %v1515_v51 }
 0x104   : > { %2281 = vst.msk [vmem:[%s3317_s25 + $0x20] sm:$0xf] %vm2272_vm1, %v2734_v46  ;;  %2345 = vst.msk [vmem:[%s3317_s25 + $0x120] sm:$0xf] %vm2272_vm1, %v2798_v50  ;;  %v1707_v60 = vsel %vm1451_vm8, %v1165_v42, %v1579_v52  ;;  %v914_v61 = vadd.f32 %v3305_v1, %v913_v43  ;;  %v1170_v62 = vadd.f32 %v3305_v1, %v1169_v44  ;;  %vm1385_vm9 = vcmp.ge.f32.partialorder %v901_v54, 0.0 }
 0x105   : > { %v2737_v63 = vpack.c.bf16 %v1643_v59, %v1643_v59  ;;  %v2801_v0 = vpack.c.bf16 %v1707_v60, %v1707_v60  ;;  %v1513_v2 = vmul.f32 0.1, %v901_v54  ;;  %vm1449_vm10 = vcmp.ge.f32.partialorder %v1157_v55, 0.0  ;;  %v2939_v7 = vpop.f32.mrb[16].mxu0 }
 0x106   : > { %v1577_v3 = vmul.f32 0.1, %v1157_v55  ;;  %vm1390_vm11 = vcmp.ge.f32.partialorder %v922_v56, 0.0  ;;  %v1518_v4 = vmul.f32 0.1, %v922_v56  ;;  %vm1454_vm12 = vcmp.ge.f32.partialorder %v1178_v57, 0.0 }
 0x107   : > { %2284 = vst.msk [vmem:[%s3317_s25 + $0x2c] sm:$0xf] %vm2272_vm1, %v2737_v63  ;;  %2348 = vst.msk [vmem:[%s3317_s25 + $0x12c] sm:$0xf] %vm2272_vm1, %v2801_v0  ;;  %v1641_v5 = vsel %vm1385_vm9, %v901_v54, %v1513_v2  ;;  %v1582_v6 = vmul.f32 0.1, %v1178_v57  ;;  %v925_v23 = vadd.f32 %v2936_v48, %v3305_v1  ;;  %v1181_v27 = vadd.f32 %v3000_v49, %v3305_v1 }
 0x108   : > { %vm1388_vm13 = vcmp.ge.f32.partialorder %v914_v61, 0.0  ;;  %v3003_v8 = vpop.f32.mrb[16].mxu1  ;;  %v2735_v9 = vpack.c.bf16 %v1641_v5, %v1641_v5  ;;  %v1705_v10 = vsel %vm1449_vm10, %v1157_v55, %v1577_v3  ;;  %v1646_v11 = vsel %vm1390_vm11, %v922_v56, %v1518_v4  ;;  %v929_v13 = vpop.f32.mrb[17].mxu0 }
 0x109   : > { %v1516_v12 = vmul.f32 0.1, %v914_v61  ;;  %v1185_v14 = vpop.f32.mrb[17].mxu1  ;;  %v2799_v15 = vpack.c.bf16 %v1705_v10, %v1705_v10  ;;  %v2740_v16 = vpack.c.bf16 %v1646_v11, %v1646_v11  ;;  %v1710_v17 = vsel %vm1454_vm12, %v1178_v57, %v1582_v6  ;;  %v2940_v18 = vpop.f32.mrb[18].mxu0 }
 0x10a   : > { %vm1452_vm14 = vcmp.ge.f32.partialorder %v1170_v62, 0.0  ;;  %v3004_v19 = vpop.f32.mrb[18].mxu1  ;;  %2282 = vst.msk [vmem:[%s3317_s25 + $0x24] sm:$0xf] %vm2272_vm1, %v2735_v9  ;;  %v2804_v20 = vpack.c.bf16 %v1710_v17, %v1710_v17  ;;  %v1580_v22 = vmul.f32 0.1, %v1170_v62  ;;  %v917_v28 = vadd.f32 %v3305_v1, %v916_v53 }
 0x10b   : > { %v1644_v21 = vsel %vm1388_vm13, %v914_v61, %v1516_v12  ;;  %v932_v24 = vpop.f32.mrb[19].mxu0  ;;  %v3392_v25 = vpop.f32.mrb[19].mxu1  ;;  %2346 = vst.msk [vmem:[%s3317_s25 + $0x124] sm:$0xf] %vm2272_vm1, %v2799_v15  ;;  %2287 = vst.msk [vmem:[%s3317_s25 + $0x38] sm:$0xf] %vm2272_vm1, %v2740_v16  ;;  %v1173_v29 = vadd.f32 %v3305_v1, %v1172_v58  ;;  %v938_v32 = vadd.f32 %v2939_v7, %v3305_v1 }
 0x10c   : > { %v2738_v26 = vpack.c.bf16 %v1644_v21, %v1644_v21  ;;  %2351 = vst.msk [vmem:[%s3317_s25 + $0x138] sm:$0xf] %vm2272_vm1, %v2804_v20  ;;  %v1708_v30 = vsel %vm1452_vm14, %v1170_v62, %v1580_v22  ;;  %vm1391_vm15 = vcmp.ge.f32.partialorder %v925_v23, 0.0  ;;  %v1519_v31 = vmul.f32 0.1, %v925_v23 }
 0x10d   : > { %v2802_v33 = vpack.c.bf16 %v1708_v30, %v1708_v30  ;;  %vm1455_vm0 = vcmp.ge.f32.partialorder %v1181_v27, 0.0  ;;  %v1583_v34 = vmul.f32 0.1, %v1181_v27  ;;  %vm1389_vm2 = vcmp.ge.f32.partialorder %v917_v28, 0.0  ;;  %v2943_v38 = vpop.f32.mrb[20].mxu0 }
 0x10e   : > { %2285 = vst.msk [vmem:[%s3317_s25 + $0x30] sm:$0xf] %vm2272_vm1, %v2738_v26  ;;  %v1647_v35 = vsel %vm1391_vm15, %v925_v23, %v1519_v31  ;;  %v1517_v36 = vmul.f32 0.1, %v917_v28  ;;  %vm1453_vm3 = vcmp.ge.f32.partialorder %v1173_v29, 0.0  ;;  %vm1394_vm4 = vcmp.ge.f32.partialorder %v938_v32, 0.0 }
 0x10f   : > { %v1581_v37 = vmul.f32 0.1, %v1173_v29  ;;  %2349 = vst.msk [vmem:[%s3317_s25 + $0x130] sm:$0xf] %vm2272_vm1, %v2802_v33  ;;  %v2741_v39 = vpack.c.bf16 %v1647_v35, %v1647_v35  ;;  %v1711_v40 = vsel %vm1455_vm0, %v1181_v27, %v1583_v34  ;;  %v1522_v41 = vmul.f32 0.1, %v938_v32 }
 0x110   : > { %v3007_v42 = vpop.f32.mrb[20].mxu1  ;;  %v945_v43 = vpop.f32.mrb[21].mxu0  ;;  %v2805_v44 = vpack.c.bf16 %v1711_v40, %v1711_v40  ;;  %v1645_v45 = vsel %vm1389_vm2, %v917_v28, %v1517_v36  ;;  %v1194_v47 = vadd.f32 %v3003_v8, %v3305_v1  ;;  %v930_v53 = vadd.f32 %v3305_v1, %v929_v13 }
 0x111   : > { %v1709_v46 = vsel %vm1453_vm3, %v1173_v29, %v1581_v37  ;;  %v3410_v48 = vpop.f32.mrb[21].mxu1  ;;  %v3412_v49 = vpop.f32.mrb[22].mxu0  ;;  %2288 = vst.msk [vmem:[%s3317_s25 + $0x3c] sm:$0xf] %vm2272_vm1, %v2741_v39  ;;  %v2739_v50 = vpack.c.bf16 %v1645_v45, %v1645_v45  ;;  %v1650_v52 = vsel %vm1394_vm4, %v938_v32, %v1522_v41  ;;  %v1186_v58 = vadd.f32 %v3305_v1, %v1185_v14 }
 0x112   : > { %v2803_v51 = vpack.c.bf16 %v1709_v46, %v1709_v46  ;;  %v3417_v54 = vpop.f32.mrb[22].mxu1  ;;  %v3419_v55 = vpop.f32.mrb[23].mxu0  ;;  %2352 = vst.msk [vmem:[%s3317_s25 + $0x13c] sm:$0xf] %vm2272_vm1, %v2805_v44  ;;  %v2744_v56 = vpack.c.bf16 %v1650_v52, %v1650_v52  ;;  %vm1458_vm5 = vcmp.ge.f32.partialorder %v1194_v47, 0.0  ;;  %vm1392_vm6 = vcmp.ge.f32.partialorder %v930_v53, 0.0 }
 0x113   : > { %v1586_v57 = vmul.f32 0.1, %v1194_v47  ;;  %v3424_v59 = vpop.f32.mrb[23].mxu1  ;;  %2286 = vst.msk [vmem:[%s3317_s25 + $0x34] sm:$0xf] %vm2272_vm1, %v2739_v50  ;;  %v941_v61 = vadd.f32 %v2940_v18, %v3305_v1  ;;  %v1197_v62 = vadd.f32 %v3004_v19, %v3305_v1  ;;  %vm1456_vm7 = vcmp.ge.f32.partialorder %v1186_v58, 0.0 }
 0x114   : > { %2350 = vst.msk [vmem:[%s3317_s25 + $0x134] sm:$0xf] %vm2272_vm1, %v2803_v51  ;;  %v1520_v60 = vmul.f32 0.1, %v930_v53  ;;  %2291 = vst.msk [vmem:[%s3317_s25 + $0x48] sm:$0xf] %vm2272_vm1, %v2744_v56  ;;  %v933_v2 = vadd.f32 %v3305_v1, %v932_v24  ;;  %v1189_v17 = vadd.f32 %v3305_v1, %v3392_v25  ;;  %v954_v18 = vadd.f32 %v2943_v38, %v3305_v1 }
 0x115   : > { %v1714_v63 = vsel %vm1458_vm5, %v1194_v47, %v1586_v57  ;;  %v1584_v0 = vmul.f32 0.1, %v1186_v58  ;;  %vm1395_vm8 = vcmp.ge.f32.partialorder %v941_v61, 0.0  ;;  %v1523_v5 = vmul.f32 0.1, %v941_v61  ;;  %v3435_v9 = vpop.f32.mrb[24].mxu0 }
 0x116   : > { %v2808_v3 = vpack.c.bf16 %v1714_v63, %v1714_v63  ;;  %v1648_v4 = vsel %vm1392_vm6, %v930_v53, %v1520_v60  ;;  %vm1459_vm9 = vcmp.ge.f32.partialorder %v1197_v62, 0.0  ;;  %v1587_v8 = vmul.f32 0.1, %v1197_v62  ;;  %v3011_v13 = vpop.f32.mrb[24].mxu1  ;;  %v3439_v14 = vpop.f32.mrb[25].mxu0 }
 0x117   : > { %v2742_v6 = vpack.c.bf16 %v1648_v4, %v1648_v4  ;;  %v1712_v7 = vsel %vm1456_vm7, %v1186_v58, %v1584_v0  ;;  %v1651_v11 = vsel %vm1395_vm8, %v941_v61, %v1523_v5  ;;  %vm1393_vm10 = vcmp.ge.f32.partialorder %v933_v2, 0.0  ;;  %v3446_v19 = vpop.f32.mrb[25].mxu1  ;;  %v3448_v20 = vpop.f32.mrb[26].mxu0 }
 0x118   : > { %2355 = vst.msk [vmem:[%s3317_s25 + $0x148] sm:$0xf] %vm2272_vm1, %v2808_v3  ;;  %v2806_v10 = vpack.c.bf16 %v1712_v7, %v1712_v7  ;;  %v1521_v12 = vmul.f32 0.1, %v933_v2  ;;  %v2745_v15 = vpack.c.bf16 %v1651_v11, %v1651_v11  ;;  %v1715_v16 = vsel %vm1459_vm9, %v1197_v62, %v1587_v8  ;;  %v3454_v26 = vpop.f32.mrb[26].mxu1  ;;  %v3456_v27 = vpop.f32.mrb[27].mxu0 }
 0x119   : > { %2289 = vst.msk [vmem:[%s3317_s25 + $0x40] sm:$0xf] %vm2272_vm1, %v2742_v6  ;;  %v2809_v21 = vpack.c.bf16 %v1715_v16, %v1715_v16  ;;  %v1210_v23 = vadd.f32 %v3007_v42, %v3305_v1  ;;  %v946_v24 = vadd.f32 %v3305_v1, %v945_v43  ;;  %vm1457_vm11 = vcmp.ge.f32.partialorder %v1189_v17, 0.0  ;;  %v3460_v29 = vpop.f32.mrb[27].mxu1 }
 0x11a   : > { %2353 = vst.msk [vmem:[%s3317_s25 + $0x140] sm:$0xf] %vm2272_vm1, %v2806_v10  ;;  %v1649_v22 = vsel %vm1393_vm10, %v933_v2, %v1521_v12  ;;  %2292 = vst.msk [vmem:[%s3317_s25 + $0x4c] sm:$0xf] %vm2272_vm1, %v2745_v15  ;;  %v1585_v28 = vmul.f32 0.1, %v1189_v17  ;;  %v1202_v34 = vadd.f32 %v3305_v1, %v3410_v48  ;;  %v957_v35 = vadd.f32 %v3412_v49, %v3305_v1 }
 0x11b   : > { %v2743_v25 = vpack.c.bf16 %v1649_v22, %v1649_v22  ;;  %vm1398_vm12 = vcmp.ge.f32.partialorder %v954_v18, 0.0  ;;  %2356 = vst.msk [vmem:[%s3317_s25 + $0x14c] sm:$0xf] %vm2272_vm1, %v2809_v21  ;;  %v1526_v30 = vmul.f32 0.1, %v954_v18  ;;  %vm1462_vm13 = vcmp.ge.f32.partialorder %v1210_v23, 0.0 }
 0x11c   : > { %v1590_v31 = vmul.f32 0.1, %v1210_v23  ;;  %vm1396_vm14 = vcmp.ge.f32.partialorder %v946_v24, 0.0  ;;  %v1713_v32 = vsel %vm1457_vm11, %v1189_v17, %v1585_v28  ;;  %v1524_v33 = vmul.f32 0.1, %v946_v24 }
 0x11d   : > { %2290 = vst.msk [vmem:[%s3317_s25 + $0x44] sm:$0xf] %vm2272_vm1, %v2743_v25  ;;  %v2807_v36 = vpack.c.bf16 %v1713_v32, %v1713_v32  ;;  %v1654_v37 = vsel %vm1398_vm12, %v954_v18, %v1526_v30  ;;  %v1213_v39 = vadd.f32 %v3417_v54, %v3305_v1  ;;  %vm1460_vm15 = vcmp.ge.f32.partialorder %v1202_v34, 0.0  ;;  %v3472_v43 = vpop.f32.mrb[28].mxu0 }
 0x11e   : > { %v1718_v38 = vsel %vm1462_vm13, %v1210_v23, %v1590_v31  ;;  %v2748_v40 = vpack.c.bf16 %v1654_v37, %v1654_v37  ;;  %v1652_v42 = vsel %vm1396_vm14, %v946_v24, %v1524_v33  ;;  %v1588_v45 = vmul.f32 0.1, %v1202_v34  ;;  %v3476_v47 = vpop.f32.mrb[28].mxu1  ;;  %v3486_v51 = vpop.f32.mrb[29].mxu0 }
 0x11f   : > { %v2812_v41 = vpack.c.bf16 %v1718_v38, %v1718_v38  ;;  %2354 = vst.msk [vmem:[%s3317_s25 + $0x144] sm:$0xf] %vm2272_vm1, %v2807_v36  ;;  %v2746_v44 = vpack.c.bf16 %v1652_v42, %v1652_v42  ;;  %vm1399_vm0 = vcmp.ge.f32.partialorder %v957_v35, 0.0  ;;  %v1527_v46 = vmul.f32 0.1, %v957_v35  ;;  %v3488_v52 = vpop.f32.mrb[29].mxu1 }
 0x120   : > { %2295 = vst.msk [vmem:[%s3317_s25 + $0x58] sm:$0xf] %vm2272_vm1, %v2748_v40  ;;  %vm1463_vm2 = vcmp.ge.f32.partialorder %v1213_v39, 0.0  ;;  %v1591_v48 = vmul.f32 0.1, %v1213_v39  ;;  %v949_v49 = vadd.f32 %v3305_v1, %v3419_v55  ;;  %v1205_v50 = vadd.f32 %v3305_v1, %v3424_v59  ;;  %v3496_v55 = vpop.f32.mrb[30].mxu0 }
 0x121   : > { %2359 = vst.msk [vmem:[%s3317_s25 + $0x158] sm:$0xf] %vm2272_vm1, %v2812_v41  ;;  %2293 = vst.msk [vmem:[%s3317_s25 + $0x50] sm:$0xf] %vm2272_vm1, %v2746_v44  ;;  %v1716_v53 = vsel %vm1460_vm15, %v1202_v34, %v1588_v45  ;;  %v1655_v54 = vsel %vm1399_vm0, %v957_v35, %v1527_v46  ;;  %v970_v56 = vadd.f32 %v3435_v9, %v3305_v1  ;;  %v3498_v58 = vpop.f32.mrb[30].mxu1  ;;  %v3500_v62 = vpop.f32.mrb[31].mxu0 }
 0x122   : > { %v1226_v57 = vadd.f32 %v3011_v13, %v3305_v1  ;;  %v2810_v59 = vpack.c.bf16 %v1716_v53, %v1716_v53  ;;  %v2749_v60 = vpack.c.bf16 %v1655_v54, %v1655_v54  ;;  %v1719_v61 = vsel %vm1463_vm2, %v1213_v39, %v1591_v48  ;;  %v3502_v63 = vpop.f32.mrb[31].mxu1 }
 0x123   : > { %vm1397_vm3 = vcmp.ge.f32.partialorder %v949_v49, 0.0  ;;  %v2813_v0 = vpack.c.bf16 %v1719_v61, %v1719_v61  ;;  %v1525_v2 = vmul.f32 0.1, %v949_v49  ;;  %vm1461_vm4 = vcmp.ge.f32.partialorder %v1205_v50, 0.0 }
 0x124   : > { %v1589_v3 = vmul.f32 0.1, %v1205_v50  ;;  %2357 = vst.msk [vmem:[%s3317_s25 + $0x150] sm:$0xf] %vm2272_vm1, %v2810_v59  ;;  %2296 = vst.msk [vmem:[%s3317_s25 + $0x5c] sm:$0xf] %vm2272_vm1, %v2749_v60  ;;  %v962_v8 = vadd.f32 %v3305_v1, %v3439_v14  ;;  %v1218_v9 = vadd.f32 %v3305_v1, %v3446_v19  ;;  %v973_v19 = vadd.f32 %v3448_v20, %v3305_v1 }
 0x125   : > { %vm1402_vm5 = vcmp.ge.f32.partialorder %v970_v56, 0.0  ;;  %v1530_v4 = vmul.f32 0.1, %v970_v56  ;;  %vm1466_vm6 = vcmp.ge.f32.partialorder %v1226_v57, 0.0  ;;  %v1594_v5 = vmul.f32 0.1, %v1226_v57 }
 0x126   : > { %2360 = vst.msk [vmem:[%s3317_s25 + $0x15c] sm:$0xf] %vm2272_vm1, %v2813_v0  ;;  %v1653_v6 = vsel %vm1397_vm3, %v949_v49, %v1525_v2  ;;  %v1717_v7 = vsel %vm1461_vm4, %v1205_v50, %v1589_v3  ;;  %v3514_v15 = vpop.f32.mrb[32].mxu0  ;;  %vm1400_vm7 = vcmp.ge.f32.partialorder %v962_v8, 0.0  ;;  %v1528_v18 = vmul.f32 0.1, %v962_v8 }
 0x127   : > { %v2747_v10 = vpack.c.bf16 %v1653_v6, %v1653_v6  ;;  %v2811_v11 = vpack.c.bf16 %v1717_v7, %v1717_v7  ;;  %v1658_v12 = vsel %vm1402_vm5, %v970_v56, %v1530_v4  ;;  %v1722_v13 = vsel %vm1466_vm6, %v1226_v57, %v1594_v5  ;;  %v3516_v21 = vpop.f32.mrb[32].mxu1  ;;  %v3518_v22 = vpop.f32.mrb[33].mxu0 }
 0x128   : > { %v2752_v16 = vpack.c.bf16 %v1658_v12, %v1658_v12  ;;  %v2816_v17 = vpack.c.bf16 %v1722_v13, %v1722_v13  ;;  %vm1464_vm8 = vcmp.ge.f32.partialorder %v1218_v9, 0.0  ;;  %v1592_v14 = vmul.f32 0.1, %v1218_v9  ;;  %v3528_v24 = vpop.f32.mrb[33].mxu1  ;;  %v3530_v25 = vpop.f32.mrb[34].mxu0 }
 0x129   : > { %2294 = vst.msk [vmem:[%s3317_s25 + $0x54] sm:$0xf] %vm2272_vm1, %v2747_v10  ;;  %2358 = vst.msk [vmem:[%s3317_s25 + $0x154] sm:$0xf] %vm2272_vm1, %v2811_v11  ;;  %v1229_v23 = vadd.f32 %v3454_v26, %v3305_v1  ;;  %v1656_v28 = vsel %vm1400_vm7, %v962_v8, %v1528_v18  ;;  %v965_v30 = vadd.f32 %v3305_v1, %v3456_v27  ;;  %v3542_v26 = vpop.f32.mrb[34].mxu1  ;;  %v3544_v32 = vpop.f32.mrb[35].mxu0 }
 0x12a   : > { %2299 = vst.msk [vmem:[%s3317_s25 + $0x68] sm:$0xf] %vm2272_vm1, %v2752_v16  ;;  %2363 = vst.msk [vmem:[%s3317_s25 + $0x168] sm:$0xf] %vm2272_vm1, %v2816_v17  ;;  %v1221_v31 = vadd.f32 %v3305_v1, %v3460_v29  ;;  %v986_v20 = vadd.f32 %v3472_v43, %v3305_v1  ;;  %v2750_v33 = vpack.c.bf16 %v1656_v28, %v1656_v28  ;;  %vm1403_vm9 = vcmp.ge.f32.partialorder %v973_v19, 0.0  ;;  %v3546_v36 = vpop.f32.mrb[35].mxu1 }
 0x12b   : > { %v1720_v34 = vsel %vm1464_vm8, %v1218_v9, %v1592_v14  ;;  %v1531_v35 = vmul.f32 0.1, %v973_v19  ;;  %vm1467_vm10 = vcmp.ge.f32.partialorder %v1229_v23, 0.0  ;;  %v1595_v27 = vmul.f32 0.1, %v1229_v23 }
 0x12c   : > { %v2814_v37 = vpack.c.bf16 %v1720_v34, %v1720_v34  ;;  %vm1401_vm11 = vcmp.ge.f32.partialorder %v965_v30, 0.0  ;;  %2297 = vst.msk [vmem:[%s3317_s25 + $0x60] sm:$0xf] %vm2272_vm1, %v2750_v33  ;;  %v1529_v38 = vmul.f32 0.1, %v965_v30  ;;  %vm1465_vm12 = vcmp.ge.f32.partialorder %v1221_v31, 0.0 }
 0x12d   : > { %v1659_v29 = vsel %vm1403_vm9, %v973_v19, %v1531_v35  ;;  %v1593_v39 = vmul.f32 0.1, %v1221_v31  ;;  %v1723_v41 = vsel %vm1467_vm10, %v1229_v23, %v1595_v27  ;;  %vm1406_vm13 = vcmp.ge.f32.partialorder %v986_v20, 0.0  ;;  %v3554_v48 = vpop.f32.mrb[36].mxu0 }
 0x12e   : > { %2361 = vst.msk [vmem:[%s3317_s25 + $0x160] sm:$0xf] %vm2272_vm1, %v2814_v37  ;;  %v2753_v40 = vpack.c.bf16 %v1659_v29, %v1659_v29  ;;  %v1534_v42 = vmul.f32 0.1, %v986_v20  ;;  %v2817_v43 = vpack.c.bf16 %v1723_v41, %v1723_v41  ;;  %v1657_v44 = vsel %vm1401_vm11, %v965_v30, %v1529_v38  ;;  %v3560_v56 = vpop.f32.mrb[36].mxu1  ;;  %v3562_v57 = vpop.f32.mrb[37].mxu0 }
 0x12f   : > { %v1721_v45 = vsel %vm1465_vm12, %v1221_v31, %v1593_v39  ;;  %v1242_v46 = vadd.f32 %v3476_v47, %v3305_v1  ;;  %v2751_v49 = vpack.c.bf16 %v1657_v44, %v1657_v44  ;;  %v978_v54 = vadd.f32 %v3305_v1, %v3486_v51  ;;  %v3568_v61 = vpop.f32.mrb[37].mxu1  ;;  %v3570_v0 = vpop.f32.mrb[38].mxu0 }
 0x130   : > { %2300 = vst.msk [vmem:[%s3317_s25 + $0x6c] sm:$0xf] %vm2272_vm1, %v2753_v40  ;;  %v2815_v50 = vpack.c.bf16 %v1721_v45, %v1721_v45  ;;  %v1662_v53 = vsel %vm1406_vm13, %v986_v20, %v1534_v42  ;;  %2364 = vst.msk [vmem:[%s3317_s25 + $0x16c] sm:$0xf] %vm2272_vm1, %v2817_v43  ;;  %v1234_v60 = vadd.f32 %v3305_v1, %v3488_v52  ;;  %v3580_v4 = vpop.f32.mrb[38].mxu1  ;;  %v3582_v52 = vpop.f32.mrb[39].mxu0 }
 0x131   : > { %v2756_v47 = vpack.c.bf16 %v1662_v53, %v1662_v53  ;;  %vm1470_vm14 = vcmp.ge.f32.partialorder %v1242_v46, 0.0  ;;  %v1598_v59 = vmul.f32 0.1, %v1242_v46  ;;  %2298 = vst.msk [vmem:[%s3317_s25 + $0x64] sm:$0xf] %vm2272_vm1, %v2751_v49  ;;  %vm1404_vm15 = vcmp.ge.f32.partialorder %v978_v54, 0.0 }
 0x132   : > { %2362 = vst.msk [vmem:[%s3317_s25 + $0x164] sm:$0xf] %vm2272_vm1, %v2815_v50  ;;  %v1532_v51 = vmul.f32 0.1, %v978_v54  ;;  %v989_v2 = vadd.f32 %v3496_v55, %v3305_v1  ;;  %v1245_v3 = vadd.f32 %v3498_v58, %v3305_v1  ;;  %vm1468_vm0 = vcmp.ge.f32.partialorder %v1234_v60, 0.0  ;;  %v3588_v8 = vpop.f32.mrb[39].mxu1 }
 0x133   : > { %2303 = vst.msk [vmem:[%s3317_s25 + $0x78] sm:$0xf] %vm2272_vm1, %v2756_v47  ;;  %v1726_v5 = vsel %vm1470_vm14, %v1242_v46, %v1598_v59  ;;  %v1596_v6 = vmul.f32 0.1, %v1234_v60  ;;  %v981_v7 = vadd.f32 %v3305_v1, %v3500_v62  ;;  %v1237_v14 = vadd.f32 %v3305_v1, %v3502_v63 }
 0x134   : > { %v2820_v55 = vpack.c.bf16 %v1726_v5, %v1726_v5  ;;  %v1660_v9 = vsel %vm1404_vm15, %v978_v54, %v1532_v51  ;;  %vm1407_vm2 = vcmp.ge.f32.partialorder %v989_v2, 0.0  ;;  %v1535_v58 = vmul.f32 0.1, %v989_v2 }
 0x135   : > { %v2754_v10 = vpack.c.bf16 %v1660_v9, %v1660_v9  ;;  %v1724_v11 = vsel %vm1468_vm0, %v1234_v60, %v1596_v6  ;;  %vm1471_vm3 = vcmp.ge.f32.partialorder %v1245_v3, 0.0  ;;  %v1599_v12 = vmul.f32 0.1, %v1245_v3  ;;  %v3598_v23 = vpop.f32.mrb[40].mxu0 }
 0x136   : > { %2367 = vst.msk [vmem:[%s3317_s25 + $0x178] sm:$0xf] %vm2272_vm1, %v2820_v55  ;;  %v2818_v13 = vpack.c.bf16 %v1724_v11, %v1724_v11  ;;  %v1663_v16 = vsel %vm1407_vm2, %v989_v2, %v1535_v58  ;;  %vm1405_vm4 = vcmp.ge.f32.partialorder %v981_v7, 0.0  ;;  %v1533_v17 = vmul.f32 0.1, %v981_v7  ;;  %v3606_v33 = vpop.f32.mrb[40].mxu1 }
 0x137   : > { %2301 = vst.msk [vmem:[%s3317_s25 + $0x70] sm:$0xf] %vm2272_vm1, %v2754_v10  ;;  %v2757_v62 = vpack.c.bf16 %v1663_v16, %v1663_v16  ;;  %v1727_v18 = vsel %vm1471_vm3, %v1245_v3, %v1599_v12  ;;  %v1002_v19 = vadd.f32 %v3514_v15, %v3305_v1  ;;  %v1258_v31 = vadd.f32 %v3516_v21, %v3305_v1  ;;  %v3608_v63 = vpop.f32.mrb[41].mxu0  ;;  %v3612_v35 = vpop.f32.mrb[41].mxu1 }
 0x138   : > { %2365 = vst.msk [vmem:[%s3317_s25 + $0x170] sm:$0xf] %vm2272_vm1, %v2818_v13  ;;  %v2821_v28 = vpack.c.bf16 %v1727_v18, %v1727_v18  ;;  %v1661_v30 = vsel %vm1405_vm4, %v981_v7, %v1533_v17  ;;  %v994_v20 = vadd.f32 %v3305_v1, %v3518_v22  ;;  %vm1469_vm5 = vcmp.ge.f32.partialorder %v1237_v14, 0.0  ;;  %v3614_v37 = vpop.f32.mrb[42].mxu0  ;;  %v3624_v40 = vpop.f32.mrb[42].mxu1 }
 0x139   : > { %2304 = vst.msk [vmem:[%s3317_s25 + $0x7c] sm:$0xf] %vm2272_vm1, %v2757_v62  ;;  %v2755_v15 = vpack.c.bf16 %v1661_v30, %v1661_v30  ;;  %v1597_v34 = vmul.f32 0.1, %v1237_v14  ;;  %vm1410_vm6 = vcmp.ge.f32.partialorder %v1002_v19, 0.0  ;;  %vm1474_vm7 = vcmp.ge.f32.partialorder %v1258_v31, 0.0 }
 0x13a   : > { %2368 = vst.msk [vmem:[%s3317_s25 + $0x17c] sm:$0xf] %vm2272_vm1, %v2821_v28  ;;  %v1538_v21 = vmul.f32 0.1, %v1002_v19  ;;  %v1602_v27 = vmul.f32 0.1, %v1258_v31  ;;  %v1250_v38 = vadd.f32 %v3305_v1, %v3528_v24  ;;  %v1005_v39 = vadd.f32 %v3530_v25, %v3305_v1 }
 0x13b   : > { %vm1408_vm8 = vcmp.ge.f32.partialorder %v994_v20, 0.0  ;;  %2302 = vst.msk [vmem:[%s3317_s25 + $0x74] sm:$0xf] %vm2272_vm1, %v2755_v15  ;;  %v1725_v22 = vsel %vm1469_vm5, %v1237_v14, %v1597_v34  ;;  %v1536_v29 = vmul.f32 0.1, %v994_v20  ;;  %v3626_v41 = vpop.f32.mrb[43].mxu0  ;;  %v1261_v45 = vadd.f32 %v3542_v26, %v3305_v1 }
 0x13c   : > { %v2819_v42 = vpack.c.bf16 %v1725_v22, %v1725_v22  ;;  %v1666_v43 = vsel %vm1410_vm6, %v1002_v19, %v1538_v21  ;;  %v1730_v44 = vsel %vm1474_vm7, %v1258_v31, %v1602_v27  ;;  %v3631_v46 = vpop.f32.mrb[43].mxu1  ;;  %vm1472_vm9 = vcmp.ge.f32.partialorder %v1250_v38, 0.0  ;;  %v3670_v17 = vld [vmem:[%s3971_s2] ss:$0 sm:$0xff] }
 0x13d   : > { %v2760_v49 = vpack.c.bf16 %v1666_v43, %v1666_v43  ;;  %v2824_v24 = vpack.c.bf16 %v1730_v44, %v1730_v44  ;;  %v1664_v50 = vsel %vm1408_vm8, %v994_v20, %v1536_v29  ;;  %v1600_v53 = vmul.f32 0.1, %v1250_v38  ;;  %v3643_v60 = vpop.f32.mrb[44].mxu0 }
 0x13e   : > { %2366 = vst.msk [vmem:[%s3317_s25 + $0x174] sm:$0xf] %vm2272_vm1, %v2819_v42  ;;  %v2758_v25 = vpack.c.bf16 %v1664_v50, %v1664_v50  ;;  %vm1411_vm10 = vcmp.ge.f32.partialorder %v1005_v39, 0.0  ;;  %v1539_v54 = vmul.f32 0.1, %v1005_v39  ;;  %vm1475_vm11 = vcmp.ge.f32.partialorder %v1261_v45, 0.0 }
 0x13f   : > { %2307 = vst.msk [vmem:[%s3317_s25 + $0x88] sm:$0xf] %vm2272_vm1, %v2760_v49  ;;  %2371 = vst.msk [vmem:[%s3317_s25 + $0x188] sm:$0xf] %vm2272_vm1, %v2824_v24  ;;  %v1603_v47 = vmul.f32 0.1, %v1261_v45  ;;  %v997_v26 = vadd.f32 %v3305_v1, %v3544_v32  ;;  %v1253_v59 = vadd.f32 %v3305_v1, %v3546_v36  ;;  %v1728_v51 = vsel %vm1472_vm9, %v1250_v38, %v1600_v53 }
 0x140   : > { %2305 = vst.msk [vmem:[%s3317_s25 + $0x80] sm:$0xf] %vm2272_vm1, %v2758_v25  ;;  %v1667_v2 = vsel %vm1411_vm10, %v1005_v39, %v1539_v54  ;;  %v1018_v3 = vadd.f32 %v3554_v48, %v3305_v1  ;;  %v1274_v5 = vadd.f32 %v3560_v56, %v3305_v1  ;;  %v3651_v6 = vpop.f32.mrb[44].mxu1  ;;  %v3653_v32 = vpop.f32.mrb[45].mxu0  ;;  %v2822_v7 = vpack.c.bf16 %v1728_v51, %v1728_v51 }
 0x141   : > { %v2761_v36 = vpack.c.bf16 %v1667_v2, %v1667_v2  ;;  %v1731_v55 = vsel %vm1475_vm11, %v1261_v45, %v1603_v47  ;;  %vm1409_vm12 = vcmp.ge.f32.partialorder %v997_v26, 0.0  ;;  %v3655_v9 = vpop.f32.mrb[45].mxu1  ;;  %v3657_v58 = vpop.f32.mrb[46].mxu0  ;;  %v1537_v11 = vmul.f32 0.1, %v997_v26 }
 0x142   : > { %v2825_v10 = vpack.c.bf16 %v1731_v55, %v1731_v55  ;;  %vm1473_vm13 = vcmp.ge.f32.partialorder %v1253_v59, 0.0  ;;  %v1601_v48 = vmul.f32 0.1, %v1253_v59  ;;  %v3659_v12 = vpop.f32.mrb[46].mxu1  ;;  %2369 = vst.msk [vmem:[%s3317_s25 + $0x180] sm:$0xf] %vm2272_vm1, %v2822_v7  ;;  %v1010_v62 = vadd.f32 %v3670_v17, %v3562_v57 }
 0x143   : > { %2308 = vst.msk [vmem:[%s3317_s25 + $0x8c] sm:$0xf] %vm2272_vm1, %v2761_v36  ;;  %vm1414_vm14 = vcmp.ge.f32.partialorder %v1018_v3, 0.0  ;;  %v1542_v1 = vmul.f32 0.1, %v1018_v3  ;;  %vm1478_vm15 = vcmp.ge.f32.partialorder %v1274_v5, 0.0  ;;  %v1665_v13 = vsel %vm1409_vm12, %v997_v26, %v1537_v11 }
 0x144   : > { %v1606_v56 = vmul.f32 0.1, %v1274_v5  ;;  %2372 = vst.msk [vmem:[%s3317_s25 + $0x18c] sm:$0xf] %vm2272_vm1, %v2825_v10  ;;  %v1729_v16 = vsel %vm1473_vm13, %v1253_v59, %v1601_v48  ;;  %v1266_v18 = vadd.f32 %v3670_v17, %v3568_v61  ;;  %v3676_v14 = vpop.f32.mrb[47].mxu0  ;;  %v3678_v19 = vpop.f32.mrb[47].mxu1  ;;  %v2759_v28 = vpack.c.bf16 %v1665_v13, %v1665_v13 }
 0x145   : > { %v2823_v30 = vpack.c.bf16 %v1729_v16, %v1729_v16  ;;  %v1670_v31 = vsel %vm1414_vm14, %v1018_v3, %v1542_v1  ;;  %vm1412_vm0 = vcmp.ge.f32.partialorder %v1010_v62, 0.0  ;;  %v1540_v21 = vmul.f32 0.1, %v1010_v62  ;;  %v3688_v22 = vpop.f32.mrb[48].mxu0 }
 0x146   : > { %v1734_v20 = vsel %vm1478_vm15, %v1274_v5, %v1606_v56  ;;  %v2764_v15 = vpack.c.bf16 %v1670_v31, %v1670_v31  ;;  %2306 = vst.msk [vmem:[%s3317_s25 + $0x84] sm:$0xf] %vm2272_vm1, %v2759_v28  ;;  %vm1476_vm2 = vcmp.ge.f32.partialorder %v1266_v18, 0.0  ;;  %v1604_v57 = vmul.f32 0.1, %v1266_v18  ;;  %v3700_v42 = vpop.f32.mrb[48].mxu1 }
 0x147   : > { %v2828_v34 = vpack.c.bf16 %v1734_v20, %v1734_v20  ;;  %2370 = vst.msk [vmem:[%s3317_s25 + $0x184] sm:$0xf] %vm2272_vm1, %v2823_v30  ;;  %v1021_v61 = vadd.f32 %v3670_v17, %v3570_v0  ;;  %v1277_v27 = vadd.f32 %v3670_v17, %v3580_v4  ;;  %v1668_v29 = vsel %vm1412_vm0, %v1010_v62, %v1540_v21  ;;  %v3702_v4 = vpop.f32.mrb[49].mxu0  ;;  %v3704_v49 = vpop.f32.mrb[49].mxu1 }
 0x148   : > { %2311 = vst.msk [vmem:[%s3317_s25 + $0x98] sm:$0xf] %vm2272_vm1, %v2764_v15  ;;  %v1013_v38 = vadd.f32 %v3670_v17, %v3582_v52  ;;  %v1269_v39 = vadd.f32 %v3670_v17, %v3588_v8  ;;  %v1034_v0 = vadd.f32 %v3670_v17, %v3598_v23  ;;  %v2762_v43 = vpack.c.bf16 %v1668_v29, %v1668_v29  ;;  %v3706_v24 = vpop.f32.mrb[50].mxu0  ;;  %v3708_v50 = vpop.f32.mrb[50].mxu1 }
 0x149   : > { %2375 = vst.msk [vmem:[%s3317_s25 + $0x198] sm:$0xf] %vm2272_vm1, %v2828_v34  ;;  %v1732_v44 = vsel %vm1476_vm2, %v1266_v18, %v1604_v57  ;;  %vm1415_vm3 = vcmp.ge.f32.partialorder %v1021_v61, 0.0  ;;  %v1543_v45 = vmul.f32 0.1, %v1021_v61  ;;  %vm1479_vm4 = vcmp.ge.f32.partialorder %v1277_v27, 0.0 }
 0x14a   : > { %v2826_v52 = vpack.c.bf16 %v1732_v44, %v1732_v44  ;;  %v1607_v8 = vmul.f32 0.1, %v1277_v27  ;;  %vm1413_vm5 = vcmp.ge.f32.partialorder %v1013_v38, 0.0  ;;  %v3710_v23 = vpop.f32.mrb[51].mxu0  ;;  %2309 = vst.msk [vmem:[%s3317_s25 + $0x90] sm:$0xf] %vm2272_vm1, %v2762_v43  ;;  %v1290_v7 = vadd.f32 %v3670_v17, %v3606_v33 }
 0x14b   : > { %v1671_v25 = vsel %vm1415_vm3, %v1021_v61, %v1543_v45  ;;  %v1541_v53 = vmul.f32 0.1, %v1013_v38  ;;  %vm1477_vm6 = vcmp.ge.f32.partialorder %v1269_v39, 0.0  ;;  %v1605_v54 = vmul.f32 0.1, %v1269_v39  ;;  %v3714_v47 = vpop.f32.mrb[51].mxu1 }
 0x14c   : > { %2373 = vst.msk [vmem:[%s3317_s25 + $0x190] sm:$0xf] %vm2272_vm1, %v2826_v52  ;;  %v2765_v26 = vpack.c.bf16 %v1671_v25, %v1671_v25  ;;  %v1735_v59 = vsel %vm1479_vm4, %v1277_v27, %v1607_v8  ;;  %vm1418_vm7 = vcmp.ge.f32.partialorder %v1034_v0, 0.0  ;;  %v1546_v51 = vmul.f32 0.1, %v1034_v0 }
 0x14d   : > { %v2829_v2 = vpack.c.bf16 %v1735_v59, %v1735_v59  ;;  %v1669_v3 = vsel %vm1413_vm5, %v1013_v38, %v1541_v53  ;;  %v1733_v5 = vsel %vm1477_vm6, %v1269_v39, %v1605_v54  ;;  %v1026_v11 = vadd.f32 %v3670_v17, %v3608_v63  ;;  %v3728_v13 = vpop.f32.mrb[52].mxu0 }
 0x14e   : > { %2312 = vst.msk [vmem:[%s3317_s25 + $0x9c] sm:$0xf] %vm2272_vm1, %v2765_v26  ;;  %v2763_v36 = vpack.c.bf16 %v1669_v3, %v1669_v3  ;;  %v2827_v55 = vpack.c.bf16 %v1733_v5, %v1733_v5  ;;  %v1674_v10 = vsel %vm1418_vm7, %v1034_v0, %v1546_v51  ;;  %vm1482_vm8 = vcmp.ge.f32.partialorder %v1290_v7, 0.0  ;;  %v3738_v62 = vpop.f32.mrb[52].mxu1  ;;  %v3740_v18 = vpop.f32.mrb[53].mxu0 }
 0x14f   : > { %2376 = vst.msk [vmem:[%s3317_s25 + $0x19c] sm:$0xf] %vm2272_vm1, %v2829_v2  ;;  %v2768_v48 = vpack.c.bf16 %v1674_v10, %v1674_v10  ;;  %v1610_v1 = vmul.f32 0.1, %v1290_v7  ;;  %v1282_v56 = vadd.f32 %v3670_v17, %v3612_v35  ;;  %vm1416_vm9 = vcmp.ge.f32.partialorder %v1026_v11, 0.0  ;;  %v3746_v31 = vpop.f32.mrb[53].mxu1 }
 0x150   : > { %2310 = vst.msk [vmem:[%s3317_s25 + $0x94] sm:$0xf] %vm2272_vm1, %v2763_v36  ;;  %2374 = vst.msk [vmem:[%s3317_s25 + $0x194] sm:$0xf] %vm2272_vm1, %v2827_v55  ;;  %v1544_v33 = vmul.f32 0.1, %v1026_v11  ;;  %v1037_v16 = vadd.f32 %v3670_v17, %v3614_v37  ;;  %v1293_v63 = vadd.f32 %v3670_v17, %v3624_v40  ;;  %v1029_v30 = vadd.f32 %v3670_v17, %v3626_v41 }
 0x151   : > { %2315 = vst.msk [vmem:[%s3317_s25 + $0xa8] sm:$0xf] %vm2272_vm1, %v2768_v48  ;;  %v1738_v35 = vsel %vm1482_vm8, %v1290_v7, %v1610_v1  ;;  %vm1480_vm10 = vcmp.ge.f32.partialorder %v1282_v56, 0.0  ;;  %v1608_v28 = vmul.f32 0.1, %v1282_v56  ;;  %v3748_v20 = vpop.f32.mrb[54].mxu0  ;;  %v1285_v44 = vadd.f32 %v3670_v17, %v3631_v46 }
 0x152   : > { %v2832_v37 = vpack.c.bf16 %v1738_v35, %v1738_v35  ;;  %v1672_v40 = vsel %vm1416_vm9, %v1026_v11, %v1544_v33  ;;  %vm1419_vm11 = vcmp.ge.f32.partialorder %v1037_v16, 0.0  ;;  %v1547_v15 = vmul.f32 0.1, %v1037_v16  ;;  %v3750_v34 = vpop.f32.mrb[54].mxu1  ;;  %v3752_v21 = vpop.f32.mrb[55].mxu0 }
 0x153   : > { %v2766_v57 = vpack.c.bf16 %v1672_v40, %v1672_v40  ;;  %v1736_v61 = vsel %vm1480_vm10, %v1282_v56, %v1608_v28  ;;  %vm1483_vm12 = vcmp.ge.f32.partialorder %v1293_v63, 0.0  ;;  %v1611_v27 = vmul.f32 0.1, %v1293_v63  ;;  %v3754_v29 = vpop.f32.mrb[55].mxu1 }
 0x154   : > { %2379 = vst.msk [vmem:[%s3317_s25 + $0x1a8] sm:$0xf] %vm2272_vm1, %v2832_v37  ;;  %v2830_v41 = vpack.c.bf16 %v1736_v61, %v1736_v61  ;;  %v1675_v38 = vsel %vm1419_vm11, %v1037_v16, %v1547_v15  ;;  %vm1417_vm13 = vcmp.ge.f32.partialorder %v1029_v30, 0.0  ;;  %v1545_v39 = vmul.f32 0.1, %v1029_v30 }
 0x155   : > { %2313 = vst.msk [vmem:[%s3317_s25 + $0xa0] sm:$0xf] %vm2272_vm1, %v2766_v57  ;;  %v2769_v0 = vpack.c.bf16 %v1675_v38, %v1675_v38  ;;  %v1739_v43 = vsel %vm1483_vm12, %v1293_v63, %v1611_v27  ;;  %v1050_v45 = vadd.f32 %v3670_v17, %v3643_v60  ;;  %v1306_v25 = vadd.f32 %v3670_v17, %v3651_v6  ;;  %v3772_v46 = vpop.f32.mrb[56].mxu0 }
 0x156   : > { %2377 = vst.msk [vmem:[%s3317_s25 + $0x1a0] sm:$0xf] %vm2272_vm1, %v2830_v41  ;;  %v2833_v52 = vpack.c.bf16 %v1739_v43, %v1739_v43  ;;  %v1673_v8 = vsel %vm1417_vm13, %v1029_v30, %v1545_v39  ;;  %v1042_v53 = vadd.f32 %v3670_v17, %v3653_v32  ;;  %vm1481_vm14 = vcmp.ge.f32.partialorder %v1285_v44, 0.0  ;;  %v3782_v3 = vpop.f32.mrb[56].mxu1  ;;  %v3784_v5 = vpop.f32.mrb[57].mxu0 }
 0x157   : > { %2316 = vst.msk [vmem:[%s3317_s25 + $0xac] sm:$0xf] %vm2272_vm1, %v2769_v0  ;;  %v2767_v54 = vpack.c.bf16 %v1673_v8, %v1673_v8  ;;  %v1609_v26 = vmul.f32 0.1, %v1285_v44  ;;  %vm1422_vm15 = vcmp.ge.f32.partialorder %v1050_v45, 0.0  ;;  %vm1486_vm0 = vcmp.ge.f32.partialorder %v1306_v25, 0.0 }
 0x158   : > { %2380 = vst.msk [vmem:[%s3317_s25 + $0x1ac] sm:$0xf] %vm2272_vm1, %v2833_v52  ;;  %v1550_v60 = vmul.f32 0.1, %v1050_v45  ;;  %v1614_v59 = vmul.f32 0.1, %v1306_v25  ;;  %v1298_v32 = vadd.f32 %v3670_v17, %v3655_v9  ;;  %v1053_v2 = vadd.f32 %v3670_v17, %v3657_v58 }
 0x159   : > { %vm1420_vm2 = vcmp.ge.f32.partialorder %v1042_v53, 0.0  ;;  %2314 = vst.msk [vmem:[%s3317_s25 + $0xa4] sm:$0xf] %vm2272_vm1, %v2767_v54  ;;  %v1737_v6 = vsel %vm1481_vm14, %v1285_v44, %v1609_v26  ;;  %v1548_v51 = vmul.f32 0.1, %v1042_v53  ;;  %v1309_v10 = vadd.f32 %v3670_v17, %v3659_v12  ;;  %v3788_v11 = vpop.f32.mrb[57].mxu1 }
 0x15a   : > { %v2831_v7 = vpack.c.bf16 %v1737_v6, %v1737_v6  ;;  %v1678_v36 = vsel %vm1422_vm15, %v1050_v45, %v1550_v60  ;;  %v1742_v55 = vsel %vm1486_vm0, %v1306_v25, %v1614_v59  ;;  %v3790_v48 = vpop.f32.mrb[58].mxu0  ;;  %vm1484_vm3 = vcmp.ge.f32.partialorder %v1298_v32, 0.0  ;;  %v3793_v56 = vpop.f32.mrb[58].mxu1 }
 0x15b   : > { %v2772_v9 = vpack.c.bf16 %v1678_v36, %v1678_v36  ;;  %v2836_v1 = vpack.c.bf16 %v1742_v55, %v1742_v55  ;;  %v1676_v58 = vsel %vm1420_vm2, %v1042_v53, %v1548_v51  ;;  %v3795_v33 = vpop.f32.mrb[59].mxu0  ;;  %v1612_v63 = vmul.f32 0.1, %v1298_v32  ;;  %v3799_v35 = vpop.f32.mrb[59].mxu1 }
 0x15c   : > { %2378 = vst.msk [vmem:[%s3317_s25 + $0x1a4] sm:$0xf] %vm2272_vm1, %v2831_v7  ;;  %v2770_v16 = vpack.c.bf16 %v1676_v58, %v1676_v58  ;;  %vm1423_vm4 = vcmp.ge.f32.partialorder %v1053_v2, 0.0  ;;  %v1551_v12 = vmul.f32 0.1, %v1053_v2  ;;  %vm1487_vm5 = vcmp.ge.f32.partialorder %v1309_v10, 0.0 }
 0x15d   : > { %2319 = vst.msk [vmem:[%s3317_s25 + $0xb8] sm:$0xf] %vm2272_vm1, %v2772_v9  ;;  %2383 = vst.msk [vmem:[%s3317_s25 + $0x1b8] sm:$0xf] %vm2272_vm1, %v2836_v1  ;;  %v1615_v28 = vmul.f32 0.1, %v1309_v10  ;;  %v1045_v30 = vadd.f32 %v3670_v17, %v3676_v14  ;;  %v1301_v37 = vadd.f32 %v3670_v17, %v3678_v19  ;;  %v1740_v40 = vsel %vm1484_vm3, %v1298_v32, %v1612_v63 }
 0x15e   : > { %2317 = vst.msk [vmem:[%s3317_s25 + $0xb0] sm:$0xf] %vm2272_vm1, %v2770_v16  ;;  %v1679_v15 = vsel %vm1423_vm4, %v1053_v2, %v1551_v12  ;;  %v1066_v57 = vadd.f32 %v3670_v17, %v3688_v22  ;;  %v1322_v61 = vadd.f32 %v3670_v17, %v3700_v42  ;;  %v2834_v27 = vpack.c.bf16 %v1740_v40, %v1740_v40  ;;  %v3816_v38 = vpop.f32.mrb[60].mxu0  ;;  %v3818_v43 = vpop.f32.mrb[60].mxu1 }
 0x15f   : > { %v2773_v41 = vpack.c.bf16 %v1679_v15, %v1679_v15  ;;  %v1743_v14 = vsel %vm1487_vm5, %v1309_v10, %v1615_v28  ;;  %vm1421_vm6 = vcmp.ge.f32.partialorder %v1045_v30, 0.0  ;;  %v1549_v39 = vmul.f32 0.1, %v1045_v30  ;;  %v3830_v25 = vpop.f32.mrb[61].mxu0  ;;  %v3832_v53 = vpop.f32.mrb[61].mxu1 }
 0x160   : > { %v2837_v19 = vpack.c.bf16 %v1743_v14, %v1743_v14  ;;  %vm1485_vm7 = vcmp.ge.f32.partialorder %v1301_v37, 0.0  ;;  %v1613_v0 = vmul.f32 0.1, %v1301_v37  ;;  %2381 = vst.msk [vmem:[%s3317_s25 + $0x1b0] sm:$0xf] %vm2272_vm1, %v2834_v27  ;;  %vm1426_vm8 = vcmp.ge.f32.partialorder %v1066_v57, 0.0 }
 0x161   : > { %2320 = vst.msk [vmem:[%s3317_s25 + $0xbc] sm:$0xf] %vm2272_vm1, %v2773_v41  ;;  %v1554_v22 = vmul.f32 0.1, %v1066_v57  ;;  %vm1490_vm9 = vcmp.ge.f32.partialorder %v1322_v61, 0.0  ;;  %v1677_v44 = vsel %vm1421_vm6, %v1045_v30, %v1549_v39  ;;  %v1058_v52 = vadd.f32 %v3670_v17, %v3702_v4  ;;  %v3834_v6 = vpop.f32.mrb[62].mxu0 }
 0x162   : > { %v1618_v42 = vmul.f32 0.1, %v1322_v61  ;;  %2384 = vst.msk [vmem:[%s3317_s25 + $0x1bc] sm:$0xf] %vm2272_vm1, %v2837_v19  ;;  %v1741_v45 = vsel %vm1485_vm7, %v1301_v37, %v1613_v0  ;;  %v1314_v8 = vadd.f32 %v3670_v17, %v3704_v49  ;;  %v2771_v54 = vpack.c.bf16 %v1677_v44, %v1677_v44  ;;  %v3836_v51 = vpop.f32.mrb[62].mxu1  ;;  %v3838_v49 = vpop.f32.mrb[63].mxu0 }
 0x163   : > { %v2835_v26 = vpack.c.bf16 %v1741_v45, %v1741_v45  ;;  %v1682_v60 = vsel %vm1426_vm8, %v1066_v57, %v1554_v22  ;;  %vm1424_vm10 = vcmp.ge.f32.partialorder %v1058_v52, 0.0  ;;  %v1552_v2 = vmul.f32 0.1, %v1058_v52  ;;  %v3840_v7 = vpop.f32.mrb[63].mxu1 }
 0x164   : > { %v1746_v59 = vsel %vm1490_vm9, %v1322_v61, %v1618_v42  ;;  %v2776_v4 = vpack.c.bf16 %v1682_v60, %v1682_v60  ;;  %2318 = vst.msk [vmem:[%s3317_s25 + $0xb4] sm:$0xf] %vm2272_vm1, %v2771_v54  ;;  %vm1488_vm11 = vcmp.ge.f32.partialorder %v1314_v8, 0.0  ;;  %v1616_v36 = vmul.f32 0.1, %v1314_v8 }
 0x165   : > { %v2840_v32 = vpack.c.bf16 %v1746_v59, %v1746_v59  ;;  %2382 = vst.msk [vmem:[%s3317_s25 + $0x1b4] sm:$0xf] %vm2272_vm1, %v2835_v26  ;;  %v1069_v55 = vadd.f32 %v3670_v17, %v3706_v24  ;;  %v1325_v10 = vadd.f32 %v3670_v17, %v3708_v50  ;;  %v1680_v9 = vsel %vm1424_vm10, %v1058_v52, %v1552_v2 }
 0x166   : > { %2323 = vst.msk [vmem:[%s3317_s25 + $0xc8] sm:$0xf] %vm2272_vm1, %v2776_v4  ;;  %v1061_v1 = vadd.f32 %v3670_v17, %v3710_v23  ;;  %v1317_v58 = vadd.f32 %v3670_v17, %v3714_v47  ;;  %v1082_v16 = vadd.f32 %v3670_v17, %v3728_v13  ;;  %v2774_v24 = vpack.c.bf16 %v1680_v9, %v1680_v9 }
 0x167   : > { %2387 = vst.msk [vmem:[%s3317_s25 + $0x1c8] sm:$0xf] %vm2272_vm1, %v2840_v32  ;;  %v1744_v63 = vsel %vm1488_vm11, %v1314_v8, %v1616_v36  ;;  %vm1427_vm12 = vcmp.ge.f32.partialorder %v1069_v55, 0.0  ;;  %v1555_v12 = vmul.f32 0.1, %v1069_v55  ;;  %vm1491_vm13 = vcmp.ge.f32.partialorder %v1325_v10, 0.0 }
 0x168   : > { %v2838_v50 = vpack.c.bf16 %v1744_v63, %v1744_v63  ;;  %v1619_v28 = vmul.f32 0.1, %v1325_v10  ;;  %vm1425_vm14 = vcmp.ge.f32.partialorder %v1061_v1, 0.0  ;;  %2321 = vst.msk [vmem:[%s3317_s25 + $0xc0] sm:$0xf] %vm2272_vm1, %v2774_v24  ;;  %vm1489_vm15 = vcmp.ge.f32.partialorder %v1317_v58, 0.0 }
 0x169   : > { %v1683_v30 = vsel %vm1427_vm12, %v1069_v55, %v1555_v12  ;;  %v1553_v23 = vmul.f32 0.1, %v1061_v1  ;;  %v1617_v37 = vmul.f32 0.1, %v1317_v58  ;;  %vm1430_vm0 = vcmp.ge.f32.partialorder %v1082_v16, 0.0 }
 0x16a   : > { %2385 = vst.msk [vmem:[%s3317_s25 + $0x1c0] sm:$0xf] %vm2272_vm1, %v2838_v50  ;;  %v2777_v47 = vpack.c.bf16 %v1683_v30, %v1683_v30  ;;  %v1747_v13 = vsel %vm1491_vm13, %v1325_v10, %v1619_v28  ;;  %v1558_v40 = vmul.f32 0.1, %v1082_v16  ;;  %v1338_v27 = vadd.f32 %v3670_v17, %v3738_v62 }
 0x16b   : > { %v2841_v15 = vpack.c.bf16 %v1747_v13, %v1747_v13  ;;  %v1681_v57 = vsel %vm1425_vm14, %v1061_v1, %v1553_v23  ;;  %v1745_v61 = vsel %vm1489_vm15, %v1317_v58, %v1617_v37  ;;  %v1074_v39 = vadd.f32 %v3670_v17, %v3740_v18 }
 0x16c   : > { %2324 = vst.msk [vmem:[%s3317_s25 + $0xcc] sm:$0xf] %vm2272_vm1, %v2777_v47  ;;  %v2775_v41 = vpack.c.bf16 %v1681_v57, %v1681_v57  ;;  %v2839_v14 = vpack.c.bf16 %v1745_v61, %v1745_v61  ;;  %v1686_v19 = vsel %vm1430_vm0, %v1082_v16, %v1558_v40  ;;  %vm1494_vm2 = vcmp.ge.f32.partialorder %v1338_v27, 0.0 }
 0x16d   : > { %2388 = vst.msk [vmem:[%s3317_s25 + $0x1cc] sm:$0xf] %vm2272_vm1, %v2841_v15  ;;  %v2780_v0 = vpack.c.bf16 %v1686_v19, %v1686_v19  ;;  %v1622_v22 = vmul.f32 0.1, %v1338_v27  ;;  %v1330_v42 = vadd.f32 %v3670_v17, %v3746_v31  ;;  %vm1428_vm3 = vcmp.ge.f32.partialorder %v1074_v39, 0.0 }
 0x16e   : > { %2322 = vst.msk [vmem:[%s3317_s25 + $0xc4] sm:$0xf] %vm2272_vm1, %v2775_v41  ;;  %2386 = vst.msk [vmem:[%s3317_s25 + $0x1c4] sm:$0xf] %vm2272_vm1, %v2839_v14  ;;  %v1556_v62 = vmul.f32 0.1, %v1074_v39  ;;  %v1085_v44 = vadd.f32 %v3670_v17, %v3748_v20  ;;  %v1341_v18 = vadd.f32 %v3670_v17, %v3750_v34  ;;  %v1077_v31 = vadd.f32 %v3670_v17, %v3752_v21 }
 0x16f   : > { %2327 = vst.msk [vmem:[%s3317_s25 + $0xd8] sm:$0xf] %vm2272_vm1, %v2780_v0  ;;  %v1750_v45 = vsel %vm1494_vm2, %v1338_v27, %v1622_v22  ;;  %vm1492_vm4 = vcmp.ge.f32.partialorder %v1330_v42, 0.0  ;;  %v1620_v52 = vmul.f32 0.1, %v1330_v42  ;;  %v1333_v36 = vadd.f32 %v3670_v17, %v3754_v29 }
 0x170   : > { %v2844_v8 = vpack.c.bf16 %v1750_v45, %v1750_v45  ;;  %v1684_v54 = vsel %vm1428_vm3, %v1074_v39, %v1556_v62  ;;  %vm1431_vm5 = vcmp.ge.f32.partialorder %v1085_v44, 0.0  ;;  %v1559_v26 = vmul.f32 0.1, %v1085_v44 }
 0x171   : > { %v2778_v60 = vpack.c.bf16 %v1684_v54, %v1684_v54  ;;  %v1748_v59 = vsel %vm1492_vm4, %v1330_v42, %v1620_v52  ;;  %vm1495_vm6 = vcmp.ge.f32.partialorder %v1341_v18, 0.0  ;;  %v1623_v20 = vmul.f32 0.1, %v1341_v18 }
 0x172   : > { %2391 = vst.msk [vmem:[%s3317_s25 + $0x1d8] sm:$0xf] %vm2272_vm1, %v2844_v8  ;;  %v2842_v34 = vpack.c.bf16 %v1748_v59, %v1748_v59  ;;  %v1687_v4 = vsel %vm1431_vm5, %v1085_v44, %v1559_v26  ;;  %vm1429_vm7 = vcmp.ge.f32.partialorder %v1077_v31, 0.0  ;;  %v1557_v32 = vmul.f32 0.1, %v1077_v31 }
 0x173   : > { %2325 = vst.msk [vmem:[%s3317_s25 + $0xd0] sm:$0xf] %vm2272_vm1, %v2778_v60  ;;  %v2781_v21 = vpack.c.bf16 %v1687_v4, %v1687_v4  ;;  %v1751_v2 = vsel %vm1495_vm6, %v1341_v18, %v1623_v20  ;;  %v1098_v55 = vadd.f32 %v3670_v17, %v3772_v46  ;;  %v1354_v1 = vadd.f32 %v3670_v17, %v3782_v3 }
 0x174   : > { %2389 = vst.msk [vmem:[%s3317_s25 + $0x1d0] sm:$0xf] %vm2272_vm1, %v2842_v34  ;;  %v2845_v10 = vpack.c.bf16 %v1751_v2, %v1751_v2  ;;  %v1685_v9 = vsel %vm1429_vm7, %v1077_v31, %v1557_v32  ;;  %v1090_v58 = vadd.f32 %v3670_v17, %v3784_v5  ;;  %vm1493_vm8 = vcmp.ge.f32.partialorder %v1333_v36, 0.0 }
 0x175   : > { %2328 = vst.msk [vmem:[%s3317_s25 + $0xdc] sm:$0xf] %vm2272_vm1, %v2781_v21  ;;  %v2779_v16 = vpack.c.bf16 %v1685_v9, %v1685_v9  ;;  %v1621_v24 = vmul.f32 0.1, %v1333_v36  ;;  %vm1434_vm9 = vcmp.ge.f32.partialorder %v1098_v55, 0.0  ;;  %vm1498_vm10 = vcmp.ge.f32.partialorder %v1354_v1, 0.0 }
 0x176   : > { %2392 = vst.msk [vmem:[%s3317_s25 + $0x1dc] sm:$0xf] %vm2272_vm1, %v2845_v10  ;;  %v1562_v29 = vmul.f32 0.1, %v1098_v55  ;;  %v1626_v46 = vmul.f32 0.1, %v1354_v1  ;;  %v1346_v5 = vadd.f32 %v3670_v17, %v3788_v11  ;;  %v1101_v12 = vadd.f32 %v3670_v17, %v3790_v48 }
 0x177   : > { %vm1432_vm11 = vcmp.ge.f32.partialorder %v1090_v58, 0.0  ;;  %2326 = vst.msk [vmem:[%s3317_s25 + $0xd4] sm:$0xf] %vm2272_vm1, %v2779_v16  ;;  %v1749_v63 = vsel %vm1493_vm8, %v1333_v36, %v1621_v24  ;;  %v1560_v3 = vmul.f32 0.1, %v1090_v58  ;;  %v1357_v23 = vadd.f32 %v3670_v17, %v3793_v56 }
 0x178   : > { %v2843_v50 = vpack.c.bf16 %v1749_v63, %v1749_v63  ;;  %v1690_v28 = vsel %vm1434_vm9, %v1098_v55, %v1562_v29  ;;  %v1754_v30 = vsel %vm1498_vm10, %v1354_v1, %v1626_v46  ;;  %vm1496_vm12 = vcmp.ge.f32.partialorder %v1346_v5, 0.0 }
 0x179   : > { %v2784_v37 = vpack.c.bf16 %v1690_v28, %v1690_v28  ;;  %v2848_v47 = vpack.c.bf16 %v1754_v30, %v1754_v30  ;;  %v1688_v13 = vsel %vm1432_vm11, %v1090_v58, %v1560_v3  ;;  %v1624_v15 = vmul.f32 0.1, %v1346_v5 }
 0x17a   : > { %2390 = vst.msk [vmem:[%s3317_s25 + $0x1d4] sm:$0xf] %vm2272_vm1, %v2843_v50  ;;  %v2782_v40 = vpack.c.bf16 %v1688_v13, %v1688_v13  ;;  %vm1435_vm13 = vcmp.ge.f32.partialorder %v1101_v12, 0.0  ;;  %v1563_v11 = vmul.f32 0.1, %v1101_v12  ;;  %vm1499_vm14 = vcmp.ge.f32.partialorder %v1357_v23, 0.0 }
 0x17b   : > { %2331 = vst.msk [vmem:[%s3317_s25 + $0xe8] sm:$0xf] %vm2272_vm1, %v2784_v37  ;;  %2395 = vst.msk [vmem:[%s3317_s25 + $0x1e8] sm:$0xf] %vm2272_vm1, %v2848_v47  ;;  %v1627_v48 = vmul.f32 0.1, %v1357_v23  ;;  %v1093_v56 = vadd.f32 %v3670_v17, %v3795_v33  ;;  %v1349_v57 = vadd.f32 %v3670_v17, %v3799_v35  ;;  %v1752_v61 = vsel %vm1496_vm12, %v1346_v5, %v1624_v15 }
 0x17c   : > { %2329 = vst.msk [vmem:[%s3317_s25 + $0xe0] sm:$0xf] %vm2272_vm1, %v2782_v40  ;;  %v1691_v27 = vsel %vm1435_vm13, %v1101_v12, %v1563_v11  ;;  %v1114_v41 = vadd.f32 %v3670_v17, %v3816_v38  ;;  %v1370_v14 = vadd.f32 %v3670_v17, %v3818_v43  ;;  %v2846_v19 = vpack.c.bf16 %v1752_v61, %v1752_v61 }
 0x17d   : > { %v2785_v39 = vpack.c.bf16 %v1691_v27, %v1691_v27  ;;  %v1755_v0 = vsel %vm1499_vm14, %v1357_v23, %v1627_v48  ;;  %vm1433_vm15 = vcmp.ge.f32.partialorder %v1093_v56, 0.0  ;;  %v1561_v22 = vmul.f32 0.1, %v1093_v56 }
 0x17e   : > { %v2849_v33 = vpack.c.bf16 %v1755_v0, %v1755_v0  ;;  %vm1497_vm0 = vcmp.ge.f32.partialorder %v1349_v57, 0.0  ;;  %v1625_v42 = vmul.f32 0.1, %v1349_v57  ;;  %2393 = vst.msk [vmem:[%s3317_s25 + $0x1e0] sm:$0xf] %vm2272_vm1, %v2846_v19  ;;  %vm1438_vm2 = vcmp.ge.f32.partialorder %v1114_v41, 0.0 }
 0x17f   : > { %2332 = vst.msk [vmem:[%s3317_s25 + $0xec] sm:$0xf] %vm2272_vm1, %v2785_v39  ;;  %v1566_v35 = vmul.f32 0.1, %v1114_v41  ;;  %vm1502_vm3 = vcmp.ge.f32.partialorder %v1370_v14, 0.0  ;;  %v1689_v43 = vsel %vm1433_vm15, %v1093_v56, %v1561_v22  ;;  %v1106_v44 = vadd.f32 %v3670_v17, %v3830_v25 }
 0x180   : > { %v1630_v38 = vmul.f32 0.1, %v1370_v14  ;;  %2396 = vst.msk [vmem:[%s3317_s25 + $0x1ec] sm:$0xf] %vm2272_vm1, %v2849_v33  ;;  %v1753_v62 = vsel %vm1497_vm0, %v1349_v57, %v1625_v42  ;;  %v1362_v18 = vadd.f32 %v3670_v17, %v3832_v53  ;;  %v2783_v45 = vpack.c.bf16 %v1689_v43, %v1689_v43 }
 0x181   : > { %v2847_v52 = vpack.c.bf16 %v1753_v62, %v1753_v62  ;;  %v1694_v31 = vsel %vm1438_vm2, %v1114_v41, %v1566_v35  ;;  %vm1436_vm4 = vcmp.ge.f32.partialorder %v1106_v44, 0.0  ;;  %v1564_v60 = vmul.f32 0.1, %v1106_v44 }
 0x182   : > { %v1758_v8 = vsel %vm1502_vm3, %v1370_v14, %v1630_v38  ;;  %v2788_v54 = vpack.c.bf16 %v1694_v31, %v1694_v31  ;;  %2330 = vst.msk [vmem:[%s3317_s25 + $0xe4] sm:$0xf] %vm2272_vm1, %v2783_v45  ;;  %vm1500_vm5 = vcmp.ge.f32.partialorder %v1362_v18, 0.0  ;;  %v1628_v59 = vmul.f32 0.1, %v1362_v18 }
 0x183   : > { %v2852_v26 = vpack.c.bf16 %v1758_v8, %v1758_v8  ;;  %2394 = vst.msk [vmem:[%s3317_s25 + $0x1e4] sm:$0xf] %vm2272_vm1, %v2847_v52  ;;  %v1117_v25 = vadd.f32 %v3670_v17, %v3834_v6  ;;  %v1373_v53 = vadd.f32 %v3670_v17, %v3836_v51  ;;  %v1692_v20 = vsel %vm1436_vm4, %v1106_v44, %v1564_v60 }
 0x184   : > { %2335 = vst.msk [vmem:[%s3317_s25 + $0xf8] sm:$0xf] %vm2272_vm1, %v2788_v54  ;;  %v1109_v34 = vadd.f32 %v3670_v17, %v3838_v49  ;;  %v1365_v4 = vadd.f32 %v3670_v17, %v3840_v7  ;;  %v2786_v32 = vpack.c.bf16 %v1692_v20, %v1692_v20  ;;  %v1756_v21 = vsel %vm1500_vm5, %v1362_v18, %v1628_v59 }
 0x185   : > { %2399 = vst.msk [vmem:[%s3317_s25 + $0x1f8] sm:$0xf] %vm2272_vm1, %v2852_v26  ;;  %vm1439_vm6 = vcmp.ge.f32.partialorder %v1117_v25, 0.0  ;;  %v1567_v2 = vmul.f32 0.1, %v1117_v25  ;;  %v2850_v6 = vpack.c.bf16 %v1756_v21, %v1756_v21  ;;  %vm1503_vm7 = vcmp.ge.f32.partialorder %v1373_v53, 0.0 }
 0x186   : > { %v1631_v51 = vmul.f32 0.1, %v1373_v53  ;;  %vm1437_vm8 = vcmp.ge.f32.partialorder %v1109_v34, 0.0  ;;  %2333 = vst.msk [vmem:[%s3317_s25 + $0xf0] sm:$0xf] %vm2272_vm1, %v2786_v32  ;;  %vm1501_vm9 = vcmp.ge.f32.partialorder %v1365_v4, 0.0 }
 0x187   : > { %v1695_v36 = vsel %vm1439_vm6, %v1117_v25, %v1567_v2  ;;  %v1565_v55 = vmul.f32 0.1, %v1109_v34  ;;  %v1629_v49 = vmul.f32 0.1, %v1365_v4  ;;  %2397 = vst.msk [vmem:[%s3317_s25 + $0x1f0] sm:$0xf] %vm2272_vm1, %v2850_v6 }
 0x188   : > { %v2789_v17 = vpack.c.bf16 %v1695_v36, %v1695_v36  ;;  %v1759_v7 = vsel %vm1503_vm7, %v1373_v53, %v1631_v51 }
 0x189   : > { %v2853_v10 = vpack.c.bf16 %v1759_v7, %v1759_v7  ;;  %v1693_v9 = vsel %vm1437_vm8, %v1109_v34, %v1565_v55  ;;  %v1757_v1 = vsel %vm1501_vm9, %v1365_v4, %v1629_v49 }
 0x18a   : > { %2336 = vst.msk [vmem:[%s3317_s25 + $0xfc] sm:$0xf] %vm2272_vm1, %v2789_v17  ;;  %v2787_v58 = vpack.c.bf16 %v1693_v9, %v1693_v9  ;;  %v2851_v16 = vpack.c.bf16 %v1757_v1, %v1757_v1 }
 0x18b   : > { %2400 = vst.msk [vmem:[%s3317_s25 + $0x1fc] sm:$0xf] %vm2272_vm1, %v2853_v10 }
 0x18c   : > { %2334 = vst.msk [vmem:[%s3317_s25 + $0xf4] sm:$0xf] %vm2272_vm1, %v2787_v58  ;;  %2398 = vst.msk [vmem:[%s3317_s25 + $0x1f4] sm:$0xf] %vm2272_vm1, %v2851_v16 }
 0x18d PF: > { %s13_s12 = sadd.s32 1, %s3131_s12  }
 0x18e   : > { %p10_p4 = scmp.ge.s32.totalorder %s13_s12, 4  }
 0x190   :  { %12 = sbr.rel (!%p10_p4) target bundleno = 1 (0x1), region = 62 }

// kernel: discriminator_forward.6
= control target key start
LH: loop header
LB: loop body
LE: loop exit
PB: predicated region body
PF: predicated region fallthrough
CT: control target
= control target key end

     0   :  { %v2784_v0 = vmov 0   ;;  %vm2072_vm1 = vcmask 257024   ;;  %s3647_s1 = inlined_call_operand.vmem [shape: bf16[512,32], index: 1, kind: input, shape index: {}]   ;;  %s3648_s0 = inlined_call_operand.vmem [shape: bf16[512,512], index: 0, kind: input, shape index: {}]   ;;  %s3649_s2 = inlined_call_operand.vmem [shape: f32[1,32], index: 2, kind: input, shape index: {}]   ;;  %s3650_s3 = inlined_call_operand.vmem [shape: bf16[512,32], index: 3, kind: output, shape index: {}]  }
   0x1   :  { %1046 = vmatprep.subr.bf16.mxu1 %v2784_v0  ;;  %1335 = vmatprep.subr.bf16.mxu0 %v2784_v0  ;;  %v2559_v1 = vld [vmem:[%s3647_s1] sm:$0xff]   ;;  %v2561_v3 = vld [vmem:[%s3647_s1 + $0x8] sm:$0xff]   ;;  %v2563_v5 = vld [vmem:[%s3647_s1 + $0x10] sm:$0xff]  }
   0x2   :  { %v2560_v2 = vld [vmem:[%s3647_s1 + $0x80] sm:$0xff]   ;;  %1047 = vmatpush1.bf16.msra.mxu1 %v2559_v1  ;;  %v2562_v4 = vld [vmem:[%s3647_s1 + $0x88] sm:$0xff]   ;;  %v2564_v6 = vld [vmem:[%s3647_s1 + $0x90] sm:$0xff]  }
   0x3   :  { %1336 = vmatpush1.bf16.msra.mxu0 %v2560_v2  ;;  %1048 = vmatprep.subr.bf16.mxu1 %v2784_v0  ;;  %v2565_v7 = vld [vmem:[%s3647_s1 + $0x18] sm:$0xff]   ;;  %v2567_v9 = vld [vmem:[%s3647_s1 + $0x20] sm:$0xff]   ;;  %v2569_v11 = vld [vmem:[%s3647_s1 + $0x28] sm:$0xff]  }
   0x4   :  { %1337 = vmatprep.subr.bf16.mxu0 %v2784_v0  ;;  %v2566_v8 = vld [vmem:[%s3647_s1 + $0x98] sm:$0xff]   ;;  %v2568_v10 = vld [vmem:[%s3647_s1 + $0xa0] sm:$0xff]   ;;  %v2570_v12 = vld [vmem:[%s3647_s1 + $0xa8] sm:$0xff]  }
   0x5   :  { %v2571_v13 = vld [vmem:[%s3647_s1 + $0x30] sm:$0xff]   ;;  %v2573_v15 = vld [vmem:[%s3647_s1 + $0x38] sm:$0xff]   ;;  %v2575_v17 = vld [vmem:[%s3647_s1 + $0x40] sm:$0xff]  }
   0x6   :  { %1049 = vmatpush1.bf16.msra.mxu1 %v2561_v3  ;;  %v2572_v14 = vld [vmem:[%s3647_s1 + $0xb0] sm:$0xff]   ;;  %v2574_v16 = vld [vmem:[%s3647_s1 + $0xb8] sm:$0xff]   ;;  %v2576_v18 = vld [vmem:[%s3647_s1 + $0xc0] sm:$0xff]  }
   0x7   :  { %1338 = vmatpush1.bf16.msra.mxu0 %v2562_v4  ;;  %1050 = vmatprep.subr.bf16.mxu1 %v2784_v0  ;;  %v2593_v19 = vld [vmem:[%s3648_s0 + $0x4] ss:$16 sps:$4 sm:$0xff]   ;;  %v2577_v20 = vld [vmem:[%s3647_s1 + $0x48] sm:$0xff]   ;;  %v2581_v25 = vld [vmem:[%s3647_s1 + $0x58] sm:$0xff]  }
   0x8   :  { %1339 = vmatprep.subr.bf16.mxu0 %v2784_v0  ;;  %v2596_v21 = vld [vmem:[%s3648_s0 + $0xc] ss:$16 sps:$4 sm:$0xff]   ;;  %1078 = vmatprep.mubr.bf16.mxu1 %v2593_v19  ;;  %v2579_v23 = vld [vmem:[%s3647_s1 + $0x50] sm:$0xff]   ;;  %v2583_v27 = vld [vmem:[%s3647_s1 + $0x60] sm:$0xff]  }
   0x9   :  { %v2578_v22 = vld [vmem:[%s3647_s1 + $0xc8] sm:$0xff]   ;;  %1367 = vmatprep.mubr.bf16.mxu0 %v2596_v21  ;;  %v2580_v24 = vld [vmem:[%s3647_s1 + $0xd0] sm:$0xff]   ;;  %v2582_v26 = vld [vmem:[%s3647_s1 + $0xd8] sm:$0xff]  }
   0xa   :  { %1051 = vmatpush1.bf16.msra.mxu1 %v2563_v5  ;;  %v2584_v28 = vld [vmem:[%s3647_s1 + $0xe0] sm:$0xff]   ;;  %v2585_v29 = vld [vmem:[%s3647_s1 + $0x68] sm:$0xff]   ;;  %v2587_v31 = vld [vmem:[%s3647_s1 + $0x70] sm:$0xff]  }
   0xb   :  { %1340 = vmatpush1.bf16.msra.mxu0 %v2564_v6  ;;  %1052 = vmatprep.subr.bf16.mxu1 %v2784_v0  ;;  %v2586_v30 = vld [vmem:[%s3647_s1 + $0xe8] sm:$0xff]   ;;  %v2588_v32 = vld [vmem:[%s3647_s1 + $0xf0] sm:$0xff]   ;;  %v2589_v33 = vld [vmem:[%s3647_s1 + $0x78] sm:$0xff]  }
   0xc   :  { %1341 = vmatprep.subr.bf16.mxu0 %v2784_v0  ;;  %v2590_v34 = vld [vmem:[%s3647_s1 + $0xf8] sm:$0xff]   ;;  %v2591_v35 = vld [vmem:[%s3648_s0] ss:$16 sps:$4 sm:$0xff]   ;;  %v2597_v37 = vld [vmem:[%s3648_s0 + $0x24] ss:$16 sps:$4 sm:$0xff]  }
   0xd   :  { %v2594_v36 = vld [vmem:[%s3648_s0 + $0x8] ss:$16 sps:$4 sm:$0xff]   ;;  %v2599_v38 = vld [vmem:[%s3648_s0 + $0x2c] ss:$16 sps:$4 sm:$0xff]   ;;  %v2601_v39 = vld [vmem:[%s3648_s0 + $0x20] ss:$16 sps:$4 sm:$0xff]  }
   0xe   :  { %1053 = vmatpush1.bf16.msra.mxu1 %v2565_v7  ;;  %v2602_v40 = vld [vmem:[%s3648_s0 + $0x28] ss:$16 sps:$4 sm:$0xff]   ;;  %v2603_v41 = vld [vmem:[%s3648_s0 + $0x44] ss:$16 sps:$4 sm:$0xff]   ;;  %v2605_v42 = vld [vmem:[%s3648_s0 + $0x4c] ss:$16 sps:$4 sm:$0xff]  }
   0xf   :  { %1342 = vmatpush1.bf16.msra.mxu0 %v2566_v8  ;;  %1054 = vmatprep.subr.bf16.mxu1 %v2784_v0  ;;  %v2607_v43 = vld [vmem:[%s3648_s0 + $0x40] ss:$16 sps:$4 sm:$0xff]   ;;  %v2608_v44 = vld [vmem:[%s3648_s0 + $0x48] ss:$16 sps:$4 sm:$0xff]   ;;  %v2609_v45 = vld [vmem:[%s3648_s0 + $0x64] ss:$16 sps:$4 sm:$0xff]  }
  0x10   :  { %1343 = vmatprep.subr.bf16.mxu0 %v2784_v0  ;;  %v2611_v46 = vld [vmem:[%s3648_s0 + $0x6c] ss:$16 sps:$4 sm:$0xff]   ;;  %v2613_v47 = vld [vmem:[%s3648_s0 + $0x60] ss:$16 sps:$4 sm:$0xff]   ;;  %v2614_v48 = vld [vmem:[%s3648_s0 + $0x68] ss:$16 sps:$4 sm:$0xff]  }
  0x11   :  { %v2615_v49 = vld [vmem:[%s3648_s0 + $0x84] ss:$16 sps:$4 sm:$0xff]   ;;  %v2617_v50 = vld [vmem:[%s3648_s0 + $0x8c] ss:$16 sps:$4 sm:$0xff]   ;;  %v2619_v51 = vld [vmem:[%s3648_s0 + $0x80] ss:$16 sps:$4 sm:$0xff]  }
  0x12   :  { %1055 = vmatpush1.bf16.msra.mxu1 %v2567_v9  ;;  %v2620_v52 = vld [vmem:[%s3648_s0 + $0x88] ss:$16 sps:$4 sm:$0xff]   ;;  %v2621_v53 = vld [vmem:[%s3648_s0 + $0xa4] ss:$16 sps:$4 sm:$0xff]   ;;  %v2623_v54 = vld [vmem:[%s3648_s0 + $0xac] ss:$16 sps:$4 sm:$0xff]  }
  0x13   :  { %1344 = vmatpush1.bf16.msra.mxu0 %v2568_v10  ;;  %1056 = vmatprep.subr.bf16.mxu1 %v2784_v0  ;;  %v2625_v55 = vld [vmem:[%s3648_s0 + $0xa0] ss:$16 sps:$4 sm:$0xff]   ;;  %v2626_v56 = vld [vmem:[%s3648_s0 + $0xa8] ss:$16 sps:$4 sm:$0xff]   ;;  %v2627_v57 = vld [vmem:[%s3648_s0 + $0xc4] ss:$16 sps:$4 sm:$0xff]  }
  0x14   :  { %1345 = vmatprep.subr.bf16.mxu0 %v2784_v0  ;;  %v2629_v58 = vld [vmem:[%s3648_s0 + $0xcc] ss:$16 sps:$4 sm:$0xff]   ;;  %v2631_v59 = vld [vmem:[%s3648_s0 + $0xc0] ss:$16 sps:$4 sm:$0xff]   ;;  %v2632_v60 = vld [vmem:[%s3648_s0 + $0xc8] ss:$16 sps:$4 sm:$0xff]  }
  0x15   :  { %v2633_v61 = vld [vmem:[%s3648_s0 + $0xe4] ss:$16 sps:$4 sm:$0xff]   ;;  %v2635_v62 = vld [vmem:[%s3648_s0 + $0xec] ss:$16 sps:$4 sm:$0xff]   ;;  %v2637_v63 = vld [vmem:[%s3648_s0 + $0xe0] ss:$16 sps:$4 sm:$0xff]  }
  0x16   :  { %1057 = vmatpush1.bf16.msra.mxu1 %v2569_v11  ;;  %v2639_v1 = vld [vmem:[%s3648_s0 + $0x104] ss:$16 sps:$4 sm:$0xff]   ;;  %v2641_v2 = vld [vmem:[%s3648_s0 + $0x10c] ss:$16 sps:$4 sm:$0xff]   ;;  %v2643_v3 = vld [vmem:[%s3648_s0 + $0x100] ss:$16 sps:$4 sm:$0xff]  }
  0x17   :  { %1346 = vmatpush1.bf16.msra.mxu0 %v2570_v12  ;;  %1058 = vmatprep.subr.bf16.mxu1 %v2784_v0  ;;  %v2644_v4 = vld [vmem:[%s3648_s0 + $0x108] ss:$16 sps:$4 sm:$0xff]   ;;  %v2645_v5 = vld [vmem:[%s3648_s0 + $0x124] ss:$16 sps:$4 sm:$0xff]   ;;  %v2647_v6 = vld [vmem:[%s3648_s0 + $0x12c] ss:$16 sps:$4 sm:$0xff]  }
  0x18   :  { %1347 = vmatprep.subr.bf16.mxu0 %v2784_v0  ;;  %v2649_v7 = vld [vmem:[%s3648_s0 + $0x120] ss:$16 sps:$4 sm:$0xff]   ;;  %v2650_v8 = vld [vmem:[%s3648_s0 + $0x128] ss:$16 sps:$4 sm:$0xff]   ;;  %v2651_v9 = vld [vmem:[%s3648_s0 + $0x144] ss:$16 sps:$4 sm:$0xff]  }
  0x19   :  { %v2653_v10 = vld [vmem:[%s3648_s0 + $0x14c] ss:$16 sps:$4 sm:$0xff]   ;;  %v2655_v11 = vld [vmem:[%s3648_s0 + $0x140] ss:$16 sps:$4 sm:$0xff]   ;;  %v2656_v12 = vld [vmem:[%s3648_s0 + $0x148] ss:$16 sps:$4 sm:$0xff]  }
  0x1a   :  { %1059 = vmatpush1.bf16.msra.mxu1 %v2571_v13  ;;  %v2657_v13 = vld [vmem:[%s3648_s0 + $0x164] ss:$16 sps:$4 sm:$0xff]   ;;  %v2667_v19 = vld [vmem:[%s3648_s0 + $0x180] ss:$16 sps:$4 sm:$0xff]  }
  0x1b   :  { %1348 = vmatpush1.bf16.msra.mxu0 %v2572_v14  ;;  %1060 = vmatprep.subr.bf16.mxu1 %v2784_v0  ;;  %v2659_v14 = vld [vmem:[%s3648_s0 + $0x16c] ss:$16 sps:$4 sm:$0xff]   ;;  %v2669_v21 = vld [vmem:[%s3648_s0 + $0x1a4] ss:$16 sps:$4 sm:$0xff]  }
  0x1c   :  { %1349 = vmatprep.subr.bf16.mxu0 %v2784_v0 }
  0x1e   :  { %1061 = vmatpush1.bf16.msra.mxu1 %v2573_v15  ;;  %v2661_v15 = vld [vmem:[%s3648_s0 + $0x160] ss:$16 sps:$4 sm:$0xff]  }
  0x1f   :  { %1350 = vmatpush1.bf16.msra.mxu0 %v2574_v16  ;;  %1062 = vmatprep.subr.bf16.mxu1 %v2784_v0  ;;  %v2662_v16 = vld [vmem:[%s3648_s0 + $0x168] ss:$16 sps:$4 sm:$0xff]  }
  0x20   :  { %1351 = vmatprep.subr.bf16.mxu0 %v2784_v0 }
  0x22   :  { %1063 = vmatpush1.bf16.msra.mxu1 %v2575_v17  ;;  %v2663_v17 = vld [vmem:[%s3648_s0 + $0x184] ss:$16 sps:$4 sm:$0xff]  }
  0x23   :  { %1352 = vmatpush1.bf16.msra.mxu0 %v2576_v18  ;;  %1064 = vmatprep.subr.bf16.mxu1 %v2784_v0  ;;  %v2665_v18 = vld [vmem:[%s3648_s0 + $0x18c] ss:$16 sps:$4 sm:$0xff]  }
  0x24   :  { %1353 = vmatprep.subr.bf16.mxu0 %v2784_v0 }
  0x26   :  { %1065 = vmatpush1.bf16.msra.mxu1 %v2577_v20  ;;  %v2668_v20 = vld [vmem:[%s3648_s0 + $0x188] ss:$16 sps:$4 sm:$0xff]  }
  0x27   :  { %1354 = vmatpush1.bf16.msra.mxu0 %v2578_v22  ;;  %1066 = vmatprep.subr.bf16.mxu1 %v2784_v0  ;;  %v2671_v22 = vld [vmem:[%s3648_s0 + $0x1ac] ss:$16 sps:$4 sm:$0xff]  }
  0x28   :  { %1355 = vmatprep.subr.bf16.mxu0 %v2784_v0 }
  0x2a   :  { %1067 = vmatpush1.bf16.msra.mxu1 %v2579_v23  ;;  %v2673_v23 = vld [vmem:[%s3648_s0 + $0x1a0] ss:$16 sps:$4 sm:$0xff]  }
  0x2b   :  { %1356 = vmatpush1.bf16.msra.mxu0 %v2580_v24  ;;  %1068 = vmatprep.subr.bf16.mxu1 %v2784_v0  ;;  %v2674_v24 = vld [vmem:[%s3648_s0 + $0x1a8] ss:$16 sps:$4 sm:$0xff]  }
  0x2c   :  { %1357 = vmatprep.subr.bf16.mxu0 %v2784_v0 }
  0x2e   :  { %1069 = vmatpush1.bf16.msra.mxu1 %v2581_v25  ;;  %v2675_v25 = vld [vmem:[%s3648_s0 + $0x1c4] ss:$16 sps:$4 sm:$0xff]  }
  0x2f   :  { %1358 = vmatpush1.bf16.msra.mxu0 %v2582_v26  ;;  %1070 = vmatprep.subr.bf16.mxu1 %v2784_v0  ;;  %v2677_v26 = vld [vmem:[%s3648_s0 + $0x1cc] ss:$16 sps:$4 sm:$0xff]  }
  0x30   :  { %1359 = vmatprep.subr.bf16.mxu0 %v2784_v0 }
  0x32   :  { %1071 = vmatpush1.bf16.msra.mxu1 %v2583_v27  ;;  %v2679_v27 = vld [vmem:[%s3648_s0 + $0x1c0] ss:$16 sps:$4 sm:$0xff]  }
  0x33   :  { %1360 = vmatpush1.bf16.msra.mxu0 %v2584_v28  ;;  %1072 = vmatprep.subr.bf16.mxu1 %v2784_v0  ;;  %v2680_v28 = vld [vmem:[%s3648_s0 + $0x1c8] ss:$16 sps:$4 sm:$0xff]  }
  0x34   :  { %1361 = vmatprep.subr.bf16.mxu0 %v2784_v0 }
  0x36   :  { %1073 = vmatpush1.bf16.msra.mxu1 %v2585_v29  ;;  %v2681_v29 = vld [vmem:[%s3648_s0 + $0x1e4] ss:$16 sps:$4 sm:$0xff]  }
  0x37   :  { %1362 = vmatpush1.bf16.msra.mxu0 %v2586_v30  ;;  %1074 = vmatprep.subr.bf16.mxu1 %v2784_v0  ;;  %v2683_v30 = vld [vmem:[%s3648_s0 + $0x1ec] ss:$16 sps:$4 sm:$0xff]  }
  0x38   :  { %1363 = vmatprep.subr.bf16.mxu0 %v2784_v0 }
  0x3a   :  { %1075 = vmatpush1.bf16.msra.mxu1 %v2587_v31  ;;  %v2685_v31 = vld [vmem:[%s3648_s0 + $0x1e0] ss:$16 sps:$4 sm:$0xff]  }
  0x3b   :  { %1364 = vmatpush1.bf16.msra.mxu0 %v2588_v32  ;;  %1076 = vmatprep.subr.bf16.mxu1 %v2784_v0  ;;  %v2686_v32 = vld [vmem:[%s3648_s0 + $0x1e8] ss:$16 sps:$4 sm:$0xff]  }
  0x3c   :  { %1365 = vmatprep.subr.bf16.mxu0 %v2784_v0  ;;  %v2638_v0 = vld [vmem:[%s3648_s0 + $0xe8] ss:$16 sps:$4 sm:$0xff]  }
  0x3e   :  { %1077 = vmatpush1.bf16.msra.mxu1 %v2589_v33  ;;  %v2687_v33 = vld [vmem:[%s3648_s0 + $0x204] ss:$16 sps:$4 sm:$0xff]  }
  0x3f   :  { %1366 = vmatpush1.bf16.msra.mxu0 %v2590_v34  ;;  %v2689_v34 = vld [vmem:[%s3648_s0 + $0x20c] ss:$16 sps:$4 sm:$0xff]  }
  0x41   :  { %1079 = vmatmul.mubr.bf16.vlgmr.msra.gmra.mrb[0].mxu1 %v2591_v35  ;;  %v2691_v35 = vld [vmem:[%s3648_s0 + $0x200] ss:$16 sps:$4 sm:$0xff]  }
  0x42   :  { %1368 = vmatmul.mubr.bf16.vlgmr.msra.gmra.mrb[0].mxu0 %v2594_v36  ;;  %1086 = vmatprep.mubr.bf16.mxu1 %v2597_v37  ;;  %v2692_v36 = vld [vmem:[%s3648_s0 + $0x208] ss:$16 sps:$4 sm:$0xff]   ;;  %v2693_v37 = vld [vmem:[%s3648_s0 + $0x224] ss:$16 sps:$4 sm:$0xff]  }
  0x43   :  { %1375 = vmatprep.mubr.bf16.mxu0 %v2599_v38  ;;  %v2695_v38 = vld [vmem:[%s3648_s0 + $0x22c] ss:$16 sps:$4 sm:$0xff]  }
  0x49   :  { %1087 = vmatmul.mubr.bf16.gmra.mrb[4].mxu1 %v2601_v39  ;;  %v2697_v39 = vld [vmem:[%s3648_s0 + $0x220] ss:$16 sps:$4 sm:$0xff]  }
  0x4a   :  { %1376 = vmatmul.mubr.bf16.gmra.mrb[4].mxu0 %v2602_v40  ;;  %1094 = vmatprep.mubr.bf16.mxu1 %v2603_v41  ;;  %v2698_v40 = vld [vmem:[%s3648_s0 + $0x228] ss:$16 sps:$4 sm:$0xff]   ;;  %v2699_v41 = vld [vmem:[%s3648_s0 + $0x244] ss:$16 sps:$4 sm:$0xff]  }
  0x4b   :  { %1383 = vmatprep.mubr.bf16.mxu0 %v2605_v42  ;;  %v2701_v42 = vld [vmem:[%s3648_s0 + $0x24c] ss:$16 sps:$4 sm:$0xff]  }
  0x51   :  { %1095 = vmatmul.mubr.bf16.gmra.mrb[8].mxu1 %v2607_v43  ;;  %v2703_v43 = vld [vmem:[%s3648_s0 + $0x240] ss:$16 sps:$4 sm:$0xff]  }
  0x52   :  { %1384 = vmatmul.mubr.bf16.gmra.mrb[8].mxu0 %v2608_v44  ;;  %1102 = vmatprep.mubr.bf16.mxu1 %v2609_v45  ;;  %v2704_v44 = vld [vmem:[%s3648_s0 + $0x248] ss:$16 sps:$4 sm:$0xff]   ;;  %v2705_v45 = vld [vmem:[%s3648_s0 + $0x264] ss:$16 sps:$4 sm:$0xff]  }
  0x53   :  { %1391 = vmatprep.mubr.bf16.mxu0 %v2611_v46  ;;  %v2707_v46 = vld [vmem:[%s3648_s0 + $0x26c] ss:$16 sps:$4 sm:$0xff]  }
  0x59   :  { %1103 = vmatmul.mubr.bf16.gmra.mrb[12].mxu1 %v2613_v47  ;;  %v2709_v47 = vld [vmem:[%s3648_s0 + $0x260] ss:$16 sps:$4 sm:$0xff]  }
  0x5a   :  { %1392 = vmatmul.mubr.bf16.gmra.mrb[12].mxu0 %v2614_v48  ;;  %1110 = vmatprep.mubr.bf16.mxu1 %v2615_v49  ;;  %v2710_v48 = vld [vmem:[%s3648_s0 + $0x268] ss:$16 sps:$4 sm:$0xff]   ;;  %v2711_v49 = vld [vmem:[%s3648_s0 + $0x284] ss:$16 sps:$4 sm:$0xff]  }
  0x5b   :  { %1399 = vmatprep.mubr.bf16.mxu0 %v2617_v50  ;;  %v2713_v50 = vld [vmem:[%s3648_s0 + $0x28c] ss:$16 sps:$4 sm:$0xff]  }
  0x61   :  { %1111 = vmatmul.mubr.bf16.gmra.mrb[16].mxu1 %v2619_v51  ;;  %v2715_v51 = vld [vmem:[%s3648_s0 + $0x280] ss:$16 sps:$4 sm:$0xff]  }
  0x62   :  { %1400 = vmatmul.mubr.bf16.gmra.mrb[16].mxu0 %v2620_v52  ;;  %1118 = vmatprep.mubr.bf16.mxu1 %v2621_v53  ;;  %v2716_v52 = vld [vmem:[%s3648_s0 + $0x288] ss:$16 sps:$4 sm:$0xff]   ;;  %v2717_v53 = vld [vmem:[%s3648_s0 + $0x2a4] ss:$16 sps:$4 sm:$0xff]  }
  0x63   :  { %1407 = vmatprep.mubr.bf16.mxu0 %v2623_v54  ;;  %v2719_v54 = vld [vmem:[%s3648_s0 + $0x2ac] ss:$16 sps:$4 sm:$0xff]  }
  0x69   :  { %1119 = vmatmul.mubr.bf16.gmra.mrb[20].mxu1 %v2625_v55  ;;  %v2721_v55 = vld [vmem:[%s3648_s0 + $0x2a0] ss:$16 sps:$4 sm:$0xff]  }
  0x6a   :  { %1408 = vmatmul.mubr.bf16.gmra.mrb[20].mxu0 %v2626_v56  ;;  %1126 = vmatprep.mubr.bf16.mxu1 %v2627_v57  ;;  %v2722_v56 = vld [vmem:[%s3648_s0 + $0x2a8] ss:$16 sps:$4 sm:$0xff]   ;;  %v2723_v57 = vld [vmem:[%s3648_s0 + $0x2c4] ss:$16 sps:$4 sm:$0xff]  }
  0x6b   :  { %1415 = vmatprep.mubr.bf16.mxu0 %v2629_v58  ;;  %v2725_v58 = vld [vmem:[%s3648_s0 + $0x2cc] ss:$16 sps:$4 sm:$0xff]  }
  0x71   :  { %1127 = vmatmul.mubr.bf16.gmra.mrb[24].mxu1 %v2631_v59  ;;  %v2727_v59 = vld [vmem:[%s3648_s0 + $0x2c0] ss:$16 sps:$4 sm:$0xff]  }
  0x72   :  { %1416 = vmatmul.mubr.bf16.gmra.mrb[24].mxu0 %v2632_v60  ;;  %1134 = vmatprep.mubr.bf16.mxu1 %v2633_v61  ;;  %v2728_v60 = vld [vmem:[%s3648_s0 + $0x2c8] ss:$16 sps:$4 sm:$0xff]   ;;  %v2729_v61 = vld [vmem:[%s3648_s0 + $0x2e4] ss:$16 sps:$4 sm:$0xff]  }
  0x73   :  { %1423 = vmatprep.mubr.bf16.mxu0 %v2635_v62  ;;  %v2731_v62 = vld [vmem:[%s3648_s0 + $0x2ec] ss:$16 sps:$4 sm:$0xff]  }
  0x79   :  { %1135 = vmatmul.mubr.bf16.gmra.mrb[28].mxu1 %v2637_v63  ;;  %v2733_v63 = vld [vmem:[%s3648_s0 + $0x2e0] ss:$16 sps:$4 sm:$0xff]  }
  0x7a   :  { %1424 = vmatmul.mubr.bf16.gmra.mrb[28].mxu0 %v2638_v0  ;;  %1142 = vmatprep.mubr.bf16.mxu1 %v2639_v1  ;;  %v2734_v0 = vld [vmem:[%s3648_s0 + $0x2e8] ss:$16 sps:$4 sm:$0xff]   ;;  %v2735_v1 = vld [vmem:[%s3648_s0 + $0x304] ss:$16 sps:$4 sm:$0xff]  }
  0x7b   :  { %1431 = vmatprep.mubr.bf16.mxu0 %v2641_v2  ;;  %v2737_v2 = vld [vmem:[%s3648_s0 + $0x30c] ss:$16 sps:$4 sm:$0xff]  }
  0x81   :  { %1143 = vmatmul.mubr.bf16.gmra.mrb[32].mxu1 %v2643_v3  ;;  %v2739_v3 = vld [vmem:[%s3648_s0 + $0x300] ss:$16 sps:$4 sm:$0xff]  }
  0x82   :  { %1432 = vmatmul.mubr.bf16.gmra.mrb[32].mxu0 %v2644_v4  ;;  %1150 = vmatprep.mubr.bf16.mxu1 %v2645_v5  ;;  %v2740_v4 = vld [vmem:[%s3648_s0 + $0x308] ss:$16 sps:$4 sm:$0xff]   ;;  %v2741_v5 = vld [vmem:[%s3648_s0 + $0x324] ss:$16 sps:$4 sm:$0xff]  }
  0x83   :  { %1439 = vmatprep.mubr.bf16.mxu0 %v2647_v6  ;;  %v2743_v6 = vld [vmem:[%s3648_s0 + $0x32c] ss:$16 sps:$4 sm:$0xff]  }
  0x89   :  { %1151 = vmatmul.mubr.bf16.gmra.mrb[36].mxu1 %v2649_v7  ;;  %v2745_v7 = vld [vmem:[%s3648_s0 + $0x320] ss:$16 sps:$4 sm:$0xff]  }
  0x8a   :  { %1440 = vmatmul.mubr.bf16.gmra.mrb[36].mxu0 %v2650_v8  ;;  %1158 = vmatprep.mubr.bf16.mxu1 %v2651_v9  ;;  %v2746_v8 = vld [vmem:[%s3648_s0 + $0x328] ss:$16 sps:$4 sm:$0xff]   ;;  %v2747_v9 = vld [vmem:[%s3648_s0 + $0x344] ss:$16 sps:$4 sm:$0xff]  }
  0x8b   :  { %1447 = vmatprep.mubr.bf16.mxu0 %v2653_v10  ;;  %v2749_v10 = vld [vmem:[%s3648_s0 + $0x34c] ss:$16 sps:$4 sm:$0xff]  }
  0x91   :  { %1159 = vmatmul.mubr.bf16.gmra.mrb[40].mxu1 %v2655_v11  ;;  %v2751_v11 = vld [vmem:[%s3648_s0 + $0x340] ss:$16 sps:$4 sm:$0xff]  }
  0x92   :  { %1448 = vmatmul.mubr.bf16.gmra.mrb[40].mxu0 %v2656_v12  ;;  %1166 = vmatprep.mubr.bf16.mxu1 %v2657_v13  ;;  %v2752_v12 = vld [vmem:[%s3648_s0 + $0x348] ss:$16 sps:$4 sm:$0xff]   ;;  %v2753_v13 = vld [vmem:[%s3648_s0 + $0x364] ss:$16 sps:$4 sm:$0xff]  }
  0x93   :  { %1455 = vmatprep.mubr.bf16.mxu0 %v2659_v14  ;;  %v2755_v14 = vld [vmem:[%s3648_s0 + $0x36c] ss:$16 sps:$4 sm:$0xff]  }
  0x99   :  { %1167 = vmatmul.mubr.bf16.gmra.mrb[44].mxu1 %v2661_v15  ;;  %v3266_v15 = vld [vmem:[%s3649_s2] ss:$0 sm:$0xff] }
  0x9a   :  { %1456 = vmatmul.mubr.bf16.gmra.mrb[44].mxu0 %v2662_v16  ;;  %1174 = vmatprep.mubr.bf16.mxu1 %v2663_v17 }
  0x9b   :  { %1463 = vmatprep.mubr.bf16.mxu0 %v2665_v18 }
  0xa1   :  { %1175 = vmatmul.mubr.bf16.gmra.mrb[48].mxu1 %v2667_v19 }
  0xa2   :  { %1464 = vmatmul.mubr.bf16.gmra.mrb[48].mxu0 %v2668_v20  ;;  %1182 = vmatprep.mubr.bf16.mxu1 %v2669_v21  ;;  %v2757_v20 = vld [vmem:[%s3648_s0 + $0x360] ss:$16 sps:$4 sm:$0xff]  }
  0xa3   :  { %1471 = vmatprep.mubr.bf16.mxu0 %v2671_v22 }
  0xa9   :  { %1183 = vmatmul.mubr.bf16.gmra.mrb[52].mxu1 %v2673_v23  ;;  %v2758_v23 = vld [vmem:[%s3648_s0 + $0x368] ss:$16 sps:$4 sm:$0xff]  }
  0xaa   :  { %1472 = vmatmul.mubr.bf16.gmra.mrb[52].mxu0 %v2674_v24  ;;  %1190 = vmatprep.mubr.bf16.mxu1 %v2675_v25  ;;  %v2759_v24 = vld [vmem:[%s3648_s0 + $0x384] ss:$16 sps:$4 sm:$0xff]  }
  0xab   :  { %1479 = vmatprep.mubr.bf16.mxu0 %v2677_v26 }
  0xb1   :  { %1191 = vmatmul.mubr.bf16.gmra.mrb[56].mxu1 %v2679_v27 }
  0xb2   :  { %1480 = vmatmul.mubr.bf16.gmra.mrb[56].mxu0 %v2680_v28  ;;  %1198 = vmatprep.mubr.bf16.mxu1 %v2681_v29  ;;  %v2761_v29 = vld [vmem:[%s3648_s0 + $0x38c] ss:$16 sps:$4 sm:$0xff]  }
  0xb3   :  { %1487 = vmatprep.mubr.bf16.mxu0 %v2683_v30 }
  0xb9   :  { %1199 = vmatmul.mubr.bf16.gmra.mrb[60].mxu1 %v2685_v31 }
  0xba   :  { %1488 = vmatmul.mubr.bf16.gmra.mrb[60].mxu0 %v2686_v32  ;;  %1206 = vmatprep.mubr.bf16.mxu1 %v2687_v33 }
  0xbb   :  { %1495 = vmatprep.mubr.bf16.mxu0 %v2689_v34 }
  0xc1   :  { %1207 = vmatmul.mubr.bf16.gmra.mrb[64].mxu1 %v2691_v35 }
  0xc2   :  { %1496 = vmatmul.mubr.bf16.gmra.mrb[64].mxu0 %v2692_v36  ;;  %1214 = vmatprep.mubr.bf16.mxu1 %v2693_v37 }
  0xc3   :  { %1503 = vmatprep.mubr.bf16.mxu0 %v2695_v38 }
  0xc9   :  { %1215 = vmatmul.mubr.bf16.gmra.mrb[68].mxu1 %v2697_v39 }
  0xca   :  { %1504 = vmatmul.mubr.bf16.gmra.mrb[68].mxu0 %v2698_v40  ;;  %1222 = vmatprep.mubr.bf16.mxu1 %v2699_v41  ;;  %v2763_v41 = vld [vmem:[%s3648_s0 + $0x380] ss:$16 sps:$4 sm:$0xff]  }
  0xcb   :  { %1511 = vmatprep.mubr.bf16.mxu0 %v2701_v42 }
  0xd1   :  { %1223 = vmatmul.mubr.bf16.gmra.mrb[72].mxu1 %v2703_v43 }
  0xd2   :  { %1512 = vmatmul.mubr.bf16.gmra.mrb[72].mxu0 %v2704_v44  ;;  %1230 = vmatprep.mubr.bf16.mxu1 %v2705_v45  ;;  %v2764_v45 = vld [vmem:[%s3648_s0 + $0x388] ss:$16 sps:$4 sm:$0xff]  }
  0xd3   :  { %1519 = vmatprep.mubr.bf16.mxu0 %v2707_v46  ;;  %v2765_v46 = vld [vmem:[%s3648_s0 + $0x3a4] ss:$16 sps:$4 sm:$0xff]  }
  0xd9   :  { %1231 = vmatmul.mubr.bf16.gmra.mrb[76].mxu1 %v2709_v47 }
  0xda   :  { %1520 = vmatmul.mubr.bf16.gmra.mrb[76].mxu0 %v2710_v48  ;;  %1238 = vmatprep.mubr.bf16.mxu1 %v2711_v49 }
  0xdb   :  { %1527 = vmatprep.mubr.bf16.mxu0 %v2713_v50 }
  0xe1   :  { %1239 = vmatmul.mubr.bf16.gmra.mrb[80].mxu1 %v2715_v51  ;;  %v2767_v51 = vld [vmem:[%s3648_s0 + $0x3ac] ss:$16 sps:$4 sm:$0xff]  }
  0xe2   :  { %1528 = vmatmul.mubr.bf16.gmra.mrb[80].mxu0 %v2716_v52  ;;  %1246 = vmatprep.mubr.bf16.mxu1 %v2717_v53 }
  0xe3   :  { %1535 = vmatprep.mubr.bf16.mxu0 %v2719_v54 }
  0xe9   :  { %1247 = vmatmul.mubr.bf16.gmra.mrb[84].mxu1 %v2721_v55 }
  0xea   :  { %1536 = vmatmul.mubr.bf16.gmra.mrb[84].mxu0 %v2722_v56  ;;  %1254 = vmatprep.mubr.bf16.mxu1 %v2723_v57 }
  0xeb   :  { %1543 = vmatprep.mubr.bf16.mxu0 %v2725_v58 }
  0xf1   :  { %1255 = vmatmul.mubr.bf16.gmra.mrb[88].mxu1 %v2727_v59 }
  0xf2   :  { %1544 = vmatmul.mubr.bf16.gmra.mrb[88].mxu0 %v2728_v60  ;;  %1262 = vmatprep.mubr.bf16.mxu1 %v2729_v61 }
  0xf3   :  { %1551 = vmatprep.mubr.bf16.mxu0 %v2731_v62 }
  0xf9   :  { %1263 = vmatmul.mubr.bf16.gmra.mrb[92].mxu1 %v2733_v63  ;;  %v2769_v63 = vld [vmem:[%s3648_s0 + $0x3a0] ss:$16 sps:$4 sm:$0xff]  }
  0xfa   :  { %1552 = vmatmul.mubr.bf16.gmra.mrb[92].mxu0 %v2734_v0  ;;  %1270 = vmatprep.mubr.bf16.mxu1 %v2735_v1 }
  0xfb   :  { %1559 = vmatprep.mubr.bf16.mxu0 %v2737_v2 }
 0x101   :  { %1271 = vmatmul.mubr.bf16.gmra.mrb[96].mxu1 %v2739_v3  ;;  %v2770_v3 = vld [vmem:[%s3648_s0 + $0x3a8] ss:$16 sps:$4 sm:$0xff]  }
 0x102   :  { %1560 = vmatmul.mubr.bf16.gmra.mrb[96].mxu0 %v2740_v4  ;;  %1278 = vmatprep.mubr.bf16.mxu1 %v2741_v5  ;;  %v2771_v4 = vld [vmem:[%s3648_s0 + $0x3c4] ss:$16 sps:$4 sm:$0xff]  }
 0x103   :  { %1567 = vmatprep.mubr.bf16.mxu0 %v2743_v6 }
 0x109   :  { %1279 = vmatmul.mubr.bf16.gmra.mrb[100].mxu1 %v2745_v7 }
 0x10a   :  { %1568 = vmatmul.mubr.bf16.gmra.mrb[100].mxu0 %v2746_v8  ;;  %1286 = vmatprep.mubr.bf16.mxu1 %v2747_v9  ;;  %v2773_v9 = vld [vmem:[%s3648_s0 + $0x3cc] ss:$16 sps:$4 sm:$0xff]  }
 0x10b   :  { %1575 = vmatprep.mubr.bf16.mxu0 %v2749_v10 }
 0x111   :  { %1287 = vmatmul.mubr.bf16.gmra.mrb[104].mxu1 %v2751_v11 }
 0x112   :  { %1576 = vmatmul.mubr.bf16.gmra.mrb[104].mxu0 %v2752_v12  ;;  %1294 = vmatprep.mubr.bf16.mxu1 %v2753_v13 }
 0x113   :  { %1583 = vmatprep.mubr.bf16.mxu0 %v2755_v14 }
 0x114   :  { %v1080_v16 = vpop.f32.mrb[0].mxu1 }
 0x115   :  { %v1081_v17 = vadd.f32 %v3266_v15, %v1080_v16  ;;  %v1369_v18 = vpop.f32.mrb[0].mxu0  ;;  %v1082_v19 = vpop.f32.mrb[1].mxu1 }
 0x116   :  { %v1371_v21 = vpop.f32.mrb[1].mxu0  ;;  %v1083_v22 = vpop.f32.mrb[2].mxu1 }
 0x117   :  { %v1370_v25 = vadd.f32 %v1369_v18, %v1081_v17  ;;  %v1084_v26 = vadd.f32 %v3266_v15, %v1083_v22  ;;  %v1372_v27 = vpop.f32.mrb[2].mxu0  ;;  %v1085_v28 = vpop.f32.mrb[3].mxu1  ;;  %v2775_v22 = vld [vmem:[%s3648_s0 + $0x3c0] ss:$16 sps:$4 sm:$0xff]  }
 0x118   :  { %v1374_v30 = vpop.f32.mrb[3].mxu0 }
 0x119   :  { %vm1624_vm0 = vcmp.ge.f32.partialorder %v1370_v25, 0.0  ;;  %v1688_v31 = vmul.f32 0.1, %v1370_v25  ;;  %v1373_v32 = vadd.f32 %v1372_v27, %v1084_v26  ;;  %1295 = vmatmul.mubr.bf16.gmra.mrb[108].mxu1 %v2757_v20  ;;  %v2776_v26 = vld [vmem:[%s3648_s0 + $0x3c8] ss:$16 sps:$4 sm:$0xff]  }
 0x11a   :  { %1584 = vmatmul.mubr.bf16.gmra.mrb[108].mxu0 %v2758_v23  ;;  %1302 = vmatprep.mubr.bf16.mxu1 %v2759_v24  ;;  %v2777_v27 = vld [vmem:[%s3648_s0 + $0x3e4] ss:$16 sps:$4 sm:$0xff]  }
 0x11b   :  { %v1752_v33 = vsel %vm1624_vm0, %v1370_v25, %v1688_v31  ;;  %vm1625_vm2 = vcmp.ge.f32.partialorder %v1373_v32, 0.0  ;;  %v1689_v34 = vmul.f32 0.1, %v1373_v32  ;;  %1591 = vmatprep.mubr.bf16.mxu0 %v2761_v29 }
 0x11c   :  { %v2366_v35 = vpack.c.bf16 %v1752_v33, %v1752_v33  ;;  %v1088_v36 = vpop.f32.mrb[4].mxu1 }
 0x11d   :  { %v1753_v37 = vsel %vm1625_vm2, %v1373_v32, %v1689_v34  ;;  %v1089_v38 = vadd.f32 %v3266_v15, %v1088_v36  ;;  %v1377_v39 = vpop.f32.mrb[4].mxu0  ;;  %v1090_v40 = vpop.f32.mrb[5].mxu1  ;;  %v2779_v32 = vld [vmem:[%s3648_s0 + $0x3ec] ss:$16 sps:$4 sm:$0xff]  }
 0x11e   :  { %2073 = vst.msk [vmem:[%s3650_s3] sm:$0xf] %vm2072_vm1, %v2366_v35  ;;  %v2367_v42 = vpack.c.bf16 %v1753_v37, %v1753_v37  ;;  %v1379_v43 = vpop.f32.mrb[5].mxu0  ;;  %v1091_v44 = vpop.f32.mrb[6].mxu1 }
 0x11f   :  { %v1378_v47 = vadd.f32 %v1377_v39, %v1089_v38  ;;  %v1092_v48 = vadd.f32 %v3266_v15, %v1091_v44  ;;  %v1380_v49 = vpop.f32.mrb[6].mxu0  ;;  %v1093_v50 = vpop.f32.mrb[7].mxu1  ;;  %v2781_v44 = vld [vmem:[%s3648_s0 + $0x3e0] ss:$16 sps:$4 sm:$0xff]  }
 0x120   :  { %2074 = vst.msk [vmem:[%s3650_s3 + $0x4] sm:$0xf] %vm2072_vm1, %v2367_v42  ;;  %v1382_v52 = vpop.f32.mrb[7].mxu0 }
 0x121   :  { %vm1626_vm3 = vcmp.ge.f32.partialorder %v1378_v47, 0.0  ;;  %v1690_v53 = vmul.f32 0.1, %v1378_v47  ;;  %v1381_v54 = vadd.f32 %v1380_v49, %v1092_v48  ;;  %1303 = vmatmul.mubr.bf16.gmra.mrb[112].mxu1 %v2763_v41  ;;  %v2782_v48 = vld [vmem:[%s3648_s0 + $0x3e8] ss:$16 sps:$4 sm:$0xff]  }
 0x122   :  { %1592 = vmatmul.mubr.bf16.gmra.mrb[112].mxu0 %v2764_v45  ;;  %1310 = vmatprep.mubr.bf16.mxu1 %v2765_v46 }
 0x123   :  { %v1754_v55 = vsel %vm1626_vm3, %v1378_v47, %v1690_v53  ;;  %vm1627_vm4 = vcmp.ge.f32.partialorder %v1381_v54, 0.0  ;;  %v1691_v56 = vmul.f32 0.1, %v1381_v54  ;;  %1599 = vmatprep.mubr.bf16.mxu0 %v2767_v51 }
 0x124   :  { %v2368_v57 = vpack.c.bf16 %v1754_v55, %v1754_v55  ;;  %v1096_v58 = vpop.f32.mrb[8].mxu1 }
 0x125   :  { %v1755_v59 = vsel %vm1627_vm4, %v1381_v54, %v1691_v56  ;;  %v1097_v60 = vadd.f32 %v3266_v15, %v1096_v58  ;;  %v1385_v61 = vpop.f32.mrb[8].mxu0  ;;  %v1098_v62 = vpop.f32.mrb[9].mxu1 }
 0x126   :  { %2075 = vst.msk [vmem:[%s3650_s3 + $0x8] sm:$0xf] %vm2072_vm1, %v2368_v57  ;;  %v2369_v0 = vpack.c.bf16 %v1755_v59, %v1755_v59  ;;  %v1387_v1 = vpop.f32.mrb[9].mxu0  ;;  %v1099_v2 = vpop.f32.mrb[10].mxu1 }
 0x127   :  { %v1386_v5 = vadd.f32 %v1385_v61, %v1097_v60  ;;  %v1100_v6 = vadd.f32 %v3266_v15, %v1099_v2  ;;  %v1388_v7 = vpop.f32.mrb[10].mxu0  ;;  %v1101_v8 = vpop.f32.mrb[11].mxu1 }
 0x128   :  { %2076 = vst.msk [vmem:[%s3650_s3 + $0xc] sm:$0xf] %vm2072_vm1, %v2369_v0  ;;  %v1390_v10 = vpop.f32.mrb[11].mxu0 }
 0x129   :  { %vm1628_vm5 = vcmp.ge.f32.partialorder %v1386_v5, 0.0  ;;  %v1692_v11 = vmul.f32 0.1, %v1386_v5  ;;  %v1389_v12 = vadd.f32 %v1388_v7, %v1100_v6  ;;  %1311 = vmatmul.mubr.bf16.gmra.mrb[116].mxu1 %v2769_v63 }
 0x12a   :  { %1600 = vmatmul.mubr.bf16.gmra.mrb[116].mxu0 %v2770_v3  ;;  %1318 = vmatprep.mubr.bf16.mxu1 %v2771_v4 }
 0x12b   :  { %v1756_v13 = vsel %vm1628_vm5, %v1386_v5, %v1692_v11  ;;  %vm1629_vm6 = vcmp.ge.f32.partialorder %v1389_v12, 0.0  ;;  %v1693_v14 = vmul.f32 0.1, %v1389_v12  ;;  %1607 = vmatprep.mubr.bf16.mxu0 %v2773_v9 }
 0x12c   :  { %v2370_v16 = vpack.c.bf16 %v1756_v13, %v1756_v13  ;;  %v1104_v17 = vpop.f32.mrb[12].mxu1 }
 0x12d   :  { %v1757_v18 = vsel %vm1629_vm6, %v1389_v12, %v1693_v14  ;;  %v1105_v19 = vadd.f32 %v3266_v15, %v1104_v17  ;;  %v1393_v20 = vpop.f32.mrb[12].mxu0  ;;  %v1106_v21 = vpop.f32.mrb[13].mxu1 }
 0x12e   :  { %2077 = vst.msk [vmem:[%s3650_s3 + $0x10] sm:$0xf] %vm2072_vm1, %v2370_v16  ;;  %v2371_v23 = vpack.c.bf16 %v1757_v18, %v1757_v18  ;;  %v1395_v24 = vpop.f32.mrb[13].mxu0  ;;  %v1107_v25 = vpop.f32.mrb[14].mxu1 }
 0x12f   :  { %v1394_v28 = vadd.f32 %v1393_v20, %v1105_v19  ;;  %v1108_v29 = vadd.f32 %v3266_v15, %v1107_v25  ;;  %v1396_v30 = vpop.f32.mrb[14].mxu0  ;;  %v1109_v31 = vpop.f32.mrb[15].mxu1 }
 0x130   :  { %2078 = vst.msk [vmem:[%s3650_s3 + $0x14] sm:$0xf] %vm2072_vm1, %v2371_v23  ;;  %v1398_v33 = vpop.f32.mrb[15].mxu0 }
 0x131   :  { %vm1630_vm7 = vcmp.ge.f32.partialorder %v1394_v28, 0.0  ;;  %v1694_v34 = vmul.f32 0.1, %v1394_v28  ;;  %v1397_v35 = vadd.f32 %v1396_v30, %v1108_v29  ;;  %1319 = vmatmul.mubr.bf16.gmra.mrb[120].mxu1 %v2775_v22 }
 0x132   :  { %1608 = vmatmul.mubr.bf16.gmra.mrb[120].mxu0 %v2776_v26  ;;  %1326 = vmatprep.mubr.bf16.mxu1 %v2777_v27 }
 0x133   :  { %v1758_v36 = vsel %vm1630_vm7, %v1394_v28, %v1694_v34  ;;  %vm1631_vm8 = vcmp.ge.f32.partialorder %v1397_v35, 0.0  ;;  %v1695_v37 = vmul.f32 0.1, %v1397_v35  ;;  %1615 = vmatprep.mubr.bf16.mxu0 %v2779_v32 }
 0x134   :  { %v2372_v38 = vpack.c.bf16 %v1758_v36, %v1758_v36  ;;  %v1112_v39 = vpop.f32.mrb[16].mxu1 }
 0x135   :  { %v1759_v40 = vsel %vm1631_vm8, %v1397_v35, %v1695_v37  ;;  %v1113_v41 = vadd.f32 %v3266_v15, %v1112_v39  ;;  %v1401_v42 = vpop.f32.mrb[16].mxu0  ;;  %v1114_v43 = vpop.f32.mrb[17].mxu1 }
 0x136   :  { %2079 = vst.msk [vmem:[%s3650_s3 + $0x18] sm:$0xf] %vm2072_vm1, %v2372_v38  ;;  %v2373_v45 = vpack.c.bf16 %v1759_v40, %v1759_v40  ;;  %v1403_v46 = vpop.f32.mrb[17].mxu0  ;;  %v1115_v47 = vpop.f32.mrb[18].mxu1 }
 0x137   :  { %v1402_v49 = vadd.f32 %v1401_v42, %v1113_v41  ;;  %v1116_v50 = vadd.f32 %v3266_v15, %v1115_v47  ;;  %v1404_v51 = vpop.f32.mrb[18].mxu0  ;;  %v1117_v52 = vpop.f32.mrb[19].mxu1 }
 0x138   :  { %2080 = vst.msk [vmem:[%s3650_s3 + $0x1c] sm:$0xf] %vm2072_vm1, %v2373_v45  ;;  %v1406_v53 = vpop.f32.mrb[19].mxu0 }
 0x139   :  { %vm1632_vm9 = vcmp.ge.f32.partialorder %v1402_v49, 0.0  ;;  %v1696_v54 = vmul.f32 0.1, %v1402_v49  ;;  %v1405_v55 = vadd.f32 %v1404_v51, %v1116_v50  ;;  %1327 = vmatmul.mubr.bf16.gmra.mrb[124].mxu1 %v2781_v44 }
 0x13a   :  { %1616 = vmatmul.mubr.bf16.gmra.mrb[124].mxu0 %v2782_v48 }
 0x13b   :  { %v1760_v56 = vsel %vm1632_vm9, %v1402_v49, %v1696_v54  ;;  %vm1633_vm10 = vcmp.ge.f32.partialorder %v1405_v55, 0.0  ;;  %v1697_v57 = vmul.f32 0.1, %v1405_v55 }
 0x13c   :  { %v2374_v58 = vpack.c.bf16 %v1760_v56, %v1760_v56  ;;  %v1120_v59 = vpop.f32.mrb[20].mxu1 }
 0x13d   :  { %v1761_v60 = vsel %vm1633_vm10, %v1405_v55, %v1697_v57  ;;  %v1121_v61 = vadd.f32 %v3266_v15, %v1120_v59  ;;  %v1409_v62 = vpop.f32.mrb[20].mxu0  ;;  %v1122_v63 = vpop.f32.mrb[21].mxu1 }
 0x13e   :  { %2081 = vst.msk [vmem:[%s3650_s3 + $0x20] sm:$0xf] %vm2072_vm1, %v2374_v58  ;;  %v2375_v0 = vpack.c.bf16 %v1761_v60, %v1761_v60  ;;  %v1411_v1 = vpop.f32.mrb[21].mxu0  ;;  %v1123_v2 = vpop.f32.mrb[22].mxu1 }
 0x13f   :  { %v1410_v3 = vadd.f32 %v1409_v62, %v1121_v61  ;;  %v1124_v4 = vadd.f32 %v3266_v15, %v1123_v2  ;;  %v1412_v5 = vpop.f32.mrb[22].mxu0  ;;  %v1125_v6 = vpop.f32.mrb[23].mxu1 }
 0x140   :  { %2082 = vst.msk [vmem:[%s3650_s3 + $0x24] sm:$0xf] %vm2072_vm1, %v2375_v0  ;;  %v1414_v7 = vpop.f32.mrb[23].mxu0 }
 0x141   :  { %vm1634_vm11 = vcmp.ge.f32.partialorder %v1410_v3, 0.0  ;;  %v1698_v8 = vmul.f32 0.1, %v1410_v3  ;;  %v1413_v9 = vadd.f32 %v1412_v5, %v1124_v4 }
 0x143   :  { %v1762_v10 = vsel %vm1634_vm11, %v1410_v3, %v1698_v8  ;;  %vm1635_vm12 = vcmp.ge.f32.partialorder %v1413_v9, 0.0  ;;  %v1699_v11 = vmul.f32 0.1, %v1413_v9 }
 0x144   :  { %v2376_v12 = vpack.c.bf16 %v1762_v10, %v1762_v10  ;;  %v1128_v13 = vpop.f32.mrb[24].mxu1 }
 0x145   :  { %v1763_v14 = vsel %vm1635_vm12, %v1413_v9, %v1699_v11  ;;  %v1129_v16 = vadd.f32 %v3266_v15, %v1128_v13  ;;  %v1417_v17 = vpop.f32.mrb[24].mxu0  ;;  %v1130_v18 = vpop.f32.mrb[25].mxu1 }
 0x146   :  { %2083 = vst.msk [vmem:[%s3650_s3 + $0x28] sm:$0xf] %vm2072_vm1, %v2376_v12  ;;  %v2377_v19 = vpack.c.bf16 %v1763_v14, %v1763_v14  ;;  %v1419_v20 = vpop.f32.mrb[25].mxu0  ;;  %v1131_v21 = vpop.f32.mrb[26].mxu1 }
 0x147   :  { %v1418_v22 = vadd.f32 %v1417_v17, %v1129_v16  ;;  %v1132_v23 = vadd.f32 %v3266_v15, %v1131_v21  ;;  %v1420_v24 = vpop.f32.mrb[26].mxu0  ;;  %v1133_v25 = vpop.f32.mrb[27].mxu1 }
 0x148   :  { %2084 = vst.msk [vmem:[%s3650_s3 + $0x2c] sm:$0xf] %vm2072_vm1, %v2377_v19  ;;  %v1422_v26 = vpop.f32.mrb[27].mxu0 }
 0x149   :  { %vm1636_vm13 = vcmp.ge.f32.partialorder %v1418_v22, 0.0  ;;  %v1700_v27 = vmul.f32 0.1, %v1418_v22  ;;  %v1421_v28 = vadd.f32 %v1420_v24, %v1132_v23 }
 0x14b   :  { %v1764_v29 = vsel %vm1636_vm13, %v1418_v22, %v1700_v27  ;;  %vm1637_vm14 = vcmp.ge.f32.partialorder %v1421_v28, 0.0  ;;  %v1701_v30 = vmul.f32 0.1, %v1421_v28 }
 0x14c   :  { %v2378_v31 = vpack.c.bf16 %v1764_v29, %v1764_v29  ;;  %v1136_v32 = vpop.f32.mrb[28].mxu1 }
 0x14d   :  { %v1765_v33 = vsel %vm1637_vm14, %v1421_v28, %v1701_v30  ;;  %v1137_v34 = vadd.f32 %v3266_v15, %v1136_v32  ;;  %v1425_v35 = vpop.f32.mrb[28].mxu0  ;;  %v1138_v36 = vpop.f32.mrb[29].mxu1 }
 0x14e   :  { %2085 = vst.msk [vmem:[%s3650_s3 + $0x30] sm:$0xf] %vm2072_vm1, %v2378_v31  ;;  %v2379_v37 = vpack.c.bf16 %v1765_v33, %v1765_v33  ;;  %v1427_v38 = vpop.f32.mrb[29].mxu0  ;;  %v1139_v39 = vpop.f32.mrb[30].mxu1 }
 0x14f   :  { %v1426_v40 = vadd.f32 %v1425_v35, %v1137_v34  ;;  %v1140_v41 = vadd.f32 %v3266_v15, %v1139_v39  ;;  %v1428_v42 = vpop.f32.mrb[30].mxu0  ;;  %v1141_v43 = vpop.f32.mrb[31].mxu1 }
 0x150   :  { %2086 = vst.msk [vmem:[%s3650_s3 + $0x34] sm:$0xf] %vm2072_vm1, %v2379_v37  ;;  %v1430_v44 = vpop.f32.mrb[31].mxu0 }
 0x151   :  { %vm1638_vm15 = vcmp.ge.f32.partialorder %v1426_v40, 0.0  ;;  %v1702_v45 = vmul.f32 0.1, %v1426_v40  ;;  %v1429_v46 = vadd.f32 %v1428_v42, %v1140_v41 }
 0x153   :  { %v1766_v47 = vsel %vm1638_vm15, %v1426_v40, %v1702_v45  ;;  %vm1639_vm0 = vcmp.ge.f32.partialorder %v1429_v46, 0.0  ;;  %v1703_v48 = vmul.f32 0.1, %v1429_v46 }
 0x154   :  { %v2380_v49 = vpack.c.bf16 %v1766_v47, %v1766_v47  ;;  %v1144_v50 = vpop.f32.mrb[32].mxu1 }
 0x155   :  { %v1767_v51 = vsel %vm1639_vm0, %v1429_v46, %v1703_v48  ;;  %v1145_v52 = vadd.f32 %v3266_v15, %v1144_v50  ;;  %v1433_v53 = vpop.f32.mrb[32].mxu0  ;;  %v1146_v54 = vpop.f32.mrb[33].mxu1 }
 0x156   :  { %2087 = vst.msk [vmem:[%s3650_s3 + $0x38] sm:$0xf] %vm2072_vm1, %v2380_v49  ;;  %v2381_v55 = vpack.c.bf16 %v1767_v51, %v1767_v51  ;;  %v1435_v56 = vpop.f32.mrb[33].mxu0  ;;  %v1147_v57 = vpop.f32.mrb[34].mxu1 }
 0x157   :  { %v1434_v58 = vadd.f32 %v1433_v53, %v1145_v52  ;;  %v1148_v59 = vadd.f32 %v3266_v15, %v1147_v57  ;;  %v1436_v60 = vpop.f32.mrb[34].mxu0  ;;  %v1149_v61 = vpop.f32.mrb[35].mxu1 }
 0x158   :  { %2088 = vst.msk [vmem:[%s3650_s3 + $0x3c] sm:$0xf] %vm2072_vm1, %v2381_v55  ;;  %v1438_v62 = vpop.f32.mrb[35].mxu0 }
 0x159   :  { %vm1640_vm2 = vcmp.ge.f32.partialorder %v1434_v58, 0.0  ;;  %v1704_v63 = vmul.f32 0.1, %v1434_v58  ;;  %v1437_v0 = vadd.f32 %v1436_v60, %v1148_v59 }
 0x15b   :  { %v1768_v1 = vsel %vm1640_vm2, %v1434_v58, %v1704_v63  ;;  %vm1641_vm3 = vcmp.ge.f32.partialorder %v1437_v0, 0.0  ;;  %v1705_v2 = vmul.f32 0.1, %v1437_v0 }
 0x15c   :  { %v2382_v3 = vpack.c.bf16 %v1768_v1, %v1768_v1  ;;  %v1152_v4 = vpop.f32.mrb[36].mxu1 }
 0x15d   :  { %v1769_v5 = vsel %vm1641_vm3, %v1437_v0, %v1705_v2  ;;  %v1153_v6 = vadd.f32 %v3266_v15, %v1152_v4  ;;  %v1441_v7 = vpop.f32.mrb[36].mxu0  ;;  %v1154_v8 = vpop.f32.mrb[37].mxu1 }
 0x15e   :  { %2089 = vst.msk [vmem:[%s3650_s3 + $0x40] sm:$0xf] %vm2072_vm1, %v2382_v3  ;;  %v2383_v9 = vpack.c.bf16 %v1769_v5, %v1769_v5  ;;  %v1443_v10 = vpop.f32.mrb[37].mxu0  ;;  %v1155_v11 = vpop.f32.mrb[38].mxu1 }
 0x15f   :  { %v1442_v12 = vadd.f32 %v1441_v7, %v1153_v6  ;;  %v1156_v13 = vadd.f32 %v3266_v15, %v1155_v11  ;;  %v1444_v14 = vpop.f32.mrb[38].mxu0  ;;  %v1157_v16 = vpop.f32.mrb[39].mxu1 }
 0x160   :  { %2090 = vst.msk [vmem:[%s3650_s3 + $0x44] sm:$0xf] %vm2072_vm1, %v2383_v9  ;;  %v1446_v17 = vpop.f32.mrb[39].mxu0 }
 0x161   :  { %vm1642_vm4 = vcmp.ge.f32.partialorder %v1442_v12, 0.0  ;;  %v1706_v18 = vmul.f32 0.1, %v1442_v12  ;;  %v1445_v19 = vadd.f32 %v1444_v14, %v1156_v13 }
 0x163   :  { %v1770_v20 = vsel %vm1642_vm4, %v1442_v12, %v1706_v18  ;;  %vm1643_vm5 = vcmp.ge.f32.partialorder %v1445_v19, 0.0  ;;  %v1707_v21 = vmul.f32 0.1, %v1445_v19 }
 0x164   :  { %v2384_v22 = vpack.c.bf16 %v1770_v20, %v1770_v20  ;;  %v1160_v23 = vpop.f32.mrb[40].mxu1 }
 0x165   :  { %v1771_v24 = vsel %vm1643_vm5, %v1445_v19, %v1707_v21  ;;  %v1161_v25 = vadd.f32 %v3266_v15, %v1160_v23  ;;  %v1449_v26 = vpop.f32.mrb[40].mxu0  ;;  %v1162_v27 = vpop.f32.mrb[41].mxu1 }
 0x166   :  { %2091 = vst.msk [vmem:[%s3650_s3 + $0x48] sm:$0xf] %vm2072_vm1, %v2384_v22  ;;  %v2385_v28 = vpack.c.bf16 %v1771_v24, %v1771_v24  ;;  %v1451_v29 = vpop.f32.mrb[41].mxu0  ;;  %v1163_v30 = vpop.f32.mrb[42].mxu1 }
 0x167   :  { %v1450_v31 = vadd.f32 %v1449_v26, %v1161_v25  ;;  %v1164_v32 = vadd.f32 %v3266_v15, %v1163_v30  ;;  %v1452_v33 = vpop.f32.mrb[42].mxu0  ;;  %v1165_v34 = vpop.f32.mrb[43].mxu1 }
 0x168   :  { %2092 = vst.msk [vmem:[%s3650_s3 + $0x4c] sm:$0xf] %vm2072_vm1, %v2385_v28  ;;  %v1454_v35 = vpop.f32.mrb[43].mxu0 }
 0x169   :  { %vm1644_vm6 = vcmp.ge.f32.partialorder %v1450_v31, 0.0  ;;  %v1708_v36 = vmul.f32 0.1, %v1450_v31  ;;  %v1453_v37 = vadd.f32 %v1452_v33, %v1164_v32 }
 0x16b   :  { %v1772_v38 = vsel %vm1644_vm6, %v1450_v31, %v1708_v36  ;;  %vm1645_vm7 = vcmp.ge.f32.partialorder %v1453_v37, 0.0  ;;  %v1709_v39 = vmul.f32 0.1, %v1453_v37 }
 0x16c   :  { %v2386_v40 = vpack.c.bf16 %v1772_v38, %v1772_v38  ;;  %v1168_v41 = vpop.f32.mrb[44].mxu1 }
 0x16d   :  { %v1773_v42 = vsel %vm1645_vm7, %v1453_v37, %v1709_v39  ;;  %v1169_v43 = vadd.f32 %v3266_v15, %v1168_v41  ;;  %v1457_v44 = vpop.f32.mrb[44].mxu0  ;;  %v1170_v45 = vpop.f32.mrb[45].mxu1 }
 0x16e   :  { %2093 = vst.msk [vmem:[%s3650_s3 + $0x50] sm:$0xf] %vm2072_vm1, %v2386_v40  ;;  %v2387_v46 = vpack.c.bf16 %v1773_v42, %v1773_v42  ;;  %v1459_v47 = vpop.f32.mrb[45].mxu0  ;;  %v1171_v48 = vpop.f32.mrb[46].mxu1 }
 0x16f   :  { %v1458_v49 = vadd.f32 %v1457_v44, %v1169_v43  ;;  %v1172_v50 = vadd.f32 %v3266_v15, %v1171_v48  ;;  %v1460_v51 = vpop.f32.mrb[46].mxu0  ;;  %v1173_v52 = vpop.f32.mrb[47].mxu1 }
 0x170   :  { %2094 = vst.msk [vmem:[%s3650_s3 + $0x54] sm:$0xf] %vm2072_vm1, %v2387_v46  ;;  %v1462_v53 = vpop.f32.mrb[47].mxu0 }
 0x171   :  { %vm1646_vm8 = vcmp.ge.f32.partialorder %v1458_v49, 0.0  ;;  %v1710_v54 = vmul.f32 0.1, %v1458_v49  ;;  %v1461_v55 = vadd.f32 %v1460_v51, %v1172_v50 }
 0x173   :  { %v1774_v56 = vsel %vm1646_vm8, %v1458_v49, %v1710_v54  ;;  %vm1647_vm9 = vcmp.ge.f32.partialorder %v1461_v55, 0.0  ;;  %v1711_v57 = vmul.f32 0.1, %v1461_v55 }
 0x174   :  { %v2388_v58 = vpack.c.bf16 %v1774_v56, %v1774_v56  ;;  %v1176_v59 = vpop.f32.mrb[48].mxu1 }
 0x175   :  { %v1775_v60 = vsel %vm1647_vm9, %v1461_v55, %v1711_v57  ;;  %v1177_v61 = vadd.f32 %v3266_v15, %v1176_v59  ;;  %v1465_v62 = vpop.f32.mrb[48].mxu0  ;;  %v1178_v63 = vpop.f32.mrb[49].mxu1 }
 0x176   :  { %2095 = vst.msk [vmem:[%s3650_s3 + $0x58] sm:$0xf] %vm2072_vm1, %v2388_v58  ;;  %v2389_v0 = vpack.c.bf16 %v1775_v60, %v1775_v60  ;;  %v1467_v1 = vpop.f32.mrb[49].mxu0  ;;  %v1179_v2 = vpop.f32.mrb[50].mxu1 }
 0x177   :  { %v1466_v3 = vadd.f32 %v1465_v62, %v1177_v61  ;;  %v1180_v4 = vadd.f32 %v3266_v15, %v1179_v2  ;;  %v1468_v5 = vpop.f32.mrb[50].mxu0  ;;  %v1181_v6 = vpop.f32.mrb[51].mxu1 }
 0x178   :  { %2096 = vst.msk [vmem:[%s3650_s3 + $0x5c] sm:$0xf] %vm2072_vm1, %v2389_v0  ;;  %v1470_v7 = vpop.f32.mrb[51].mxu0 }
 0x179   :  { %vm1648_vm10 = vcmp.ge.f32.partialorder %v1466_v3, 0.0  ;;  %v1712_v8 = vmul.f32 0.1, %v1466_v3  ;;  %v1469_v9 = vadd.f32 %v1468_v5, %v1180_v4 }
 0x17b   :  { %v1776_v10 = vsel %vm1648_vm10, %v1466_v3, %v1712_v8  ;;  %vm1649_vm11 = vcmp.ge.f32.partialorder %v1469_v9, 0.0  ;;  %v1713_v11 = vmul.f32 0.1, %v1469_v9 }
 0x17c   :  { %v2390_v12 = vpack.c.bf16 %v1776_v10, %v1776_v10  ;;  %v1184_v13 = vpop.f32.mrb[52].mxu1 }
 0x17d   :  { %v1777_v14 = vsel %vm1649_vm11, %v1469_v9, %v1713_v11  ;;  %v1185_v16 = vadd.f32 %v3266_v15, %v1184_v13  ;;  %v1473_v17 = vpop.f32.mrb[52].mxu0  ;;  %v1186_v18 = vpop.f32.mrb[53].mxu1 }
 0x17e   :  { %2097 = vst.msk [vmem:[%s3650_s3 + $0x60] sm:$0xf] %vm2072_vm1, %v2390_v12  ;;  %v2391_v19 = vpack.c.bf16 %v1777_v14, %v1777_v14  ;;  %v1475_v20 = vpop.f32.mrb[53].mxu0  ;;  %v1187_v21 = vpop.f32.mrb[54].mxu1 }
 0x17f   :  { %v1474_v22 = vadd.f32 %v1473_v17, %v1185_v16  ;;  %v1188_v23 = vadd.f32 %v3266_v15, %v1187_v21  ;;  %v1476_v24 = vpop.f32.mrb[54].mxu0  ;;  %v1189_v25 = vpop.f32.mrb[55].mxu1 }
 0x180   :  { %2098 = vst.msk [vmem:[%s3650_s3 + $0x64] sm:$0xf] %vm2072_vm1, %v2391_v19  ;;  %v1478_v26 = vpop.f32.mrb[55].mxu0 }
 0x181   :  { %vm1650_vm12 = vcmp.ge.f32.partialorder %v1474_v22, 0.0  ;;  %v1714_v27 = vmul.f32 0.1, %v1474_v22  ;;  %v1477_v28 = vadd.f32 %v1476_v24, %v1188_v23 }
 0x183   :  { %v1778_v29 = vsel %vm1650_vm12, %v1474_v22, %v1714_v27  ;;  %vm1651_vm13 = vcmp.ge.f32.partialorder %v1477_v28, 0.0  ;;  %v1715_v30 = vmul.f32 0.1, %v1477_v28 }
 0x184   :  { %v2392_v31 = vpack.c.bf16 %v1778_v29, %v1778_v29  ;;  %v1192_v32 = vpop.f32.mrb[56].mxu1 }
 0x185   :  { %v1779_v33 = vsel %vm1651_vm13, %v1477_v28, %v1715_v30  ;;  %v1193_v34 = vadd.f32 %v3266_v15, %v1192_v32  ;;  %v1481_v35 = vpop.f32.mrb[56].mxu0  ;;  %v1194_v36 = vpop.f32.mrb[57].mxu1 }
 0x186   :  { %2099 = vst.msk [vmem:[%s3650_s3 + $0x68] sm:$0xf] %vm2072_vm1, %v2392_v31  ;;  %v2393_v37 = vpack.c.bf16 %v1779_v33, %v1779_v33  ;;  %v1483_v38 = vpop.f32.mrb[57].mxu0  ;;  %v1195_v39 = vpop.f32.mrb[58].mxu1 }
 0x187   :  { %v1482_v40 = vadd.f32 %v1481_v35, %v1193_v34  ;;  %v1196_v41 = vadd.f32 %v3266_v15, %v1195_v39  ;;  %v1484_v42 = vpop.f32.mrb[58].mxu0  ;;  %v1197_v43 = vpop.f32.mrb[59].mxu1 }
 0x188   :  { %2100 = vst.msk [vmem:[%s3650_s3 + $0x6c] sm:$0xf] %vm2072_vm1, %v2393_v37  ;;  %v1486_v44 = vpop.f32.mrb[59].mxu0 }
 0x189   :  { %vm1652_vm14 = vcmp.ge.f32.partialorder %v1482_v40, 0.0  ;;  %v1716_v45 = vmul.f32 0.1, %v1482_v40  ;;  %v1485_v46 = vadd.f32 %v1484_v42, %v1196_v41 }
 0x18b   :  { %v1780_v47 = vsel %vm1652_vm14, %v1482_v40, %v1716_v45  ;;  %vm1653_vm15 = vcmp.ge.f32.partialorder %v1485_v46, 0.0  ;;  %v1717_v48 = vmul.f32 0.1, %v1485_v46 }
 0x18c   :  { %v2394_v49 = vpack.c.bf16 %v1780_v47, %v1780_v47  ;;  %v1200_v50 = vpop.f32.mrb[60].mxu1 }
 0x18d   :  { %v1781_v51 = vsel %vm1653_vm15, %v1485_v46, %v1717_v48  ;;  %v1201_v52 = vadd.f32 %v3266_v15, %v1200_v50  ;;  %v1489_v53 = vpop.f32.mrb[60].mxu0  ;;  %v1202_v54 = vpop.f32.mrb[61].mxu1 }
 0x18e   :  { %2101 = vst.msk [vmem:[%s3650_s3 + $0x70] sm:$0xf] %vm2072_vm1, %v2394_v49  ;;  %v2395_v55 = vpack.c.bf16 %v1781_v51, %v1781_v51  ;;  %v1491_v56 = vpop.f32.mrb[61].mxu0  ;;  %v1203_v57 = vpop.f32.mrb[62].mxu1 }
 0x18f   :  { %v1490_v58 = vadd.f32 %v1489_v53, %v1201_v52  ;;  %v1204_v59 = vadd.f32 %v3266_v15, %v1203_v57  ;;  %v1492_v60 = vpop.f32.mrb[62].mxu0  ;;  %v1205_v61 = vpop.f32.mrb[63].mxu1 }
 0x190   :  { %2102 = vst.msk [vmem:[%s3650_s3 + $0x74] sm:$0xf] %vm2072_vm1, %v2395_v55  ;;  %v1494_v62 = vpop.f32.mrb[63].mxu0 }
 0x191   :  { %vm1654_vm0 = vcmp.ge.f32.partialorder %v1490_v58, 0.0  ;;  %v1718_v63 = vmul.f32 0.1, %v1490_v58  ;;  %v1493_v0 = vadd.f32 %v1492_v60, %v1204_v59 }
 0x193   :  { %v1782_v1 = vsel %vm1654_vm0, %v1490_v58, %v1718_v63  ;;  %vm1655_vm2 = vcmp.ge.f32.partialorder %v1493_v0, 0.0  ;;  %v1719_v2 = vmul.f32 0.1, %v1493_v0 }
 0x194   :  { %v2396_v3 = vpack.c.bf16 %v1782_v1, %v1782_v1  ;;  %v1208_v4 = vpop.f32.mrb[64].mxu1 }
 0x195   :  { %v1783_v5 = vsel %vm1655_vm2, %v1493_v0, %v1719_v2  ;;  %v1209_v6 = vadd.f32 %v3266_v15, %v1208_v4  ;;  %v1497_v7 = vpop.f32.mrb[64].mxu0  ;;  %v1210_v8 = vpop.f32.mrb[65].mxu1 }
 0x196   :  { %2103 = vst.msk [vmem:[%s3650_s3 + $0x78] sm:$0xf] %vm2072_vm1, %v2396_v3  ;;  %v2397_v9 = vpack.c.bf16 %v1783_v5, %v1783_v5  ;;  %v1499_v10 = vpop.f32.mrb[65].mxu0  ;;  %v1211_v11 = vpop.f32.mrb[66].mxu1 }
 0x197   :  { %v1498_v12 = vadd.f32 %v1497_v7, %v1209_v6  ;;  %v1212_v13 = vadd.f32 %v3266_v15, %v1211_v11  ;;  %v1500_v14 = vpop.f32.mrb[66].mxu0  ;;  %v1213_v16 = vpop.f32.mrb[67].mxu1 }
 0x198   :  { %2104 = vst.msk [vmem:[%s3650_s3 + $0x7c] sm:$0xf] %vm2072_vm1, %v2397_v9  ;;  %v1502_v17 = vpop.f32.mrb[67].mxu0 }
 0x199   :  { %vm1656_vm3 = vcmp.ge.f32.partialorder %v1498_v12, 0.0  ;;  %v1720_v18 = vmul.f32 0.1, %v1498_v12  ;;  %v1501_v19 = vadd.f32 %v1500_v14, %v1212_v13 }
 0x19b   :  { %v1784_v20 = vsel %vm1656_vm3, %v1498_v12, %v1720_v18  ;;  %vm1657_vm4 = vcmp.ge.f32.partialorder %v1501_v19, 0.0  ;;  %v1721_v21 = vmul.f32 0.1, %v1501_v19 }
 0x19c   :  { %v2398_v22 = vpack.c.bf16 %v1784_v20, %v1784_v20  ;;  %v1216_v23 = vpop.f32.mrb[68].mxu1 }
 0x19d   :  { %v1785_v24 = vsel %vm1657_vm4, %v1501_v19, %v1721_v21  ;;  %v1217_v25 = vadd.f32 %v3266_v15, %v1216_v23  ;;  %v1505_v26 = vpop.f32.mrb[68].mxu0  ;;  %v1218_v27 = vpop.f32.mrb[69].mxu1 }
 0x19e   :  { %2105 = vst.msk [vmem:[%s3650_s3 + $0x80] sm:$0xf] %vm2072_vm1, %v2398_v22  ;;  %v2399_v28 = vpack.c.bf16 %v1785_v24, %v1785_v24  ;;  %v1507_v29 = vpop.f32.mrb[69].mxu0  ;;  %v1219_v30 = vpop.f32.mrb[70].mxu1 }
 0x19f   :  { %v1506_v31 = vadd.f32 %v1505_v26, %v1217_v25  ;;  %v1220_v32 = vadd.f32 %v3266_v15, %v1219_v30  ;;  %v1508_v33 = vpop.f32.mrb[70].mxu0  ;;  %v1221_v34 = vpop.f32.mrb[71].mxu1 }
 0x1a0   :  { %2106 = vst.msk [vmem:[%s3650_s3 + $0x84] sm:$0xf] %vm2072_vm1, %v2399_v28  ;;  %v1510_v35 = vpop.f32.mrb[71].mxu0 }
 0x1a1   :  { %vm1658_vm5 = vcmp.ge.f32.partialorder %v1506_v31, 0.0  ;;  %v1722_v36 = vmul.f32 0.1, %v1506_v31  ;;  %v1509_v37 = vadd.f32 %v1508_v33, %v1220_v32 }
 0x1a3   :  { %v1786_v38 = vsel %vm1658_vm5, %v1506_v31, %v1722_v36  ;;  %vm1659_vm6 = vcmp.ge.f32.partialorder %v1509_v37, 0.0  ;;  %v1723_v39 = vmul.f32 0.1, %v1509_v37 }
 0x1a4   :  { %v2400_v40 = vpack.c.bf16 %v1786_v38, %v1786_v38  ;;  %v1224_v41 = vpop.f32.mrb[72].mxu1 }
 0x1a5   :  { %v1787_v42 = vsel %vm1659_vm6, %v1509_v37, %v1723_v39  ;;  %v1225_v43 = vadd.f32 %v3266_v15, %v1224_v41  ;;  %v1513_v44 = vpop.f32.mrb[72].mxu0  ;;  %v1226_v45 = vpop.f32.mrb[73].mxu1 }
 0x1a6   :  { %2107 = vst.msk [vmem:[%s3650_s3 + $0x88] sm:$0xf] %vm2072_vm1, %v2400_v40  ;;  %v2401_v46 = vpack.c.bf16 %v1787_v42, %v1787_v42  ;;  %v1515_v47 = vpop.f32.mrb[73].mxu0  ;;  %v1227_v48 = vpop.f32.mrb[74].mxu1 }
 0x1a7   :  { %v1514_v49 = vadd.f32 %v1513_v44, %v1225_v43  ;;  %v1228_v50 = vadd.f32 %v3266_v15, %v1227_v48  ;;  %v1516_v51 = vpop.f32.mrb[74].mxu0  ;;  %v1229_v52 = vpop.f32.mrb[75].mxu1 }
 0x1a8   :  { %2108 = vst.msk [vmem:[%s3650_s3 + $0x8c] sm:$0xf] %vm2072_vm1, %v2401_v46  ;;  %v1518_v53 = vpop.f32.mrb[75].mxu0 }
 0x1a9   :  { %vm1660_vm7 = vcmp.ge.f32.partialorder %v1514_v49, 0.0  ;;  %v1724_v54 = vmul.f32 0.1, %v1514_v49  ;;  %v1517_v55 = vadd.f32 %v1516_v51, %v1228_v50 }
 0x1ab   :  { %v1788_v56 = vsel %vm1660_vm7, %v1514_v49, %v1724_v54  ;;  %vm1661_vm8 = vcmp.ge.f32.partialorder %v1517_v55, 0.0  ;;  %v1725_v57 = vmul.f32 0.1, %v1517_v55 }
 0x1ac   :  { %v2402_v58 = vpack.c.bf16 %v1788_v56, %v1788_v56  ;;  %v1232_v59 = vpop.f32.mrb[76].mxu1 }
 0x1ad   :  { %v1789_v60 = vsel %vm1661_vm8, %v1517_v55, %v1725_v57  ;;  %v1233_v61 = vadd.f32 %v3266_v15, %v1232_v59  ;;  %v1521_v62 = vpop.f32.mrb[76].mxu0  ;;  %v1234_v63 = vpop.f32.mrb[77].mxu1 }
 0x1ae   :  { %2109 = vst.msk [vmem:[%s3650_s3 + $0x90] sm:$0xf] %vm2072_vm1, %v2402_v58  ;;  %v2403_v0 = vpack.c.bf16 %v1789_v60, %v1789_v60  ;;  %v1523_v1 = vpop.f32.mrb[77].mxu0  ;;  %v1235_v2 = vpop.f32.mrb[78].mxu1 }
 0x1af   :  { %v1522_v3 = vadd.f32 %v1521_v62, %v1233_v61  ;;  %v1236_v4 = vadd.f32 %v3266_v15, %v1235_v2  ;;  %v1524_v5 = vpop.f32.mrb[78].mxu0  ;;  %v1237_v6 = vpop.f32.mrb[79].mxu1 }
 0x1b0   :  { %2110 = vst.msk [vmem:[%s3650_s3 + $0x94] sm:$0xf] %vm2072_vm1, %v2403_v0  ;;  %v1526_v7 = vpop.f32.mrb[79].mxu0 }
 0x1b1   :  { %vm1662_vm9 = vcmp.ge.f32.partialorder %v1522_v3, 0.0  ;;  %v1726_v8 = vmul.f32 0.1, %v1522_v3  ;;  %v1525_v9 = vadd.f32 %v1524_v5, %v1236_v4 }
 0x1b3   :  { %v1790_v10 = vsel %vm1662_vm9, %v1522_v3, %v1726_v8  ;;  %vm1663_vm10 = vcmp.ge.f32.partialorder %v1525_v9, 0.0  ;;  %v1727_v11 = vmul.f32 0.1, %v1525_v9 }
 0x1b4   :  { %v2404_v12 = vpack.c.bf16 %v1790_v10, %v1790_v10  ;;  %v1240_v13 = vpop.f32.mrb[80].mxu1 }
 0x1b5   :  { %v1791_v14 = vsel %vm1663_vm10, %v1525_v9, %v1727_v11  ;;  %v1241_v16 = vadd.f32 %v3266_v15, %v1240_v13  ;;  %v1529_v17 = vpop.f32.mrb[80].mxu0  ;;  %v1242_v18 = vpop.f32.mrb[81].mxu1 }
 0x1b6   :  { %2111 = vst.msk [vmem:[%s3650_s3 + $0x98] sm:$0xf] %vm2072_vm1, %v2404_v12  ;;  %v2405_v19 = vpack.c.bf16 %v1791_v14, %v1791_v14  ;;  %v1531_v20 = vpop.f32.mrb[81].mxu0  ;;  %v1243_v21 = vpop.f32.mrb[82].mxu1 }
 0x1b7   :  { %v1530_v22 = vadd.f32 %v1529_v17, %v1241_v16  ;;  %v1244_v23 = vadd.f32 %v3266_v15, %v1243_v21  ;;  %v1532_v24 = vpop.f32.mrb[82].mxu0  ;;  %v1245_v25 = vpop.f32.mrb[83].mxu1 }
 0x1b8   :  { %2112 = vst.msk [vmem:[%s3650_s3 + $0x9c] sm:$0xf] %vm2072_vm1, %v2405_v19  ;;  %v1534_v26 = vpop.f32.mrb[83].mxu0 }
 0x1b9   :  { %vm1664_vm11 = vcmp.ge.f32.partialorder %v1530_v22, 0.0  ;;  %v1728_v27 = vmul.f32 0.1, %v1530_v22  ;;  %v1533_v28 = vadd.f32 %v1532_v24, %v1244_v23 }
 0x1bb   :  { %v1792_v29 = vsel %vm1664_vm11, %v1530_v22, %v1728_v27  ;;  %vm1665_vm12 = vcmp.ge.f32.partialorder %v1533_v28, 0.0  ;;  %v1729_v30 = vmul.f32 0.1, %v1533_v28 }
 0x1bc   :  { %v2406_v31 = vpack.c.bf16 %v1792_v29, %v1792_v29  ;;  %v1248_v32 = vpop.f32.mrb[84].mxu1 }
 0x1bd   :  { %v1793_v33 = vsel %vm1665_vm12, %v1533_v28, %v1729_v30  ;;  %v1249_v34 = vadd.f32 %v3266_v15, %v1248_v32  ;;  %v1537_v35 = vpop.f32.mrb[84].mxu0  ;;  %v1250_v36 = vpop.f32.mrb[85].mxu1 }
 0x1be   :  { %2113 = vst.msk [vmem:[%s3650_s3 + $0xa0] sm:$0xf] %vm2072_vm1, %v2406_v31  ;;  %v2407_v37 = vpack.c.bf16 %v1793_v33, %v1793_v33  ;;  %v1539_v38 = vpop.f32.mrb[85].mxu0  ;;  %v1251_v39 = vpop.f32.mrb[86].mxu1 }
 0x1bf   :  { %v1538_v40 = vadd.f32 %v1537_v35, %v1249_v34  ;;  %v1252_v41 = vadd.f32 %v3266_v15, %v1251_v39  ;;  %v1540_v42 = vpop.f32.mrb[86].mxu0  ;;  %v1253_v43 = vpop.f32.mrb[87].mxu1  ;;  %v3537_v15 = vld [vmem:[%s3649_s2] ss:$0 sm:$0xff] }
 0x1c0   :  { %2114 = vst.msk [vmem:[%s3650_s3 + $0xa4] sm:$0xf] %vm2072_vm1, %v2407_v37  ;;  %v1542_v44 = vpop.f32.mrb[87].mxu0 }
 0x1c1   :  { %vm1666_vm13 = vcmp.ge.f32.partialorder %v1538_v40, 0.0  ;;  %v1730_v45 = vmul.f32 0.1, %v1538_v40  ;;  %v1541_v46 = vadd.f32 %v1540_v42, %v1252_v41 }
 0x1c3   :  { %v1794_v47 = vsel %vm1666_vm13, %v1538_v40, %v1730_v45  ;;  %vm1667_vm14 = vcmp.ge.f32.partialorder %v1541_v46, 0.0  ;;  %v1731_v48 = vmul.f32 0.1, %v1541_v46 }
 0x1c4   :  { %v2408_v49 = vpack.c.bf16 %v1794_v47, %v1794_v47  ;;  %v1256_v50 = vpop.f32.mrb[88].mxu1 }
 0x1c5   :  { %v1795_v51 = vsel %vm1667_vm14, %v1541_v46, %v1731_v48  ;;  %v1257_v52 = vadd.f32 %v3537_v15, %v1256_v50  ;;  %v1545_v53 = vpop.f32.mrb[88].mxu0  ;;  %v1258_v54 = vpop.f32.mrb[89].mxu1 }
 0x1c6   :  { %2115 = vst.msk [vmem:[%s3650_s3 + $0xa8] sm:$0xf] %vm2072_vm1, %v2408_v49  ;;  %v2409_v55 = vpack.c.bf16 %v1795_v51, %v1795_v51  ;;  %v1547_v56 = vpop.f32.mrb[89].mxu0  ;;  %v1259_v57 = vpop.f32.mrb[90].mxu1 }
 0x1c7   :  { %v1546_v58 = vadd.f32 %v1545_v53, %v1257_v52  ;;  %v1260_v59 = vadd.f32 %v3537_v15, %v1259_v57  ;;  %v1548_v60 = vpop.f32.mrb[90].mxu0  ;;  %v1261_v61 = vpop.f32.mrb[91].mxu1 }
 0x1c8   :  { %2116 = vst.msk [vmem:[%s3650_s3 + $0xac] sm:$0xf] %vm2072_vm1, %v2409_v55  ;;  %v1550_v62 = vpop.f32.mrb[91].mxu0 }
 0x1c9   :  { %vm1668_vm15 = vcmp.ge.f32.partialorder %v1546_v58, 0.0  ;;  %v1732_v63 = vmul.f32 0.1, %v1546_v58  ;;  %v1549_v0 = vadd.f32 %v1548_v60, %v1260_v59 }
 0x1cb   :  { %v1796_v1 = vsel %vm1668_vm15, %v1546_v58, %v1732_v63  ;;  %vm1669_vm0 = vcmp.ge.f32.partialorder %v1549_v0, 0.0  ;;  %v1733_v2 = vmul.f32 0.1, %v1549_v0 }
 0x1cc   :  { %v2410_v3 = vpack.c.bf16 %v1796_v1, %v1796_v1  ;;  %v1264_v4 = vpop.f32.mrb[92].mxu1 }
 0x1cd   :  { %v1797_v5 = vsel %vm1669_vm0, %v1549_v0, %v1733_v2  ;;  %v1265_v6 = vadd.f32 %v3537_v15, %v1264_v4  ;;  %v1553_v7 = vpop.f32.mrb[92].mxu0  ;;  %v1266_v8 = vpop.f32.mrb[93].mxu1 }
 0x1ce   :  { %2117 = vst.msk [vmem:[%s3650_s3 + $0xb0] sm:$0xf] %vm2072_vm1, %v2410_v3  ;;  %v2411_v9 = vpack.c.bf16 %v1797_v5, %v1797_v5  ;;  %v1555_v10 = vpop.f32.mrb[93].mxu0  ;;  %v1267_v11 = vpop.f32.mrb[94].mxu1 }
 0x1cf   :  { %v1554_v12 = vadd.f32 %v1553_v7, %v1265_v6  ;;  %v1268_v13 = vadd.f32 %v3537_v15, %v1267_v11  ;;  %v1556_v14 = vpop.f32.mrb[94].mxu0  ;;  %v1269_v16 = vpop.f32.mrb[95].mxu1 }
 0x1d0   :  { %2118 = vst.msk [vmem:[%s3650_s3 + $0xb4] sm:$0xf] %vm2072_vm1, %v2411_v9  ;;  %v1558_v17 = vpop.f32.mrb[95].mxu0 }
 0x1d1   :  { %vm1670_vm2 = vcmp.ge.f32.partialorder %v1554_v12, 0.0  ;;  %v1734_v18 = vmul.f32 0.1, %v1554_v12  ;;  %v1557_v19 = vadd.f32 %v1556_v14, %v1268_v13 }
 0x1d3   :  { %v1798_v20 = vsel %vm1670_vm2, %v1554_v12, %v1734_v18  ;;  %vm1671_vm3 = vcmp.ge.f32.partialorder %v1557_v19, 0.0  ;;  %v1735_v21 = vmul.f32 0.1, %v1557_v19 }
 0x1d4   :  { %v2412_v22 = vpack.c.bf16 %v1798_v20, %v1798_v20  ;;  %v1272_v23 = vpop.f32.mrb[96].mxu1 }
 0x1d5   :  { %v1799_v24 = vsel %vm1671_vm3, %v1557_v19, %v1735_v21  ;;  %v1273_v25 = vadd.f32 %v3537_v15, %v1272_v23  ;;  %v1561_v26 = vpop.f32.mrb[96].mxu0  ;;  %v1274_v27 = vpop.f32.mrb[97].mxu1 }
 0x1d6   :  { %2119 = vst.msk [vmem:[%s3650_s3 + $0xb8] sm:$0xf] %vm2072_vm1, %v2412_v22  ;;  %v2413_v28 = vpack.c.bf16 %v1799_v24, %v1799_v24  ;;  %v1563_v29 = vpop.f32.mrb[97].mxu0  ;;  %v1275_v30 = vpop.f32.mrb[98].mxu1 }
 0x1d7   :  { %v1562_v31 = vadd.f32 %v1561_v26, %v1273_v25  ;;  %v1276_v32 = vadd.f32 %v3537_v15, %v1275_v30  ;;  %v1564_v33 = vpop.f32.mrb[98].mxu0  ;;  %v1277_v34 = vpop.f32.mrb[99].mxu1 }
 0x1d8   :  { %2120 = vst.msk [vmem:[%s3650_s3 + $0xbc] sm:$0xf] %vm2072_vm1, %v2413_v28  ;;  %v1566_v35 = vpop.f32.mrb[99].mxu0 }
 0x1d9   :  { %vm1672_vm4 = vcmp.ge.f32.partialorder %v1562_v31, 0.0  ;;  %v1736_v36 = vmul.f32 0.1, %v1562_v31  ;;  %v1565_v37 = vadd.f32 %v1564_v33, %v1276_v32 }
 0x1db   :  { %v1800_v38 = vsel %vm1672_vm4, %v1562_v31, %v1736_v36  ;;  %vm1673_vm5 = vcmp.ge.f32.partialorder %v1565_v37, 0.0  ;;  %v1737_v39 = vmul.f32 0.1, %v1565_v37 }
 0x1dc   :  { %v2414_v40 = vpack.c.bf16 %v1800_v38, %v1800_v38  ;;  %v1280_v41 = vpop.f32.mrb[100].mxu1 }
 0x1dd   :  { %v1801_v42 = vsel %vm1673_vm5, %v1565_v37, %v1737_v39  ;;  %v1281_v43 = vadd.f32 %v3537_v15, %v1280_v41  ;;  %v1569_v44 = vpop.f32.mrb[100].mxu0  ;;  %v1282_v45 = vpop.f32.mrb[101].mxu1 }
 0x1de   :  { %2121 = vst.msk [vmem:[%s3650_s3 + $0xc0] sm:$0xf] %vm2072_vm1, %v2414_v40  ;;  %v2415_v46 = vpack.c.bf16 %v1801_v42, %v1801_v42  ;;  %v1571_v47 = vpop.f32.mrb[101].mxu0  ;;  %v1283_v48 = vpop.f32.mrb[102].mxu1 }
 0x1df   :  { %v1570_v49 = vadd.f32 %v1569_v44, %v1281_v43  ;;  %v1284_v50 = vadd.f32 %v3537_v15, %v1283_v48  ;;  %v1572_v51 = vpop.f32.mrb[102].mxu0  ;;  %v1285_v52 = vpop.f32.mrb[103].mxu1 }
 0x1e0   :  { %2122 = vst.msk [vmem:[%s3650_s3 + $0xc4] sm:$0xf] %vm2072_vm1, %v2415_v46  ;;  %v1574_v53 = vpop.f32.mrb[103].mxu0 }
 0x1e1   :  { %vm1674_vm6 = vcmp.ge.f32.partialorder %v1570_v49, 0.0  ;;  %v1738_v54 = vmul.f32 0.1, %v1570_v49  ;;  %v1573_v55 = vadd.f32 %v1572_v51, %v1284_v50 }
 0x1e3   :  { %v1802_v56 = vsel %vm1674_vm6, %v1570_v49, %v1738_v54  ;;  %vm1675_vm7 = vcmp.ge.f32.partialorder %v1573_v55, 0.0  ;;  %v1739_v57 = vmul.f32 0.1, %v1573_v55 }
 0x1e4   :  { %v2416_v58 = vpack.c.bf16 %v1802_v56, %v1802_v56  ;;  %v1288_v59 = vpop.f32.mrb[104].mxu1 }
 0x1e5   :  { %v1803_v60 = vsel %vm1675_vm7, %v1573_v55, %v1739_v57  ;;  %v1289_v61 = vadd.f32 %v3537_v15, %v1288_v59  ;;  %v1577_v62 = vpop.f32.mrb[104].mxu0  ;;  %v1290_v63 = vpop.f32.mrb[105].mxu1 }
 0x1e6   :  { %2123 = vst.msk [vmem:[%s3650_s3 + $0xc8] sm:$0xf] %vm2072_vm1, %v2416_v58  ;;  %v2417_v0 = vpack.c.bf16 %v1803_v60, %v1803_v60  ;;  %v1579_v1 = vpop.f32.mrb[105].mxu0  ;;  %v1291_v2 = vpop.f32.mrb[106].mxu1 }
 0x1e7   :  { %v1578_v3 = vadd.f32 %v1577_v62, %v1289_v61  ;;  %v1292_v4 = vadd.f32 %v3537_v15, %v1291_v2  ;;  %v1580_v5 = vpop.f32.mrb[106].mxu0  ;;  %v1293_v6 = vpop.f32.mrb[107].mxu1 }
 0x1e8   :  { %2124 = vst.msk [vmem:[%s3650_s3 + $0xcc] sm:$0xf] %vm2072_vm1, %v2417_v0  ;;  %v1582_v7 = vpop.f32.mrb[107].mxu0 }
 0x1e9   :  { %vm1676_vm8 = vcmp.ge.f32.partialorder %v1578_v3, 0.0  ;;  %v1740_v8 = vmul.f32 0.1, %v1578_v3  ;;  %v1581_v9 = vadd.f32 %v1580_v5, %v1292_v4 }
 0x1eb   :  { %v1804_v10 = vsel %vm1676_vm8, %v1578_v3, %v1740_v8  ;;  %vm1677_vm9 = vcmp.ge.f32.partialorder %v1581_v9, 0.0  ;;  %v1741_v11 = vmul.f32 0.1, %v1581_v9 }
 0x1ec   :  { %v2418_v12 = vpack.c.bf16 %v1804_v10, %v1804_v10  ;;  %v1296_v13 = vpop.f32.mrb[108].mxu1 }
 0x1ed   :  { %v1805_v14 = vsel %vm1677_vm9, %v1581_v9, %v1741_v11  ;;  %v1297_v16 = vadd.f32 %v3537_v15, %v1296_v13  ;;  %v1585_v17 = vpop.f32.mrb[108].mxu0  ;;  %v1298_v18 = vpop.f32.mrb[109].mxu1 }
 0x1ee   :  { %2125 = vst.msk [vmem:[%s3650_s3 + $0xd0] sm:$0xf] %vm2072_vm1, %v2418_v12  ;;  %v2419_v19 = vpack.c.bf16 %v1805_v14, %v1805_v14  ;;  %v1587_v20 = vpop.f32.mrb[109].mxu0  ;;  %v1299_v21 = vpop.f32.mrb[110].mxu1 }
 0x1ef   :  { %v1586_v22 = vadd.f32 %v1585_v17, %v1297_v16  ;;  %v1300_v23 = vadd.f32 %v3537_v15, %v1299_v21  ;;  %v1588_v24 = vpop.f32.mrb[110].mxu0  ;;  %v1301_v25 = vpop.f32.mrb[111].mxu1 }
 0x1f0   :  { %2126 = vst.msk [vmem:[%s3650_s3 + $0xd4] sm:$0xf] %vm2072_vm1, %v2419_v19  ;;  %v1590_v26 = vpop.f32.mrb[111].mxu0 }
 0x1f1   :  { %vm1678_vm10 = vcmp.ge.f32.partialorder %v1586_v22, 0.0  ;;  %v1742_v27 = vmul.f32 0.1, %v1586_v22  ;;  %v1589_v28 = vadd.f32 %v1588_v24, %v1300_v23 }
 0x1f3   :  { %v1806_v29 = vsel %vm1678_vm10, %v1586_v22, %v1742_v27  ;;  %vm1679_vm11 = vcmp.ge.f32.partialorder %v1589_v28, 0.0  ;;  %v1743_v30 = vmul.f32 0.1, %v1589_v28 }
 0x1f4   :  { %v2420_v31 = vpack.c.bf16 %v1806_v29, %v1806_v29  ;;  %v1304_v32 = vpop.f32.mrb[112].mxu1 }
 0x1f5   :  { %v1807_v33 = vsel %vm1679_vm11, %v1589_v28, %v1743_v30  ;;  %v1305_v34 = vadd.f32 %v3537_v15, %v1304_v32  ;;  %v1593_v35 = vpop.f32.mrb[112].mxu0  ;;  %v1306_v36 = vpop.f32.mrb[113].mxu1 }
 0x1f6   :  { %2127 = vst.msk [vmem:[%s3650_s3 + $0xd8] sm:$0xf] %vm2072_vm1, %v2420_v31  ;;  %v2421_v37 = vpack.c.bf16 %v1807_v33, %v1807_v33  ;;  %v1595_v38 = vpop.f32.mrb[113].mxu0  ;;  %v1307_v39 = vpop.f32.mrb[114].mxu1 }
 0x1f7   :  { %v1594_v40 = vadd.f32 %v1593_v35, %v1305_v34  ;;  %v1308_v41 = vadd.f32 %v3537_v15, %v1307_v39  ;;  %v1596_v42 = vpop.f32.mrb[114].mxu0  ;;  %v1309_v43 = vpop.f32.mrb[115].mxu1 }
 0x1f8   :  { %2128 = vst.msk [vmem:[%s3650_s3 + $0xdc] sm:$0xf] %vm2072_vm1, %v2421_v37  ;;  %v1598_v44 = vpop.f32.mrb[115].mxu0 }
 0x1f9   :  { %vm1680_vm12 = vcmp.ge.f32.partialorder %v1594_v40, 0.0  ;;  %v1744_v45 = vmul.f32 0.1, %v1594_v40  ;;  %v1597_v46 = vadd.f32 %v1596_v42, %v1308_v41 }
 0x1fb   :  { %v1808_v47 = vsel %vm1680_vm12, %v1594_v40, %v1744_v45  ;;  %vm1681_vm13 = vcmp.ge.f32.partialorder %v1597_v46, 0.0  ;;  %v1745_v48 = vmul.f32 0.1, %v1597_v46 }
 0x1fc   :  { %v2422_v49 = vpack.c.bf16 %v1808_v47, %v1808_v47  ;;  %v1312_v50 = vpop.f32.mrb[116].mxu1 }
 0x1fd   :  { %v1809_v51 = vsel %vm1681_vm13, %v1597_v46, %v1745_v48  ;;  %v1313_v52 = vadd.f32 %v3537_v15, %v1312_v50  ;;  %v1601_v53 = vpop.f32.mrb[116].mxu0  ;;  %v1314_v54 = vpop.f32.mrb[117].mxu1 }
 0x1fe   :  { %2129 = vst.msk [vmem:[%s3650_s3 + $0xe0] sm:$0xf] %vm2072_vm1, %v2422_v49  ;;  %v2423_v55 = vpack.c.bf16 %v1809_v51, %v1809_v51  ;;  %v1603_v56 = vpop.f32.mrb[117].mxu0  ;;  %v1315_v57 = vpop.f32.mrb[118].mxu1 }
 0x1ff   :  { %v1602_v58 = vadd.f32 %v1601_v53, %v1313_v52  ;;  %v1316_v59 = vadd.f32 %v3537_v15, %v1315_v57  ;;  %v1604_v60 = vpop.f32.mrb[118].mxu0  ;;  %v1317_v61 = vpop.f32.mrb[119].mxu1 }
 0x200   :  { %2130 = vst.msk [vmem:[%s3650_s3 + $0xe4] sm:$0xf] %vm2072_vm1, %v2423_v55  ;;  %v1606_v62 = vpop.f32.mrb[119].mxu0 }
 0x201   :  { %vm1682_vm14 = vcmp.ge.f32.partialorder %v1602_v58, 0.0  ;;  %v1746_v63 = vmul.f32 0.1, %v1602_v58  ;;  %v1605_v0 = vadd.f32 %v1604_v60, %v1316_v59 }
 0x203   :  { %v1810_v1 = vsel %vm1682_vm14, %v1602_v58, %v1746_v63  ;;  %vm1683_vm15 = vcmp.ge.f32.partialorder %v1605_v0, 0.0  ;;  %v1747_v2 = vmul.f32 0.1, %v1605_v0 }
 0x204   :  { %v2424_v3 = vpack.c.bf16 %v1810_v1, %v1810_v1  ;;  %v1320_v4 = vpop.f32.mrb[120].mxu1 }
 0x205   :  { %v1811_v5 = vsel %vm1683_vm15, %v1605_v0, %v1747_v2  ;;  %v1321_v6 = vadd.f32 %v3537_v15, %v1320_v4  ;;  %v1609_v7 = vpop.f32.mrb[120].mxu0  ;;  %v1322_v8 = vpop.f32.mrb[121].mxu1 }
 0x206   :  { %2131 = vst.msk [vmem:[%s3650_s3 + $0xe8] sm:$0xf] %vm2072_vm1, %v2424_v3  ;;  %v2425_v9 = vpack.c.bf16 %v1811_v5, %v1811_v5  ;;  %v1611_v10 = vpop.f32.mrb[121].mxu0  ;;  %v1323_v11 = vpop.f32.mrb[122].mxu1 }
 0x207   :  { %v1610_v12 = vadd.f32 %v1609_v7, %v1321_v6  ;;  %v1324_v13 = vadd.f32 %v3537_v15, %v1323_v11  ;;  %v1612_v14 = vpop.f32.mrb[122].mxu0  ;;  %v1325_v16 = vpop.f32.mrb[123].mxu1 }
 0x208   :  { %2132 = vst.msk [vmem:[%s3650_s3 + $0xec] sm:$0xf] %vm2072_vm1, %v2425_v9  ;;  %v1614_v17 = vpop.f32.mrb[123].mxu0 }
 0x209   :  { %vm1684_vm0 = vcmp.ge.f32.partialorder %v1610_v12, 0.0  ;;  %v1748_v18 = vmul.f32 0.1, %v1610_v12  ;;  %v1613_v19 = vadd.f32 %v1612_v14, %v1324_v13 }
 0x20b   :  { %v1812_v20 = vsel %vm1684_vm0, %v1610_v12, %v1748_v18  ;;  %vm1685_vm2 = vcmp.ge.f32.partialorder %v1613_v19, 0.0  ;;  %v1749_v21 = vmul.f32 0.1, %v1613_v19 }
 0x20c   :  { %v2426_v22 = vpack.c.bf16 %v1812_v20, %v1812_v20  ;;  %v1328_v23 = vpop.f32.mrb[124].mxu1 }
 0x20d   :  { %v1813_v24 = vsel %vm1685_vm2, %v1613_v19, %v1749_v21  ;;  %v1329_v25 = vadd.f32 %v3537_v15, %v1328_v23  ;;  %v1617_v26 = vpop.f32.mrb[124].mxu0  ;;  %v1330_v27 = vpop.f32.mrb[125].mxu1 }
 0x20e   :  { %2133 = vst.msk [vmem:[%s3650_s3 + $0xf0] sm:$0xf] %vm2072_vm1, %v2426_v22  ;;  %v2427_v28 = vpack.c.bf16 %v1813_v24, %v1813_v24  ;;  %v1619_v29 = vpop.f32.mrb[125].mxu0  ;;  %v1331_v30 = vpop.f32.mrb[126].mxu1 }
 0x20f   :  { %v1618_v31 = vadd.f32 %v1617_v26, %v1329_v25  ;;  %v1332_v32 = vadd.f32 %v3537_v15, %v1331_v30  ;;  %v1620_v33 = vpop.f32.mrb[126].mxu0  ;;  %v1333_v34 = vpop.f32.mrb[127].mxu1 }
 0x210   :  { %2134 = vst.msk [vmem:[%s3650_s3 + $0xf4] sm:$0xf] %vm2072_vm1, %v2427_v28  ;;  %v1622_v35 = vpop.f32.mrb[127].mxu0 }
 0x211   :  { %vm1686_vm3 = vcmp.ge.f32.partialorder %v1618_v31, 0.0  ;;  %v1750_v36 = vmul.f32 0.1, %v1618_v31  ;;  %v1621_v37 = vadd.f32 %v1620_v33, %v1332_v32 }
 0x213   :  { %v1814_v38 = vsel %vm1686_vm3, %v1618_v31, %v1750_v36  ;;  %vm1687_vm4 = vcmp.ge.f32.partialorder %v1621_v37, 0.0  ;;  %v1751_v39 = vmul.f32 0.1, %v1621_v37 }
 0x214   :  { %v2428_v40 = vpack.c.bf16 %v1814_v38, %v1814_v38 }
 0x215   :  { %v1815_v41 = vsel %vm1687_vm4, %v1621_v37, %v1751_v39 }
 0x216   :  { %2135 = vst.msk [vmem:[%s3650_s3 + $0xf8] sm:$0xf] %vm2072_vm1, %v2428_v40  ;;  %v2429_v15 = vpack.c.bf16 %v1815_v41, %v1815_v41 }
 0x218   :  { %2136 = vst.msk [vmem:[%s3650_s3 + $0xfc] sm:$0xf] %vm2072_vm1, %v2429_v15 }

// kernel: discriminator_forward.7
= control target key start
LH: loop header
LB: loop body
LE: loop exit
PB: predicated region body
PF: predicated region fallthrough
CT: control target
= control target key end

     0   :  { %vm776_vm1 = vcmask 519168   ;;  %s1399_s1 = inlined_call_operand.vmem [shape: bf16[512,64], index: 1, kind: input, shape index: {}]   ;;  %s1400_s0 = inlined_call_operand.vmem [shape: bf16[128,512], index: 0, kind: input, shape index: {}]   ;;  %s1401_s2 = inlined_call_operand.vmem [shape: f32[1,64], index: 2, kind: input, shape index: {}]   ;;  %s1402_s3 = inlined_call_operand.vmem [shape: bf16[128,64], index: 3, kind: output, shape index: {}]  }
   0x1   :  { %v1022_v0 = vld [vmem:[%s1399_s1 + $0x40] sm:$0xff]   ;;  %v1026_v4 = vld [vmem:[%s1399_s1 + $0x48] sm:$0xff]   ;;  %v1030_v8 = vld [vmem:[%s1399_s1 + $0x50] sm:$0xff]  }
   0x2   :  { %v1023_v1 = vld [vmem:[%s1399_s1 + $0xc0] sm:$0xff]   ;;  %894 = vmatprep.subr.bf16.mxu0 %v1022_v0  ;;  %v1027_v5 = vld [vmem:[%s1399_s1 + $0xc8] sm:$0xff]   ;;  %v1031_v9 = vld [vmem:[%s1399_s1 + $0xd0] sm:$0xff]  }
   0x3   :  { %v1024_v2 = vld [vmem:[%s1399_s1] sm:$0xff]   ;;  %958 = vmatprep.subr.bf16.mxu1 %v1023_v1  ;;  %v1028_v6 = vld [vmem:[%s1399_s1 + $0x8] sm:$0xff]   ;;  %v1032_v10 = vld [vmem:[%s1399_s1 + $0x10] sm:$0xff]  }
   0x4   :  { %v1025_v3 = vld [vmem:[%s1399_s1 + $0x80] sm:$0xff]   ;;  %895 = vmatpush3.bf16.msra.mxu0 %v1024_v2  ;;  %v1029_v7 = vld [vmem:[%s1399_s1 + $0x88] sm:$0xff]   ;;  %v1033_v11 = vld [vmem:[%s1399_s1 + $0x90] sm:$0xff]  }
   0x5   :  { %959 = vmatpush3.bf16.msra.mxu1 %v1025_v3  ;;  %896 = vmatprep.subr.bf16.mxu0 %v1026_v4  ;;  %v1034_v12 = vld [vmem:[%s1399_s1 + $0x58] sm:$0xff]   ;;  %v1038_v16 = vld [vmem:[%s1399_s1 + $0x60] sm:$0xff]   ;;  %v1042_v20 = vld [vmem:[%s1399_s1 + $0x68] sm:$0xff]  }
   0x6   :  { %960 = vmatprep.subr.bf16.mxu1 %v1027_v5  ;;  %v1035_v13 = vld [vmem:[%s1399_s1 + $0xd8] sm:$0xff]   ;;  %v1039_v17 = vld [vmem:[%s1399_s1 + $0xe0] sm:$0xff]   ;;  %v1043_v21 = vld [vmem:[%s1399_s1 + $0xe8] sm:$0xff]  }
   0x7   :  { %v1036_v14 = vld [vmem:[%s1399_s1 + $0x18] sm:$0xff]   ;;  %v1040_v18 = vld [vmem:[%s1399_s1 + $0x20] sm:$0xff]   ;;  %v1044_v22 = vld [vmem:[%s1399_s1 + $0x28] sm:$0xff]  }
   0x8   :  { %897 = vmatpush3.bf16.msra.mxu0 %v1028_v6  ;;  %v1037_v15 = vld [vmem:[%s1399_s1 + $0x98] sm:$0xff]   ;;  %v1041_v19 = vld [vmem:[%s1399_s1 + $0xa0] sm:$0xff]   ;;  %v1045_v23 = vld [vmem:[%s1399_s1 + $0xa8] sm:$0xff]  }
   0x9   :  { %961 = vmatpush3.bf16.msra.mxu1 %v1029_v7  ;;  %898 = vmatprep.subr.bf16.mxu0 %v1030_v8  ;;  %v1046_v24 = vld [vmem:[%s1399_s1 + $0x70] sm:$0xff]   ;;  %v1050_v28 = vld [vmem:[%s1399_s1 + $0x78] sm:$0xff]   ;;  %v1317_v2 = vld [vmem:[%s1401_s2] ss:$0 sm:$0xff] }
   0xa   :  { %962 = vmatprep.subr.bf16.mxu1 %v1031_v9  ;;  %v1047_v25 = vld [vmem:[%s1399_s1 + $0xf0] sm:$0xff]   ;;  %v1051_v29 = vld [vmem:[%s1399_s1 + $0xf8] sm:$0xff]  }
   0xb   :  { %v1048_v26 = vld [vmem:[%s1399_s1 + $0x30] sm:$0xff]   ;;  %v1052_v30 = vld [vmem:[%s1399_s1 + $0x38] sm:$0xff]  }
   0xc   :  { %899 = vmatpush3.bf16.msra.mxu0 %v1032_v10  ;;  %v1049_v27 = vld [vmem:[%s1399_s1 + $0xb0] sm:$0xff]   ;;  %v1053_v31 = vld [vmem:[%s1399_s1 + $0xb8] sm:$0xff]  }
   0xd   :  { %963 = vmatpush3.bf16.msra.mxu1 %v1033_v11  ;;  %900 = vmatprep.subr.bf16.mxu0 %v1034_v12  ;;  %v1054_v32 = vld [vmem:[%s1400_s0] ss:$16 sps:$4 sm:$0xff]   ;;  %v1056_v33 = vld [vmem:[%s1400_s0 + $0x4] ss:$16 sps:$4 sm:$0xff]   ;;  %v1057_v34 = vld [vmem:[%s1400_s0 + $0x8] ss:$16 sps:$4 sm:$0xff]  }
   0xe   :  { %964 = vmatprep.subr.bf16.mxu1 %v1035_v13  ;;  %v1059_v35 = vld [vmem:[%s1400_s0 + $0xc] ss:$16 sps:$4 sm:$0xff]   ;;  %502 = vmatprep.mubr.bf16.mxu0 %v1056_v33  ;;  %v1060_v36 = vld [vmem:[%s1400_s0 + $0x24] ss:$16 sps:$4 sm:$0xff]   ;;  %v1064_v38 = vld [vmem:[%s1400_s0 + $0x20] ss:$16 sps:$4 sm:$0xff]  }
   0xf   :  { %599 = vmatprep.mubr.bf16.mxu1 %v1059_v35  ;;  %v1062_v37 = vld [vmem:[%s1400_s0 + $0x2c] ss:$16 sps:$4 sm:$0xff]   ;;  %v1065_v39 = vld [vmem:[%s1400_s0 + $0x28] ss:$16 sps:$4 sm:$0xff]   ;;  %v1066_v40 = vld [vmem:[%s1400_s0 + $0x44] ss:$16 sps:$4 sm:$0xff]  }
  0x10   :  { %901 = vmatpush3.bf16.msra.mxu0 %v1036_v14  ;;  %v1068_v41 = vld [vmem:[%s1400_s0 + $0x4c] ss:$16 sps:$4 sm:$0xff]   ;;  %v1070_v42 = vld [vmem:[%s1400_s0 + $0x40] ss:$16 sps:$4 sm:$0xff]   ;;  %v1071_v43 = vld [vmem:[%s1400_s0 + $0x48] ss:$16 sps:$4 sm:$0xff]  }
  0x11   :  { %965 = vmatpush3.bf16.msra.mxu1 %v1037_v15  ;;  %902 = vmatprep.subr.bf16.mxu0 %v1038_v16  ;;  %v1072_v44 = vld [vmem:[%s1400_s0 + $0x64] ss:$16 sps:$4 sm:$0xff]   ;;  %v1074_v45 = vld [vmem:[%s1400_s0 + $0x6c] ss:$16 sps:$4 sm:$0xff]   ;;  %v1076_v46 = vld [vmem:[%s1400_s0 + $0x60] ss:$16 sps:$4 sm:$0xff]  }
  0x12   :  { %966 = vmatprep.subr.bf16.mxu1 %v1039_v17  ;;  %v1077_v47 = vld [vmem:[%s1400_s0 + $0x68] ss:$16 sps:$4 sm:$0xff]   ;;  %v1078_v48 = vld [vmem:[%s1400_s0 + $0x84] ss:$16 sps:$4 sm:$0xff]   ;;  %v1080_v49 = vld [vmem:[%s1400_s0 + $0x8c] ss:$16 sps:$4 sm:$0xff]  }
  0x13   :  { %v1082_v50 = vld [vmem:[%s1400_s0 + $0x80] ss:$16 sps:$4 sm:$0xff]   ;;  %v1083_v51 = vld [vmem:[%s1400_s0 + $0x88] ss:$16 sps:$4 sm:$0xff]   ;;  %v1084_v52 = vld [vmem:[%s1400_s0 + $0xa4] ss:$16 sps:$4 sm:$0xff]  }
  0x14   :  { %903 = vmatpush3.bf16.msra.mxu0 %v1040_v18  ;;  %v1086_v53 = vld [vmem:[%s1400_s0 + $0xac] ss:$16 sps:$4 sm:$0xff]   ;;  %v1088_v54 = vld [vmem:[%s1400_s0 + $0xa0] ss:$16 sps:$4 sm:$0xff]   ;;  %v1089_v55 = vld [vmem:[%s1400_s0 + $0xa8] ss:$16 sps:$4 sm:$0xff]  }
  0x15   :  { %967 = vmatpush3.bf16.msra.mxu1 %v1041_v19  ;;  %904 = vmatprep.subr.bf16.mxu0 %v1042_v20  ;;  %v1090_v56 = vld [vmem:[%s1400_s0 + $0xc4] ss:$16 sps:$4 sm:$0xff]   ;;  %v1092_v57 = vld [vmem:[%s1400_s0 + $0xcc] ss:$16 sps:$4 sm:$0xff]   ;;  %v1094_v58 = vld [vmem:[%s1400_s0 + $0xc0] ss:$16 sps:$4 sm:$0xff]  }
  0x16   :  { %968 = vmatprep.subr.bf16.mxu1 %v1043_v21  ;;  %v1095_v59 = vld [vmem:[%s1400_s0 + $0xc8] ss:$16 sps:$4 sm:$0xff]   ;;  %v1096_v60 = vld [vmem:[%s1400_s0 + $0xe4] ss:$16 sps:$4 sm:$0xff]   ;;  %v1098_v61 = vld [vmem:[%s1400_s0 + $0xec] ss:$16 sps:$4 sm:$0xff]  }
  0x17   :  { %v1100_v62 = vld [vmem:[%s1400_s0 + $0xe0] ss:$16 sps:$4 sm:$0xff]   ;;  %v1101_v63 = vld [vmem:[%s1400_s0 + $0xe8] ss:$16 sps:$4 sm:$0xff]  }
  0x18   :  { %905 = vmatpush3.bf16.msra.mxu0 %v1044_v22 }
  0x19   :  { %969 = vmatpush3.bf16.msra.mxu1 %v1045_v23  ;;  %906 = vmatprep.subr.bf16.mxu0 %v1046_v24 }
  0x1a   :  { %970 = vmatprep.subr.bf16.mxu1 %v1047_v25 }
  0x1c   :  { %907 = vmatpush3.bf16.msra.mxu0 %v1048_v26 }
  0x1d   :  { %971 = vmatpush3.bf16.msra.mxu1 %v1049_v27  ;;  %908 = vmatprep.subr.bf16.mxu0 %v1050_v28 }
  0x1e   :  { %972 = vmatprep.subr.bf16.mxu1 %v1051_v29 }
  0x20   :  { %909 = vmatpush3.bf16.msra.mxu0 %v1052_v30 }
  0x21   :  { %973 = vmatpush3.bf16.msra.mxu1 %v1053_v31 }
  0x23   :  { %503 = vmatmul.mubr.bf16.vlgmr.msra.gmra.mrb[0].mxu0 %v1054_v32 }
  0x24   :  { %600 = vmatmul.mubr.bf16.vlgmr.msra.gmra.mrb[0].mxu1 %v1057_v34  ;;  %510 = vmatprep.mubr.bf16.mxu0 %v1060_v36 }
  0x25   :  { %607 = vmatprep.mubr.bf16.mxu1 %v1062_v37 }
  0x2b   :  { %511 = vmatmul.mubr.bf16.gmra.mrb[4].mxu0 %v1064_v38 }
  0x2c   :  { %608 = vmatmul.mubr.bf16.gmra.mrb[4].mxu1 %v1065_v39  ;;  %518 = vmatprep.mubr.bf16.mxu0 %v1066_v40 }
  0x2d   :  { %615 = vmatprep.mubr.bf16.mxu1 %v1068_v41 }
  0x33   :  { %519 = vmatmul.mubr.bf16.gmra.mrb[8].mxu0 %v1070_v42 }
  0x34   :  { %616 = vmatmul.mubr.bf16.gmra.mrb[8].mxu1 %v1071_v43  ;;  %526 = vmatprep.mubr.bf16.mxu0 %v1072_v44 }
  0x35   :  { %623 = vmatprep.mubr.bf16.mxu1 %v1074_v45 }
  0x3b   :  { %527 = vmatmul.mubr.bf16.gmra.mrb[12].mxu0 %v1076_v46 }
  0x3c   :  { %624 = vmatmul.mubr.bf16.gmra.mrb[12].mxu1 %v1077_v47  ;;  %534 = vmatprep.mubr.bf16.mxu0 %v1078_v48 }
  0x3d   :  { %631 = vmatprep.mubr.bf16.mxu1 %v1080_v49 }
  0x43   :  { %535 = vmatmul.mubr.bf16.gmra.mrb[16].mxu0 %v1082_v50 }
  0x44   :  { %632 = vmatmul.mubr.bf16.gmra.mrb[16].mxu1 %v1083_v51  ;;  %542 = vmatprep.mubr.bf16.mxu0 %v1084_v52 }
  0x45   :  { %639 = vmatprep.mubr.bf16.mxu1 %v1086_v53 }
  0x4b   :  { %543 = vmatmul.mubr.bf16.gmra.mrb[20].mxu0 %v1088_v54 }
  0x4c   :  { %640 = vmatmul.mubr.bf16.gmra.mrb[20].mxu1 %v1089_v55  ;;  %550 = vmatprep.mubr.bf16.mxu0 %v1090_v56 }
  0x4d   :  { %647 = vmatprep.mubr.bf16.mxu1 %v1092_v57 }
  0x53   :  { %551 = vmatmul.mubr.bf16.gmra.mrb[24].mxu0 %v1094_v58 }
  0x54   :  { %648 = vmatmul.mubr.bf16.gmra.mrb[24].mxu1 %v1095_v59  ;;  %558 = vmatprep.mubr.bf16.mxu0 %v1096_v60 }
  0x55   :  { %655 = vmatprep.mubr.bf16.mxu1 %v1098_v61 }
  0x5b   :  { %559 = vmatmul.mubr.bf16.gmra.mrb[28].mxu0 %v1100_v62 }
  0x5c   :  { %656 = vmatmul.mubr.bf16.gmra.mrb[28].mxu1 %v1101_v63 }
  0xf6   :  { %v910_v0 = vpop.f32.mrb[0].mxu0 }
  0xf7   :  { %v974_v1 = vpop.f32.mrb[0].mxu1  ;;  %v911_v3 = vpop.f32.mrb[1].mxu0 }
  0xf8   :  { %v912_v4 = vadd.f32 %v911_v3, %v910_v0  ;;  %v975_v5 = vpop.f32.mrb[1].mxu1  ;;  %v913_v6 = vpop.f32.mrb[2].mxu0 }
  0xf9   :  { %v976_v7 = vadd.f32 %v975_v5, %v974_v1  ;;  %v977_v8 = vpop.f32.mrb[2].mxu1  ;;  %v914_v9 = vpop.f32.mrb[3].mxu0 }
  0xfa   :  { %v505_v10 = vadd.f32 %v912_v4, %v1317_v2  ;;  %v915_v11 = vadd.f32 %v914_v9, %v913_v6  ;;  %v978_v12 = vpop.f32.mrb[3].mxu1 }
  0xfb   :  { %v979_v13 = vadd.f32 %v978_v12, %v977_v8 }
  0xfc   :  { %v602_v14 = vadd.f32 %v976_v7, %v505_v10  ;;  %v508_v15 = vadd.f32 %v915_v11, %v1317_v2 }
  0xfe   :  { %vm664_vm0 = vcmp.ge.f32.partialorder %v602_v14, 0.0  ;;  %v680_v16 = vmul.f32 0.1, %v602_v14  ;;  %v605_v17 = vadd.f32 %v979_v13, %v508_v15  ;;  %v916_v18 = vpop.f32.mrb[4].mxu0 }
  0xff   :  { %v980_v19 = vpop.f32.mrb[4].mxu1  ;;  %v917_v20 = vpop.f32.mrb[5].mxu0 }
 0x100   :  { %v696_v21 = vsel %vm664_vm0, %v602_v14, %v680_v16  ;;  %vm665_vm2 = vcmp.ge.f32.partialorder %v605_v17, 0.0  ;;  %v681_v22 = vmul.f32 0.1, %v605_v17  ;;  %v918_v23 = vadd.f32 %v917_v20, %v916_v18  ;;  %v981_v24 = vpop.f32.mrb[5].mxu1  ;;  %v919_v25 = vpop.f32.mrb[6].mxu0 }
 0x101   :  { %v878_v26 = vpack.c.bf16 %v696_v21, %v696_v21  ;;  %v982_v27 = vadd.f32 %v981_v24, %v980_v19  ;;  %v983_v28 = vpop.f32.mrb[6].mxu1  ;;  %v920_v29 = vpop.f32.mrb[7].mxu0 }
 0x102   :  { %v697_v30 = vsel %vm665_vm2, %v605_v17, %v681_v22  ;;  %v513_v31 = vadd.f32 %v918_v23, %v1317_v2  ;;  %v921_v32 = vadd.f32 %v920_v29, %v919_v25  ;;  %v984_v33 = vpop.f32.mrb[7].mxu1 }
 0x103   :  { %777 = vst.msk [vmem:[%s1402_s3] sm:$0xf] %vm776_vm1, %v878_v26  ;;  %v879_v34 = vpack.c.bf16 %v697_v30, %v697_v30  ;;  %v985_v35 = vadd.f32 %v984_v33, %v983_v28 }
 0x104   :  { %v610_v36 = vadd.f32 %v982_v27, %v513_v31  ;;  %v516_v37 = vadd.f32 %v921_v32, %v1317_v2 }
 0x105   :  { %778 = vst.msk [vmem:[%s1402_s3 + $0x4] sm:$0xf] %vm776_vm1, %v879_v34 }
 0x106   :  { %vm666_vm3 = vcmp.ge.f32.partialorder %v610_v36, 0.0  ;;  %v682_v38 = vmul.f32 0.1, %v610_v36  ;;  %v613_v39 = vadd.f32 %v985_v35, %v516_v37  ;;  %v922_v40 = vpop.f32.mrb[8].mxu0 }
 0x107   :  { %v986_v41 = vpop.f32.mrb[8].mxu1  ;;  %v923_v42 = vpop.f32.mrb[9].mxu0 }
 0x108   :  { %v698_v43 = vsel %vm666_vm3, %v610_v36, %v682_v38  ;;  %vm667_vm4 = vcmp.ge.f32.partialorder %v613_v39, 0.0  ;;  %v683_v44 = vmul.f32 0.1, %v613_v39  ;;  %v924_v45 = vadd.f32 %v923_v42, %v922_v40  ;;  %v987_v46 = vpop.f32.mrb[9].mxu1  ;;  %v925_v47 = vpop.f32.mrb[10].mxu0 }
 0x109   :  { %v880_v48 = vpack.c.bf16 %v698_v43, %v698_v43  ;;  %v988_v49 = vadd.f32 %v987_v46, %v986_v41  ;;  %v989_v50 = vpop.f32.mrb[10].mxu1  ;;  %v926_v51 = vpop.f32.mrb[11].mxu0 }
 0x10a   :  { %v699_v52 = vsel %vm667_vm4, %v613_v39, %v683_v44  ;;  %v521_v53 = vadd.f32 %v924_v45, %v1317_v2  ;;  %v927_v54 = vadd.f32 %v926_v51, %v925_v47  ;;  %v990_v55 = vpop.f32.mrb[11].mxu1 }
 0x10b   :  { %779 = vst.msk [vmem:[%s1402_s3 + $0x8] sm:$0xf] %vm776_vm1, %v880_v48  ;;  %v881_v56 = vpack.c.bf16 %v699_v52, %v699_v52  ;;  %v991_v57 = vadd.f32 %v990_v55, %v989_v50 }
 0x10c   :  { %v618_v58 = vadd.f32 %v988_v49, %v521_v53  ;;  %v524_v59 = vadd.f32 %v927_v54, %v1317_v2 }
 0x10d   :  { %780 = vst.msk [vmem:[%s1402_s3 + $0xc] sm:$0xf] %vm776_vm1, %v881_v56 }
 0x10e   :  { %vm668_vm5 = vcmp.ge.f32.partialorder %v618_v58, 0.0  ;;  %v684_v60 = vmul.f32 0.1, %v618_v58  ;;  %v621_v61 = vadd.f32 %v991_v57, %v524_v59  ;;  %v928_v62 = vpop.f32.mrb[12].mxu0 }
 0x10f   :  { %v992_v63 = vpop.f32.mrb[12].mxu1  ;;  %v929_v0 = vpop.f32.mrb[13].mxu0 }
 0x110   :  { %v700_v1 = vsel %vm668_vm5, %v618_v58, %v684_v60  ;;  %vm669_vm6 = vcmp.ge.f32.partialorder %v621_v61, 0.0  ;;  %v685_v3 = vmul.f32 0.1, %v621_v61  ;;  %v930_v4 = vadd.f32 %v929_v0, %v928_v62  ;;  %v993_v5 = vpop.f32.mrb[13].mxu1  ;;  %v931_v6 = vpop.f32.mrb[14].mxu0 }
 0x111   :  { %v882_v7 = vpack.c.bf16 %v700_v1, %v700_v1  ;;  %v994_v8 = vadd.f32 %v993_v5, %v992_v63  ;;  %v995_v9 = vpop.f32.mrb[14].mxu1  ;;  %v932_v10 = vpop.f32.mrb[15].mxu0 }
 0x112   :  { %v701_v11 = vsel %vm669_vm6, %v621_v61, %v685_v3  ;;  %v529_v12 = vadd.f32 %v930_v4, %v1317_v2  ;;  %v933_v13 = vadd.f32 %v932_v10, %v931_v6  ;;  %v996_v14 = vpop.f32.mrb[15].mxu1 }
 0x113   :  { %781 = vst.msk [vmem:[%s1402_s3 + $0x10] sm:$0xf] %vm776_vm1, %v882_v7  ;;  %v883_v15 = vpack.c.bf16 %v701_v11, %v701_v11  ;;  %v997_v16 = vadd.f32 %v996_v14, %v995_v9 }
 0x114   :  { %v626_v17 = vadd.f32 %v994_v8, %v529_v12  ;;  %v532_v18 = vadd.f32 %v933_v13, %v1317_v2 }
 0x115   :  { %782 = vst.msk [vmem:[%s1402_s3 + $0x14] sm:$0xf] %vm776_vm1, %v883_v15 }
 0x116   :  { %vm670_vm7 = vcmp.ge.f32.partialorder %v626_v17, 0.0  ;;  %v686_v19 = vmul.f32 0.1, %v626_v17  ;;  %v629_v20 = vadd.f32 %v997_v16, %v532_v18  ;;  %v934_v21 = vpop.f32.mrb[16].mxu0 }
 0x117   :  { %v998_v22 = vpop.f32.mrb[16].mxu1  ;;  %v935_v23 = vpop.f32.mrb[17].mxu0 }
 0x118   :  { %v702_v24 = vsel %vm670_vm7, %v626_v17, %v686_v19  ;;  %vm671_vm8 = vcmp.ge.f32.partialorder %v629_v20, 0.0  ;;  %v687_v25 = vmul.f32 0.1, %v629_v20  ;;  %v936_v26 = vadd.f32 %v935_v23, %v934_v21  ;;  %v999_v27 = vpop.f32.mrb[17].mxu1  ;;  %v937_v28 = vpop.f32.mrb[18].mxu0 }
 0x119   :  { %v884_v29 = vpack.c.bf16 %v702_v24, %v702_v24  ;;  %v1000_v30 = vadd.f32 %v999_v27, %v998_v22  ;;  %v1001_v31 = vpop.f32.mrb[18].mxu1  ;;  %v938_v32 = vpop.f32.mrb[19].mxu0 }
 0x11a   :  { %v703_v33 = vsel %vm671_vm8, %v629_v20, %v687_v25  ;;  %v537_v34 = vadd.f32 %v936_v26, %v1317_v2  ;;  %v939_v35 = vadd.f32 %v938_v32, %v937_v28  ;;  %v1002_v36 = vpop.f32.mrb[19].mxu1 }
 0x11b   :  { %783 = vst.msk [vmem:[%s1402_s3 + $0x18] sm:$0xf] %vm776_vm1, %v884_v29  ;;  %v885_v37 = vpack.c.bf16 %v703_v33, %v703_v33  ;;  %v1003_v38 = vadd.f32 %v1002_v36, %v1001_v31 }
 0x11c   :  { %v634_v39 = vadd.f32 %v1000_v30, %v537_v34  ;;  %v540_v40 = vadd.f32 %v939_v35, %v1317_v2 }
 0x11d   :  { %784 = vst.msk [vmem:[%s1402_s3 + $0x1c] sm:$0xf] %vm776_vm1, %v885_v37 }
 0x11e   :  { %vm672_vm9 = vcmp.ge.f32.partialorder %v634_v39, 0.0  ;;  %v688_v41 = vmul.f32 0.1, %v634_v39  ;;  %v637_v42 = vadd.f32 %v1003_v38, %v540_v40  ;;  %v940_v43 = vpop.f32.mrb[20].mxu0 }
 0x11f   :  { %v1004_v44 = vpop.f32.mrb[20].mxu1  ;;  %v941_v45 = vpop.f32.mrb[21].mxu0 }
 0x120   :  { %v704_v46 = vsel %vm672_vm9, %v634_v39, %v688_v41  ;;  %vm673_vm10 = vcmp.ge.f32.partialorder %v637_v42, 0.0  ;;  %v689_v47 = vmul.f32 0.1, %v637_v42  ;;  %v942_v48 = vadd.f32 %v941_v45, %v940_v43  ;;  %v1005_v49 = vpop.f32.mrb[21].mxu1  ;;  %v943_v50 = vpop.f32.mrb[22].mxu0 }
 0x121   :  { %v886_v51 = vpack.c.bf16 %v704_v46, %v704_v46  ;;  %v1006_v52 = vadd.f32 %v1005_v49, %v1004_v44  ;;  %v1007_v53 = vpop.f32.mrb[22].mxu1  ;;  %v944_v54 = vpop.f32.mrb[23].mxu0 }
 0x122   :  { %v705_v55 = vsel %vm673_vm10, %v637_v42, %v689_v47  ;;  %v545_v56 = vadd.f32 %v942_v48, %v1317_v2  ;;  %v945_v57 = vadd.f32 %v944_v54, %v943_v50  ;;  %v1008_v58 = vpop.f32.mrb[23].mxu1 }
 0x123   :  { %785 = vst.msk [vmem:[%s1402_s3 + $0x20] sm:$0xf] %vm776_vm1, %v886_v51  ;;  %v887_v59 = vpack.c.bf16 %v705_v55, %v705_v55  ;;  %v1009_v60 = vadd.f32 %v1008_v58, %v1007_v53 }
 0x124   :  { %v642_v61 = vadd.f32 %v1006_v52, %v545_v56  ;;  %v548_v62 = vadd.f32 %v945_v57, %v1317_v2 }
 0x125   :  { %786 = vst.msk [vmem:[%s1402_s3 + $0x24] sm:$0xf] %vm776_vm1, %v887_v59 }
 0x126   :  { %vm674_vm11 = vcmp.ge.f32.partialorder %v642_v61, 0.0  ;;  %v690_v63 = vmul.f32 0.1, %v642_v61  ;;  %v645_v0 = vadd.f32 %v1009_v60, %v548_v62  ;;  %v946_v1 = vpop.f32.mrb[24].mxu0 }
 0x127   :  { %v1010_v3 = vpop.f32.mrb[24].mxu1  ;;  %v947_v4 = vpop.f32.mrb[25].mxu0 }
 0x128   :  { %v706_v5 = vsel %vm674_vm11, %v642_v61, %v690_v63  ;;  %vm675_vm12 = vcmp.ge.f32.partialorder %v645_v0, 0.0  ;;  %v691_v6 = vmul.f32 0.1, %v645_v0  ;;  %v948_v7 = vadd.f32 %v947_v4, %v946_v1  ;;  %v1011_v8 = vpop.f32.mrb[25].mxu1  ;;  %v949_v9 = vpop.f32.mrb[26].mxu0 }
 0x129   :  { %v888_v10 = vpack.c.bf16 %v706_v5, %v706_v5  ;;  %v1012_v11 = vadd.f32 %v1011_v8, %v1010_v3  ;;  %v1013_v12 = vpop.f32.mrb[26].mxu1  ;;  %v950_v13 = vpop.f32.mrb[27].mxu0 }
 0x12a   :  { %v707_v14 = vsel %vm675_vm12, %v645_v0, %v691_v6  ;;  %v553_v15 = vadd.f32 %v948_v7, %v1317_v2  ;;  %v951_v16 = vadd.f32 %v950_v13, %v949_v9  ;;  %v1014_v17 = vpop.f32.mrb[27].mxu1 }
 0x12b   :  { %787 = vst.msk [vmem:[%s1402_s3 + $0x28] sm:$0xf] %vm776_vm1, %v888_v10  ;;  %v889_v18 = vpack.c.bf16 %v707_v14, %v707_v14  ;;  %v1015_v19 = vadd.f32 %v1014_v17, %v1013_v12 }
 0x12c   :  { %v650_v20 = vadd.f32 %v1012_v11, %v553_v15  ;;  %v556_v21 = vadd.f32 %v951_v16, %v1317_v2 }
 0x12d   :  { %788 = vst.msk [vmem:[%s1402_s3 + $0x2c] sm:$0xf] %vm776_vm1, %v889_v18 }
 0x12e   :  { %vm676_vm13 = vcmp.ge.f32.partialorder %v650_v20, 0.0  ;;  %v692_v22 = vmul.f32 0.1, %v650_v20  ;;  %v653_v23 = vadd.f32 %v1015_v19, %v556_v21  ;;  %v952_v24 = vpop.f32.mrb[28].mxu0 }
 0x12f   :  { %v1016_v25 = vpop.f32.mrb[28].mxu1  ;;  %v953_v26 = vpop.f32.mrb[29].mxu0 }
 0x130   :  { %v708_v27 = vsel %vm676_vm13, %v650_v20, %v692_v22  ;;  %vm677_vm14 = vcmp.ge.f32.partialorder %v653_v23, 0.0  ;;  %v693_v28 = vmul.f32 0.1, %v653_v23  ;;  %v954_v29 = vadd.f32 %v953_v26, %v952_v24  ;;  %v1017_v30 = vpop.f32.mrb[29].mxu1  ;;  %v955_v31 = vpop.f32.mrb[30].mxu0 }
 0x131   :  { %v890_v32 = vpack.c.bf16 %v708_v27, %v708_v27  ;;  %v1018_v33 = vadd.f32 %v1017_v30, %v1016_v25  ;;  %v1019_v34 = vpop.f32.mrb[30].mxu1  ;;  %v956_v35 = vpop.f32.mrb[31].mxu0 }
 0x132   :  { %v709_v36 = vsel %vm677_vm14, %v653_v23, %v693_v28  ;;  %v561_v37 = vadd.f32 %v954_v29, %v1317_v2  ;;  %v957_v38 = vadd.f32 %v956_v35, %v955_v31  ;;  %v1020_v39 = vpop.f32.mrb[31].mxu1 }
 0x133   :  { %789 = vst.msk [vmem:[%s1402_s3 + $0x30] sm:$0xf] %vm776_vm1, %v890_v32  ;;  %v891_v40 = vpack.c.bf16 %v709_v36, %v709_v36  ;;  %v1021_v41 = vadd.f32 %v1020_v39, %v1019_v34 }
 0x134   :  { %v658_v42 = vadd.f32 %v1018_v33, %v561_v37  ;;  %v564_v43 = vadd.f32 %v957_v38, %v1317_v2 }
 0x135   :  { %790 = vst.msk [vmem:[%s1402_s3 + $0x34] sm:$0xf] %vm776_vm1, %v891_v40 }
 0x136   :  { %vm678_vm15 = vcmp.ge.f32.partialorder %v658_v42, 0.0  ;;  %v694_v44 = vmul.f32 0.1, %v658_v42  ;;  %v661_v45 = vadd.f32 %v1021_v41, %v564_v43 }
 0x138   :  { %v710_v46 = vsel %vm678_vm15, %v658_v42, %v694_v44  ;;  %vm679_vm0 = vcmp.ge.f32.partialorder %v661_v45, 0.0  ;;  %v695_v47 = vmul.f32 0.1, %v661_v45 }
 0x139   :  { %v892_v48 = vpack.c.bf16 %v710_v46, %v710_v46 }
 0x13a   :  { %v711_v49 = vsel %vm679_vm0, %v661_v45, %v695_v47 }
 0x13b   :  { %791 = vst.msk [vmem:[%s1402_s3 + $0x38] sm:$0xf] %vm776_vm1, %v892_v48  ;;  %v893_v50 = vpack.c.bf16 %v711_v49, %v711_v49 }
 0x13d   :  { %792 = vst.msk [vmem:[%s1402_s3 + $0x3c] sm:$0xf] %vm776_vm1, %v893_v50 }

// kernel: discriminator_forward.8
= control target key start
LH: loop header
LB: loop body
LE: loop exit
PB: predicated region body
PF: predicated region fallthrough
CT: control target
= control target key end

     0   :  { %vm854_vm1 = vcmask 519168   ;;  %s1407_s1 = inlined_call_operand.vmem [shape: bf16[1024,64], index: 1, kind: input, shape index: {}]   ;;  %s1408_s0 = inlined_call_operand.vmem [shape: bf16[32,1024], index: 0, kind: input, shape index: {}]   ;;  %s1409_s2 = inlined_call_operand.vmem [shape: f32[1,64], index: 2, kind: input, shape index: {}]   ;;  %s1410_s3 = inlined_call_operand.vmem [shape: bf16[32,64], index: 3, kind: output, shape index: {}]  }
   0x1   :  { %v1064_v0 = vld [vmem:[%s1407_s1 + $0x40] sm:$0xff]   ;;  %v1068_v4 = vld [vmem:[%s1407_s1 + $0x48] sm:$0xff]   ;;  %v1072_v8 = vld [vmem:[%s1407_s1 + $0x50] sm:$0xff]  }
   0x2   :  { %v1065_v1 = vld [vmem:[%s1407_s1 + $0xc0] sm:$0xff]   ;;  %952 = vmatprep.subr.bf16.mxu0 %v1064_v0  ;;  %v1069_v5 = vld [vmem:[%s1407_s1 + $0xc8] sm:$0xff]   ;;  %v1073_v9 = vld [vmem:[%s1407_s1 + $0xd0] sm:$0xff]  }
   0x3   :  { %v1066_v2 = vld [vmem:[%s1407_s1] sm:$0xff]   ;;  %980 = vmatprep.subr.bf16.mxu1 %v1065_v1  ;;  %v1070_v6 = vld [vmem:[%s1407_s1 + $0x8] sm:$0xff]   ;;  %v1074_v10 = vld [vmem:[%s1407_s1 + $0x10] sm:$0xff]  }
   0x4   :  { %v1067_v3 = vld [vmem:[%s1407_s1 + $0x80] sm:$0xff]   ;;  %953 = vmatpush3.bf16.msra.mxu0 %v1066_v2  ;;  %v1071_v7 = vld [vmem:[%s1407_s1 + $0x88] sm:$0xff]   ;;  %v1075_v11 = vld [vmem:[%s1407_s1 + $0x90] sm:$0xff]  }
   0x5   :  { %981 = vmatpush3.bf16.msra.mxu1 %v1067_v3  ;;  %954 = vmatprep.subr.bf16.mxu0 %v1068_v4  ;;  %v1076_v12 = vld [vmem:[%s1407_s1 + $0x58] sm:$0xff]   ;;  %v1080_v16 = vld [vmem:[%s1407_s1 + $0x60] sm:$0xff]   ;;  %v1084_v20 = vld [vmem:[%s1407_s1 + $0x68] sm:$0xff]  }
   0x6   :  { %982 = vmatprep.subr.bf16.mxu1 %v1069_v5  ;;  %v1077_v13 = vld [vmem:[%s1407_s1 + $0xd8] sm:$0xff]   ;;  %v1081_v17 = vld [vmem:[%s1407_s1 + $0xe0] sm:$0xff]   ;;  %v1085_v21 = vld [vmem:[%s1407_s1 + $0xe8] sm:$0xff]  }
   0x7   :  { %v1078_v14 = vld [vmem:[%s1407_s1 + $0x18] sm:$0xff]   ;;  %v1082_v18 = vld [vmem:[%s1407_s1 + $0x20] sm:$0xff]   ;;  %v1086_v22 = vld [vmem:[%s1407_s1 + $0x28] sm:$0xff]  }
   0x8   :  { %955 = vmatpush3.bf16.msra.mxu0 %v1070_v6  ;;  %v1079_v15 = vld [vmem:[%s1407_s1 + $0x98] sm:$0xff]   ;;  %v1083_v19 = vld [vmem:[%s1407_s1 + $0xa0] sm:$0xff]   ;;  %v1087_v23 = vld [vmem:[%s1407_s1 + $0xa8] sm:$0xff]  }
   0x9   :  { %983 = vmatpush3.bf16.msra.mxu1 %v1071_v7  ;;  %956 = vmatprep.subr.bf16.mxu0 %v1072_v8  ;;  %v1088_v24 = vld [vmem:[%s1407_s1 + $0x70] sm:$0xff]   ;;  %v1092_v28 = vld [vmem:[%s1407_s1 + $0x78] sm:$0xff]   ;;  %v15_v32 = vld [vmem:[%s1408_s0] sm:$0xff] }
   0xa   :  { %984 = vmatprep.subr.bf16.mxu1 %v1073_v9  ;;  %v1089_v25 = vld [vmem:[%s1407_s1 + $0xf0] sm:$0xff]   ;;  %v1093_v29 = vld [vmem:[%s1407_s1 + $0xf8] sm:$0xff]   ;;  %v19_v33 = vld [vmem:[%s1408_s0 + $0x20] sm:$0xff] }
   0xb   :  { %v1090_v26 = vld [vmem:[%s1407_s1 + $0x30] sm:$0xff]   ;;  %v1094_v30 = vld [vmem:[%s1407_s1 + $0x38] sm:$0xff]   ;;  %v16_v34 = vld [vmem:[%s1408_s0 + $0x8] sm:$0xff]  ;;  %v864_v35 = vcombine.low %v15_v32, %v19_v33  ;;  %v865_v36 = vcombine.high %v15_v32, %v19_v33 }
   0xc   :  { %957 = vmatpush3.bf16.msra.mxu0 %v1074_v10  ;;  %v1091_v27 = vld [vmem:[%s1407_s1 + $0xb0] sm:$0xff]   ;;  %v1095_v31 = vld [vmem:[%s1407_s1 + $0xb8] sm:$0xff]   ;;  %v20_v37 = vld [vmem:[%s1408_s0 + $0x28] sm:$0xff] }
   0xd   :  { %985 = vmatpush3.bf16.msra.mxu1 %v1075_v11  ;;  %958 = vmatprep.subr.bf16.mxu0 %v1076_v12  ;;  %v866_v38 = vcombine.low %v16_v34, %v20_v37  ;;  %v867_v39 = vcombine.high %v16_v34, %v20_v37  ;;  %v1096_v40 = vld [vmem:[%s1407_s1 + $0x140] sm:$0xff]   ;;  %v1100_v44 = vld [vmem:[%s1407_s1 + $0x148] sm:$0xff]   ;;  %v1104_v48 = vld [vmem:[%s1407_s1 + $0x150] sm:$0xff]  }
   0xe   :  { %986 = vmatprep.subr.bf16.mxu1 %v1077_v13  ;;  %662 = vmatprep.mubr.bf16.mxu0 %v865_v36  ;;  %v1097_v41 = vld [vmem:[%s1407_s1 + $0x1c0] sm:$0xff]   ;;  %v1101_v45 = vld [vmem:[%s1407_s1 + $0x1c8] sm:$0xff]   ;;  %v1105_v49 = vld [vmem:[%s1407_s1 + $0x1d0] sm:$0xff]  }
   0xf   :  { %711 = vmatprep.mubr.bf16.mxu1 %v867_v39  ;;  %v1098_v42 = vld [vmem:[%s1407_s1 + $0x100] sm:$0xff]   ;;  %v1102_v46 = vld [vmem:[%s1407_s1 + $0x108] sm:$0xff]   ;;  %v1106_v50 = vld [vmem:[%s1407_s1 + $0x110] sm:$0xff]  }
  0x10   :  { %959 = vmatpush3.bf16.msra.mxu0 %v1078_v14  ;;  %v1099_v43 = vld [vmem:[%s1407_s1 + $0x180] sm:$0xff]   ;;  %v1103_v47 = vld [vmem:[%s1407_s1 + $0x188] sm:$0xff]   ;;  %v1107_v51 = vld [vmem:[%s1407_s1 + $0x190] sm:$0xff]  }
  0x11   :  { %987 = vmatpush3.bf16.msra.mxu1 %v1079_v15  ;;  %960 = vmatprep.subr.bf16.mxu0 %v1080_v16  ;;  %v1108_v52 = vld [vmem:[%s1407_s1 + $0x158] sm:$0xff]   ;;  %v1112_v56 = vld [vmem:[%s1407_s1 + $0x160] sm:$0xff]   ;;  %v1116_v63 = vld [vmem:[%s1407_s1 + $0x168] sm:$0xff]  }
  0x12   :  { %988 = vmatprep.subr.bf16.mxu1 %v1081_v17  ;;  %v1109_v53 = vld [vmem:[%s1407_s1 + $0x1d8] sm:$0xff]   ;;  %v1113_v57 = vld [vmem:[%s1407_s1 + $0x1e0] sm:$0xff]   ;;  %v1117_v1 = vld [vmem:[%s1407_s1 + $0x1e8] sm:$0xff]  }
  0x13   :  { %v1110_v54 = vld [vmem:[%s1407_s1 + $0x118] sm:$0xff]   ;;  %v1114_v58 = vld [vmem:[%s1407_s1 + $0x120] sm:$0xff]   ;;  %v1118_v2 = vld [vmem:[%s1407_s1 + $0x128] sm:$0xff]  }
  0x14   :  { %961 = vmatpush3.bf16.msra.mxu0 %v1082_v18  ;;  %v1111_v55 = vld [vmem:[%s1407_s1 + $0x198] sm:$0xff]   ;;  %v1115_v59 = vld [vmem:[%s1407_s1 + $0x1a0] sm:$0xff]   ;;  %v1119_v3 = vld [vmem:[%s1407_s1 + $0x1a8] sm:$0xff]  }
  0x15   :  { %989 = vmatpush3.bf16.msra.mxu1 %v1083_v19  ;;  %962 = vmatprep.subr.bf16.mxu0 %v1084_v20  ;;  %v23_v60 = vld [vmem:[%s1408_s0 + $0x40] sm:$0xff]  ;;  %v24_v4 = vld [vmem:[%s1408_s0 + $0x48] sm:$0xff]  ;;  %v1120_v8 = vld [vmem:[%s1407_s1 + $0x170] sm:$0xff]  }
  0x16   :  { %990 = vmatprep.subr.bf16.mxu1 %v1085_v21  ;;  %v27_v61 = vld [vmem:[%s1408_s0 + $0x60] sm:$0xff]  ;;  %v28_v5 = vld [vmem:[%s1408_s0 + $0x68] sm:$0xff]  ;;  %v1121_v9 = vld [vmem:[%s1407_s1 + $0x1f0] sm:$0xff]  }
  0x17   :  { %v873_v62 = vcombine.high %v23_v60, %v27_v61  ;;  %v872_v0 = vcombine.low %v23_v60, %v27_v61  ;;  %v875_v6 = vcombine.high %v24_v4, %v28_v5  ;;  %v874_v7 = vcombine.low %v24_v4, %v28_v5  ;;  %v1122_v10 = vld [vmem:[%s1407_s1 + $0x130] sm:$0xff]   ;;  %v1124_v12 = vld [vmem:[%s1407_s1 + $0x178] sm:$0xff]   ;;  %v863_v34 = vld [vmem:[%s1409_s2] ss:$0 sm:$0xff] }
  0x18   :  { %963 = vmatpush3.bf16.msra.mxu0 %v1086_v22  ;;  %v1123_v11 = vld [vmem:[%s1407_s1 + $0x1b0] sm:$0xff]   ;;  %v1125_v13 = vld [vmem:[%s1407_s1 + $0x1f8] sm:$0xff]  }
  0x19   :  { %991 = vmatpush3.bf16.msra.mxu1 %v1087_v23  ;;  %964 = vmatprep.subr.bf16.mxu0 %v1088_v24  ;;  %v1126_v14 = vld [vmem:[%s1407_s1 + $0x138] sm:$0xff]   ;;  %v17_v16 = vld [vmem:[%s1408_s0 + $0x10] sm:$0xff] }
  0x1a   :  { %992 = vmatprep.subr.bf16.mxu1 %v1089_v25  ;;  %v1127_v15 = vld [vmem:[%s1407_s1 + $0x1b8] sm:$0xff]   ;;  %v21_v17 = vld [vmem:[%s1408_s0 + $0x30] sm:$0xff] }
  0x1b   :  { %v18_v18 = vld [vmem:[%s1408_s0 + $0x18] sm:$0xff]  ;;  %v868_v20 = vcombine.low %v17_v16, %v21_v17  ;;  %v869_v21 = vcombine.high %v17_v16, %v21_v17  ;;  %v25_v24 = vld [vmem:[%s1408_s0 + $0x50] sm:$0xff] }
  0x1c   :  { %965 = vmatpush3.bf16.msra.mxu0 %v1090_v26  ;;  %v22_v19 = vld [vmem:[%s1408_s0 + $0x38] sm:$0xff]  ;;  %v29_v25 = vld [vmem:[%s1408_s0 + $0x70] sm:$0xff] }
  0x1d   :  { %993 = vmatpush3.bf16.msra.mxu1 %v1091_v27  ;;  %966 = vmatprep.subr.bf16.mxu0 %v1092_v28  ;;  %v870_v22 = vcombine.low %v18_v18, %v22_v19  ;;  %v871_v23 = vcombine.high %v18_v18, %v22_v19  ;;  %v26_v26 = vld [vmem:[%s1408_s0 + $0x58] sm:$0xff]  ;;  %v877_v27 = vcombine.high %v25_v24, %v29_v25 }
  0x1e   :  { %994 = vmatprep.subr.bf16.mxu1 %v1093_v29  ;;  %v30_v28 = vld [vmem:[%s1408_s0 + $0x78] sm:$0xff] }
  0x1f   :  { %v879_v29 = vcombine.high %v26_v26, %v30_v28 }
  0x20   :  { %967 = vmatpush3.bf16.msra.mxu0 %v1094_v30  ;;  %v876_v30 = vcombine.low %v25_v24, %v29_v25 }
  0x21   :  { %995 = vmatpush3.bf16.msra.mxu1 %v1095_v31  ;;  %1008 = vmatprep.subr.bf16.mxu0 %v1096_v40  ;;  %v878_v31 = vcombine.low %v26_v26, %v30_v28 }
  0x22   :  { %1036 = vmatprep.subr.bf16.mxu1 %v1097_v41 }
  0x23   :  { %663 = vmatmul.mubr.bf16.vlgmr.msra.gmra.mrb[0].mxu0 %v864_v35 }
  0x24   :  { %712 = vmatmul.mubr.bf16.vlgmr.msra.gmra.mrb[0].mxu1 %v866_v38  ;;  %1009 = vmatpush3.bf16.msra.mxu0 %v1098_v42 }
  0x25   :  { %1037 = vmatpush3.bf16.msra.mxu1 %v1099_v43  ;;  %1010 = vmatprep.subr.bf16.mxu0 %v1100_v44 }
  0x26   :  { %1038 = vmatprep.subr.bf16.mxu1 %v1101_v45  ;;  %670 = vmatprep.mubr.bf16.mxu0 %v873_v62 }
  0x27   :  { %719 = vmatprep.mubr.bf16.mxu1 %v875_v6 }
  0x28   :  { %1011 = vmatpush3.bf16.msra.mxu0 %v1102_v46 }
  0x29   :  { %1039 = vmatpush3.bf16.msra.mxu1 %v1103_v47  ;;  %1012 = vmatprep.subr.bf16.mxu0 %v1104_v48 }
  0x2a   :  { %1040 = vmatprep.subr.bf16.mxu1 %v1105_v49 }
  0x2b   :  { %671 = vmatmul.mubr.bf16.gmra.mrb[4].mxu0 %v872_v0 }
  0x2c   :  { %1013 = vmatpush3.bf16.msra.mxu0 %v1106_v50  ;;  %720 = vmatmul.mubr.bf16.gmra.mrb[4].mxu1 %v874_v7 }
  0x2d   :  { %1041 = vmatpush3.bf16.msra.mxu1 %v1107_v51  ;;  %1014 = vmatprep.subr.bf16.mxu0 %v1108_v52 }
  0x2e   :  { %1042 = vmatprep.subr.bf16.mxu1 %v1109_v53  ;;  %760 = vmatprep.mubr.bf16.mxu0 %v869_v21 }
  0x2f   :  { %809 = vmatprep.mubr.bf16.mxu1 %v871_v23 }
  0x30   :  { %1015 = vmatpush3.bf16.msra.mxu0 %v1110_v54 }
  0x31   :  { %1043 = vmatpush3.bf16.msra.mxu1 %v1111_v55  ;;  %1016 = vmatprep.subr.bf16.mxu0 %v1112_v56 }
  0x32   :  { %1044 = vmatprep.subr.bf16.mxu1 %v1113_v57 }
  0x34   :  { %1017 = vmatpush3.bf16.msra.mxu0 %v1114_v58 }
  0x35   :  { %1045 = vmatpush3.bf16.msra.mxu1 %v1115_v59  ;;  %1018 = vmatprep.subr.bf16.mxu0 %v1116_v63 }
  0x36   :  { %1046 = vmatprep.subr.bf16.mxu1 %v1117_v1 }
  0x38   :  { %1019 = vmatpush3.bf16.msra.mxu0 %v1118_v2 }
  0x39   :  { %1047 = vmatpush3.bf16.msra.mxu1 %v1119_v3  ;;  %1020 = vmatprep.subr.bf16.mxu0 %v1120_v8 }
  0x3a   :  { %1048 = vmatprep.subr.bf16.mxu1 %v1121_v9 }
  0x3c   :  { %1021 = vmatpush3.bf16.msra.mxu0 %v1122_v10 }
  0x3d   :  { %1049 = vmatpush3.bf16.msra.mxu1 %v1123_v11  ;;  %1022 = vmatprep.subr.bf16.mxu0 %v1124_v12 }
  0x3e   :  { %1050 = vmatprep.subr.bf16.mxu1 %v1125_v13 }
  0x40   :  { %1023 = vmatpush3.bf16.msra.mxu0 %v1126_v14 }
  0x41   :  { %1051 = vmatpush3.bf16.msra.mxu1 %v1127_v15 }
  0x43   :  { %761 = vmatmul.mubr.bf16.vlgmr.msra.gmra.mrb[8].mxu0 %v868_v20 }
  0x44   :  { %810 = vmatmul.mubr.bf16.vlgmr.msra.gmra.mrb[8].mxu1 %v870_v22  ;;  %768 = vmatprep.mubr.bf16.mxu0 %v877_v27 }
  0x45   :  { %817 = vmatprep.mubr.bf16.mxu1 %v879_v29 }
  0x4b   :  { %769 = vmatmul.mubr.bf16.gmra.mrb[12].mxu0 %v876_v30 }
  0x4c   :  { %818 = vmatmul.mubr.bf16.gmra.mrb[12].mxu1 %v878_v31 }
  0xf6   :  { %v968_v32 = vpop.f32.mrb[0].mxu0 }
  0xf7   :  { %v996_v33 = vpop.f32.mrb[0].mxu1  ;;  %v969_v35 = vpop.f32.mrb[1].mxu0 }
  0xf8   :  { %v970_v36 = vadd.f32 %v969_v35, %v968_v32  ;;  %v997_v37 = vpop.f32.mrb[1].mxu1  ;;  %v971_v38 = vpop.f32.mrb[2].mxu0 }
  0xf9   :  { %v998_v39 = vadd.f32 %v997_v37, %v996_v33  ;;  %v999_v40 = vpop.f32.mrb[2].mxu1  ;;  %v972_v41 = vpop.f32.mrb[3].mxu0 }
  0xfa   :  { %v665_v42 = vadd.f32 %v970_v36, %v863_v34  ;;  %v973_v43 = vadd.f32 %v972_v41, %v971_v38  ;;  %v1000_v44 = vpop.f32.mrb[3].mxu1 }
  0xfb   :  { %v1001_v45 = vadd.f32 %v1000_v44, %v999_v40 }
  0xfc   :  { %v714_v46 = vadd.f32 %v998_v39, %v665_v42  ;;  %v668_v47 = vadd.f32 %v973_v43, %v863_v34 }
  0xfe   :  { %v717_v48 = vadd.f32 %v1001_v45, %v668_v47  ;;  %v974_v49 = vpop.f32.mrb[4].mxu0 }
  0xff   :  { %v975_v50 = vpop.f32.mrb[5].mxu0  ;;  %v1002_v56 = vpop.f32.mrb[4].mxu1 }
 0x100   :  { %v976_v51 = vadd.f32 %v975_v50, %v974_v49  ;;  %v977_v52 = vpop.f32.mrb[6].mxu0  ;;  %v1003_v57 = vpop.f32.mrb[5].mxu1 }
 0x101   :  { %v978_v53 = vpop.f32.mrb[7].mxu0  ;;  %v1004_v59 = vadd.f32 %v1003_v57, %v1002_v56  ;;  %v1005_v60 = vpop.f32.mrb[6].mxu1 }
 0x102   :  { %v979_v54 = vadd.f32 %v978_v53, %v977_v52  ;;  %v673_v55 = vadd.f32 %v976_v51, %v863_v34  ;;  %v1006_v61 = vpop.f32.mrb[7].mxu1 }
 0x103   :  { %v1007_v63 = vadd.f32 %v1006_v61, %v1005_v60 }
 0x104   :  { %v676_v58 = vadd.f32 %v979_v54, %v863_v34  ;;  %v722_v62 = vadd.f32 %v1004_v59, %v673_v55 }
 0x106   :  { %v725_v0 = vadd.f32 %v1007_v63, %v676_v58 }
 0x116   :  { %v1024_v1 = vpop.f32.mrb[8].mxu0 }
 0x117   :  { %v1052_v2 = vpop.f32.mrb[8].mxu1  ;;  %v1025_v3 = vpop.f32.mrb[9].mxu0 }
 0x118   :  { %v1053_v4 = vpop.f32.mrb[9].mxu1  ;;  %v1026_v5 = vadd.f32 %v1025_v3, %v1024_v1  ;;  %v1027_v7 = vpop.f32.mrb[10].mxu0 }
 0x119   :  { %v1054_v6 = vadd.f32 %v1053_v4, %v1052_v2  ;;  %v1055_v8 = vpop.f32.mrb[10].mxu1  ;;  %v1028_v9 = vpop.f32.mrb[11].mxu0 }
 0x11a   :  { %v1056_v10 = vpop.f32.mrb[11].mxu1  ;;  %v763_v11 = vadd.f32 %v1026_v5, %v714_v46  ;;  %v1029_v12 = vadd.f32 %v1028_v9, %v1027_v7 }
 0x11b   :  { %v1057_v13 = vadd.f32 %v1056_v10, %v1055_v8 }
 0x11c   :  { %v812_v14 = vadd.f32 %v1054_v6, %v763_v11  ;;  %v766_v15 = vadd.f32 %v1029_v12, %v717_v48 }
 0x11e   :  { %vm826_vm0 = vcmp.ge.f32.partialorder %v812_v14, 0.0  ;;  %v830_v16 = vmul.f32 0.1, %v812_v14  ;;  %v815_v17 = vadd.f32 %v1057_v13, %v766_v15  ;;  %v1030_v18 = vpop.f32.mrb[12].mxu0 }
 0x11f   :  { %v1058_v19 = vpop.f32.mrb[12].mxu1  ;;  %v1031_v20 = vpop.f32.mrb[13].mxu0 }
 0x120   :  { %v1059_v21 = vpop.f32.mrb[13].mxu1  ;;  %v834_v22 = vsel %vm826_vm0, %v812_v14, %v830_v16  ;;  %vm827_vm2 = vcmp.ge.f32.partialorder %v815_v17, 0.0  ;;  %v831_v23 = vmul.f32 0.1, %v815_v17  ;;  %v1032_v24 = vadd.f32 %v1031_v20, %v1030_v18  ;;  %v1033_v25 = vpop.f32.mrb[14].mxu0 }
 0x121   :  { %v1061_v26 = vpop.f32.mrb[14].mxu1  ;;  %v948_v27 = vpack.c.bf16 %v834_v22, %v834_v22  ;;  %v1060_v28 = vadd.f32 %v1059_v21, %v1058_v19  ;;  %v1034_v29 = vpop.f32.mrb[15].mxu0 }
 0x122   :  { %v1062_v30 = vpop.f32.mrb[15].mxu1  ;;  %v835_v31 = vsel %vm827_vm2, %v815_v17, %v831_v23  ;;  %v771_v32 = vadd.f32 %v1032_v24, %v722_v62  ;;  %v1035_v33 = vadd.f32 %v1034_v29, %v1033_v25 }
 0x123   :  { %v1063_v34 = vadd.f32 %v1062_v30, %v1061_v26  ;;  %855 = vst.msk [vmem:[%s1410_s3] sm:$0xf] %vm854_vm1, %v948_v27  ;;  %v949_v35 = vpack.c.bf16 %v835_v31, %v835_v31 }
 0x124   :  { %v820_v36 = vadd.f32 %v1060_v28, %v771_v32  ;;  %v774_v37 = vadd.f32 %v1035_v33, %v725_v0 }
 0x125   :  { %856 = vst.msk [vmem:[%s1410_s3 + $0x4] sm:$0xf] %vm854_vm1, %v949_v35 }
 0x126   :  { %vm828_vm3 = vcmp.ge.f32.partialorder %v820_v36, 0.0  ;;  %v832_v38 = vmul.f32 0.1, %v820_v36  ;;  %v823_v39 = vadd.f32 %v1063_v34, %v774_v37 }
 0x128   :  { %v836_v40 = vsel %vm828_vm3, %v820_v36, %v832_v38  ;;  %vm829_vm4 = vcmp.ge.f32.partialorder %v823_v39, 0.0  ;;  %v833_v41 = vmul.f32 0.1, %v823_v39 }
 0x129   :  { %v950_v42 = vpack.c.bf16 %v836_v40, %v836_v40 }
 0x12a   :  { %v837_v43 = vsel %vm829_vm4, %v823_v39, %v833_v41 }
 0x12b   :  { %857 = vst.msk [vmem:[%s1410_s3 + $0x8] sm:$0xf] %vm854_vm1, %v950_v42  ;;  %v951_v44 = vpack.c.bf16 %v837_v43, %v837_v43 }
 0x12d   :  { %858 = vst.msk [vmem:[%s1410_s3 + $0xc] sm:$0xf] %vm854_vm1, %v951_v44 }

// kernel: discriminator_forward.9
= control target key start
LH: loop header
LB: loop body
LE: loop exit
PB: predicated region body
PF: predicated region fallthrough
CT: control target
= control target key end

     0   :  { %v172_v28 = vlaneseq  ;;  %v1475_v36 = vmov 1966171168   ;;  %s1848_s0 = inlined_call_operand.vmem [shape: bf16[2,1024], index: 0, kind: input, shape index: {}]   ;;  %s1849_s1 = inlined_call_operand.vmem [shape: bf16[1024,128], index: 1, kind: input, shape index: {}]   ;;  %s1850_s2 = inlined_call_operand.vmem [shape: f32[1,128], index: 2, kind: input, shape index: {}]   ;;  %s1851_s3 = inlined_call_operand.vmem [shape: bf16[128,129], index: 3, kind: input, shape index: {}]   ;;  %s1852_s4 = inlined_call_operand.vmem [shape: f32[1,129], index: 4, kind: input, shape index: {}]   ;;  %s1853_s5 = inlined_call_operand.vmem [shape: bf16[128,13], index: 5, kind: input, shape index: {}]   ;;  %s1854_s6 = inlined_call_operand.vmem [shape: f32[1,13], index: 6, kind: input, shape index: {}]   ;;  %s1855_s7 = inlined_call_operand.vmem [shape: f32[2,1], index: 7, kind: output, shape index: {0}]   ;;  %s1856_s8 = inlined_call_operand.hbm [shape: f32[2,3], index: 8, kind: output, shape index: {1}]   ;;  %s1857_s9 = inlined_call_operand.vmem [shape: f32[2,10], index: 9, kind: output, shape index: {2}]  }
   0x1   :  { %v1342_v0 = vld [vmem:[%s1849_s1 + $0x40] sm:$0xff]   ;;  %v1346_v4 = vld [vmem:[%s1849_s1 + $0x48] sm:$0xff]   ;;  %v1350_v8 = vld [vmem:[%s1849_s1 + $0x50] sm:$0xff]   ;;  %v170_v37 = vunpack.c.l.s4 %v1475_v36 }
   0x2   :  { %v1343_v1 = vld [vmem:[%s1849_s1 + $0xc0] sm:$0xff]   ;;  %1217 = vmatprep.subr.bf16.mxu0 %v1342_v0  ;;  %v1347_v5 = vld [vmem:[%s1849_s1 + $0xc8] sm:$0xff]   ;;  %v1351_v9 = vld [vmem:[%s1849_s1 + $0xd0] sm:$0xff]   ;;  %v1629_v33 = vshrl.u32 %v172_v28, 7 }
   0x3   :  { %v1344_v2 = vld [vmem:[%s1849_s1] sm:$0xff]   ;;  %1239 = vmatprep.subr.bf16.mxu1 %v1343_v1  ;;  %v1348_v6 = vld [vmem:[%s1849_s1 + $0x8] sm:$0xff]   ;;  %v1352_v10 = vld [vmem:[%s1849_s1 + $0x10] sm:$0xff]   ;;  %v171_v40 = vunpack.c.0.s8 %v170_v37 }
   0x4   :  { %v1345_v3 = vld [vmem:[%s1849_s1 + $0x80] sm:$0xff]   ;;  %1218 = vmatpush3.bf16.msra.mxu0 %v1344_v2  ;;  %v1349_v7 = vld [vmem:[%s1849_s1 + $0x88] sm:$0xff]   ;;  %v1353_v11 = vld [vmem:[%s1849_s1 + $0x90] sm:$0xff]  }
   0x5   :  { %1240 = vmatpush3.bf16.msra.mxu1 %v1345_v3  ;;  %1219 = vmatprep.subr.bf16.mxu0 %v1346_v4  ;;  %v1354_v12 = vld [vmem:[%s1849_s1 + $0x58] sm:$0xff]   ;;  %v1358_v16 = vld [vmem:[%s1849_s1 + $0x60] sm:$0xff]   ;;  %v1362_v20 = vld [vmem:[%s1849_s1 + $0x68] sm:$0xff]   ;;  %v1641_v41 = vsub.s32 %v171_v40, %v1629_v33 }
   0x6   :  { %1241 = vmatprep.subr.bf16.mxu1 %v1347_v5  ;;  %v1355_v13 = vld [vmem:[%s1849_s1 + $0xd8] sm:$0xff]   ;;  %v1359_v17 = vld [vmem:[%s1849_s1 + $0xe0] sm:$0xff]   ;;  %v1363_v21 = vld [vmem:[%s1849_s1 + $0xe8] sm:$0xff]  }
   0x7   :  { %v1356_v14 = vld [vmem:[%s1849_s1 + $0x18] sm:$0xff]   ;;  %v1360_v18 = vld [vmem:[%s1849_s1 + $0x20] sm:$0xff]   ;;  %v1364_v22 = vld [vmem:[%s1849_s1 + $0x28] sm:$0xff]  }
   0x8   :  { %1220 = vmatpush3.bf16.msra.mxu0 %v1348_v6  ;;  %v1357_v15 = vld [vmem:[%s1849_s1 + $0x98] sm:$0xff]   ;;  %v1361_v19 = vld [vmem:[%s1849_s1 + $0xa0] sm:$0xff]   ;;  %v1365_v23 = vld [vmem:[%s1849_s1 + $0xa8] sm:$0xff]  }
   0x9   :  { %1242 = vmatpush3.bf16.msra.mxu1 %v1349_v7  ;;  %1221 = vmatprep.subr.bf16.mxu0 %v1350_v8  ;;  %v1366_v24 = vld [vmem:[%s1849_s1 + $0x70] sm:$0xff]   ;;  %v1370_v29 = vld [vmem:[%s1849_s1 + $0x78] sm:$0xff]   ;;  %v31_v34 = vld [vmem:[%s1848_s0] sm:$0xff] }
   0xa   :  { %1243 = vmatprep.subr.bf16.mxu1 %v1351_v9  ;;  %v1367_v25 = vld [vmem:[%s1849_s1 + $0xf0] sm:$0xff]   ;;  %v1371_v30 = vld [vmem:[%s1849_s1 + $0xf8] sm:$0xff]   ;;  %v1375_v35 = vld [vmem:[%s1849_s1 + $0x140] sm:$0xff]   ;;  %v168_v39 = vcombine.high %v31_v34, %v31_v34  ;;  %v175_v42 = vrot.slane %v31_v34, %v1641_v41 }
   0xb   :  { %v1368_v26 = vld [vmem:[%s1849_s1 + $0x30] sm:$0xff]   ;;  %v1372_v31 = vld [vmem:[%s1849_s1 + $0x38] sm:$0xff]   ;;  %v1376_v38 = vld [vmem:[%s1849_s1 + $0x1c0] sm:$0xff]  }
   0xc   :  { %1222 = vmatpush3.bf16.msra.mxu0 %v1352_v10  ;;  %v1369_v27 = vld [vmem:[%s1849_s1 + $0xb0] sm:$0xff]   ;;  %v1373_v32 = vld [vmem:[%s1849_s1 + $0xb8] sm:$0xff]   ;;  %v1645_v43 = vrot.slane %v168_v39, %v1641_v41  ;;  %v183_v44 = vcombine.high %v175_v42, %v175_v42  ;;  %v191_v45 = vrot.slane %v175_v42, %v1641_v41  ;;  %v1377_v47 = vld [vmem:[%s1849_s1 + $0x100] sm:$0xff]  }
   0xd   :  { %1244 = vmatpush3.bf16.msra.mxu1 %v1353_v11  ;;  %1223 = vmatprep.subr.bf16.mxu0 %v1354_v12  ;;  %v1378_v49 = vld [vmem:[%s1849_s1 + $0x180] sm:$0xff]   ;;  %v1379_v52 = vld [vmem:[%s1849_s1 + $0x148] sm:$0xff]   ;;  %v1383_v58 = vld [vmem:[%s1849_s1 + $0x150] sm:$0xff]  }
   0xe   :  { %1245 = vmatprep.subr.bf16.mxu1 %v1355_v13  ;;  %v184_v46 = vcombine.high %v1645_v43, %v1645_v43  ;;  %v205_v48 = vrot.slane %v183_v44, %v1641_v41  ;;  %v213_v51 = vcombine.high %v191_v45, %v191_v45  ;;  %v1380_v54 = vld [vmem:[%s1849_s1 + $0x1c8] sm:$0xff]   ;;  %v1384_v59 = vld [vmem:[%s1849_s1 + $0x1d0] sm:$0xff]   ;;  %v1387_v62 = vld [vmem:[%s1849_s1 + $0x158] sm:$0xff]  }
   0xf   :  { %v1381_v55 = vld [vmem:[%s1849_s1 + $0x108] sm:$0xff]   ;;  %v1385_v60 = vld [vmem:[%s1849_s1 + $0x110] sm:$0xff]   ;;  %v1388_v63 = vld [vmem:[%s1849_s1 + $0x1d8] sm:$0xff]  }
  0x10   :  { %1224 = vmatpush3.bf16.msra.mxu0 %v1356_v14  ;;  %v212_v50 = vrot.slane %v184_v46, %v1641_v41  ;;  %641 = vmatprep.mubr.bf16.mxu0 %v205_v48  ;;  %v215_v53 = vcombine.high %v205_v48, %v205_v48  ;;  %v1382_v57 = vld [vmem:[%s1849_s1 + $0x188] sm:$0xff]   ;;  %v1386_v61 = vld [vmem:[%s1849_s1 + $0x190] sm:$0xff]   ;;  %v1389_v0 = vld [vmem:[%s1849_s1 + $0x118] sm:$0xff]  }
  0x11   :  { %1246 = vmatpush3.bf16.msra.mxu1 %v1357_v15  ;;  %1225 = vmatprep.subr.bf16.mxu0 %v1358_v16  ;;  %v1390_v1 = vld [vmem:[%s1849_s1 + $0x198] sm:$0xff]   ;;  %v1391_v2 = vld [vmem:[%s1849_s1 + $0x160] sm:$0xff]   ;;  %v1395_v6 = vld [vmem:[%s1849_s1 + $0x168] sm:$0xff]  }
  0x12   :  { %1247 = vmatprep.subr.bf16.mxu1 %v1359_v17  ;;  %v216_v56 = vcombine.high %v212_v50, %v212_v50  ;;  %681 = vmatprep.mubr.bf16.mxu1 %v215_v53  ;;  %v1392_v3 = vld [vmem:[%s1849_s1 + $0x1e0] sm:$0xff]   ;;  %v1396_v7 = vld [vmem:[%s1849_s1 + $0x1e8] sm:$0xff]   ;;  %v1399_v10 = vld [vmem:[%s1849_s1 + $0x170] sm:$0xff]  }
  0x13   :  { %v1393_v4 = vld [vmem:[%s1849_s1 + $0x120] sm:$0xff]   ;;  %v1397_v8 = vld [vmem:[%s1849_s1 + $0x128] sm:$0xff]   ;;  %v1400_v11 = vld [vmem:[%s1849_s1 + $0x1f0] sm:$0xff]  }
  0x14   :  { %1226 = vmatpush3.bf16.msra.mxu0 %v1360_v18  ;;  %v1394_v5 = vld [vmem:[%s1849_s1 + $0x1a0] sm:$0xff]   ;;  %v1398_v9 = vld [vmem:[%s1849_s1 + $0x1a8] sm:$0xff]   ;;  %v1401_v12 = vld [vmem:[%s1849_s1 + $0x130] sm:$0xff]   ;;  %v198_v18 = vrot.slane %v1645_v43, %v1641_v41 }
  0x15   :  { %1248 = vmatpush3.bf16.msra.mxu1 %v1361_v19  ;;  %1227 = vmatprep.subr.bf16.mxu0 %v1362_v20  ;;  %v1403_v13 = vld [vmem:[%s1849_s1 + $0x178] sm:$0xff]   ;;  %v1402_v14 = vld [vmem:[%s1849_s1 + $0x1b0] sm:$0xff]  }
  0x16   :  { %1249 = vmatprep.subr.bf16.mxu1 %v1363_v21  ;;  %v1404_v15 = vld [vmem:[%s1849_s1 + $0x1f8] sm:$0xff]  }
  0x17   :  { %v1405_v16 = vld [vmem:[%s1849_s1 + $0x138] sm:$0xff]  }
  0x18   :  { %1228 = vmatpush3.bf16.msra.mxu0 %v1364_v22  ;;  %v1406_v17 = vld [vmem:[%s1849_s1 + $0x1b8] sm:$0xff]  }
  0x19   :  { %1250 = vmatpush3.bf16.msra.mxu1 %v1365_v23  ;;  %1229 = vmatprep.subr.bf16.mxu0 %v1366_v24 }
  0x1a   :  { %1251 = vmatprep.subr.bf16.mxu1 %v1367_v25 }
  0x1c   :  { %1230 = vmatpush3.bf16.msra.mxu0 %v1368_v26 }
  0x1d   :  { %1252 = vmatpush3.bf16.msra.mxu1 %v1369_v27  ;;  %1231 = vmatprep.subr.bf16.mxu0 %v1370_v29 }
  0x1e   :  { %1253 = vmatprep.subr.bf16.mxu1 %v1371_v30 }
  0x20   :  { %1232 = vmatpush3.bf16.msra.mxu0 %v1372_v31 }
  0x21   :  { %1254 = vmatpush3.bf16.msra.mxu1 %v1373_v32  ;;  %1261 = vmatprep.subr.bf16.mxu0 %v1375_v35 }
  0x22   :  { %1283 = vmatprep.subr.bf16.mxu1 %v1376_v38 }
  0x23   :  { %642 = vmatmul.mubr.bf16.vlgmr.msra.gmra.mrb[0].mxu0 %v191_v45 }
  0x24   :  { %1262 = vmatpush3.bf16.msra.mxu0 %v1377_v47  ;;  %682 = vmatmul.mubr.bf16.vlgmr.msra.gmra.mrb[0].mxu1 %v213_v51 }
  0x25   :  { %1263 = vmatprep.subr.bf16.mxu0 %v1379_v52  ;;  %1284 = vmatpush3.bf16.msra.mxu1 %v1378_v49 }
  0x26   :  { %721 = vmatprep.mubr.bf16.mxu0 %v212_v50  ;;  %1285 = vmatprep.subr.bf16.mxu1 %v1380_v54 }
  0x27   :  { %761 = vmatprep.mubr.bf16.mxu1 %v216_v56 }
  0x28   :  { %1264 = vmatpush3.bf16.msra.mxu0 %v1381_v55 }
  0x29   :  { %1265 = vmatprep.subr.bf16.mxu0 %v1383_v58  ;;  %1286 = vmatpush3.bf16.msra.mxu1 %v1382_v57 }
  0x2a   :  { %1287 = vmatprep.subr.bf16.mxu1 %v1384_v59 }
  0x2c   :  { %1266 = vmatpush3.bf16.msra.mxu0 %v1385_v60 }
  0x2d   :  { %1267 = vmatprep.subr.bf16.mxu0 %v1387_v62  ;;  %1288 = vmatpush3.bf16.msra.mxu1 %v1386_v61 }
  0x2e   :  { %1289 = vmatprep.subr.bf16.mxu1 %v1388_v63 }
  0x30   :  { %1268 = vmatpush3.bf16.msra.mxu0 %v1389_v0 }
  0x31   :  { %1269 = vmatprep.subr.bf16.mxu0 %v1391_v2  ;;  %1290 = vmatpush3.bf16.msra.mxu1 %v1390_v1 }
  0x32   :  { %1291 = vmatprep.subr.bf16.mxu1 %v1392_v3 }
  0x34   :  { %1270 = vmatpush3.bf16.msra.mxu0 %v1393_v4 }
  0x35   :  { %1271 = vmatprep.subr.bf16.mxu0 %v1395_v6  ;;  %1292 = vmatpush3.bf16.msra.mxu1 %v1394_v5 }
  0x36   :  { %1293 = vmatprep.subr.bf16.mxu1 %v1396_v7 }
  0x38   :  { %1272 = vmatpush3.bf16.msra.mxu0 %v1397_v8 }
  0x39   :  { %1273 = vmatprep.subr.bf16.mxu0 %v1399_v10  ;;  %1294 = vmatpush3.bf16.msra.mxu1 %v1398_v9 }
  0x3a   :  { %1295 = vmatprep.subr.bf16.mxu1 %v1400_v11 }
  0x3c   :  { %1274 = vmatpush3.bf16.msra.mxu0 %v1401_v12 }
  0x3d   :  { %1275 = vmatprep.subr.bf16.mxu0 %v1403_v13  ;;  %1296 = vmatpush3.bf16.msra.mxu1 %v1402_v14 }
  0x3e   :  { %1297 = vmatprep.subr.bf16.mxu1 %v1404_v15 }
  0x40   :  { %1276 = vmatpush3.bf16.msra.mxu0 %v1405_v16 }
  0x41   :  { %15 = vsyncpa [#allocation3], 0  ;;  %v214_v19 = vcombine.high %v198_v18, %v198_v18  ;;  %1298 = vmatpush3.bf16.msra.mxu1 %v1406_v17  ;;  %v1407_v20 = vld [vmem:[%s1851_s3] ss:$8 sps:$4 sm:$0xff]   ;;  %v1409_v21 = vld [vmem:[%s1851_s3 + $0x4] ss:$8 sps:$4 sm:$0xff]  }
  0x42   :  { %v1412_v22 = vld [vmem:[%s1851_s3 + $0x14] ss:$8 sps:$4 sm:$0xff]   ;;  %881 = vmatprep.subr.bf16.mxu0 %v1409_v21  ;;  %v1410_v23 = vld [vmem:[%s1851_s3 + $0x10] ss:$8 sps:$4 sm:$0xff]   ;;  %v1415_v24 = vld [vmem:[%s1851_s3 + $0x24] ss:$8 sps:$4 sm:$0xff]  }
  0x43   :  { %722 = vmatmul.mubr.bf16.vlgmr.msra.gmra.mrb[4].mxu0 %v198_v18  ;;  %v1413_v25 = vld [vmem:[%s1851_s3 + $0x20] ss:$8 sps:$4 sm:$0xff]   ;;  %v1418_v26 = vld [vmem:[%s1851_s3 + $0x34] ss:$8 sps:$4 sm:$0xff]   ;;  %v1416_v27 = vld [vmem:[%s1851_s3 + $0x30] ss:$8 sps:$4 sm:$0xff]  }
  0x44   :  { %762 = vmatmul.mubr.bf16.vlgmr.msra.gmra.mrb[4].mxu1 %v214_v19  ;;  %882 = vmatpush1.bf16.msra.mxu0 %v1407_v20  ;;  %v1421_v28 = vld [vmem:[%s1851_s3 + $0x44] ss:$8 sps:$4 sm:$0xff]   ;;  %v1419_v29 = vld [vmem:[%s1851_s3 + $0x40] ss:$8 sps:$4 sm:$0xff]   ;;  %v1424_v30 = vld [vmem:[%s1851_s3 + $0x54] ss:$8 sps:$4 sm:$0xff]  }
  0x45   :  { %883 = vmatprep.subr.bf16.mxu0 %v1412_v22  ;;  %v1422_v31 = vld [vmem:[%s1851_s3 + $0x50] ss:$8 sps:$4 sm:$0xff]   ;;  %v1427_v32 = vld [vmem:[%s1851_s3 + $0x64] ss:$8 sps:$4 sm:$0xff]   ;;  %v1425_v34 = vld [vmem:[%s1851_s3 + $0x60] ss:$8 sps:$4 sm:$0xff]  }
  0x46   :  { %v1430_v35 = vld [vmem:[%s1851_s3 + $0x74] ss:$8 sps:$4 sm:$0xff]   ;;  %v1428_v36 = vld [vmem:[%s1851_s3 + $0x70] ss:$8 sps:$4 sm:$0xff]   ;;  %v1476_v37 = vmov 0   ;;  %v1431_v2 = vld [vmem:[%s1853_s5] sm:$0xff]  }
  0x47   :  { %913 = vmatprep.mubr.bf16.mxu0 %v1476_v37  ;;  %v1127_v39 = vld [vmem:[%s1850_s2] ss:$0 sm:$0xff]  ;;  %v1477_v3 = vmov 0.0   ;;  %v1432_v4 = vld [vmem:[%s1853_s5 + $0x8] sm:$0xff]   ;;  %v1433_v5 = vld [vmem:[%s1853_s5 + $0x10] sm:$0xff]   ;;  %v793_v10 = vsub.s32 0, %v1629_v33 }
  0x48   :  { %884 = vmatpush1.bf16.msra.mxu0 %v1410_v23  ;;  %1314 = vmatprep.subr.bf16.mxu1 %v1477_v3  ;;  %v1434_v6 = vld [vmem:[%s1853_s5 + $0x18] sm:$0xff]   ;;  %v1435_v7 = vld [vmem:[%s1853_s5 + $0x20] sm:$0xff]   ;;  %v1436_v8 = vld [vmem:[%s1853_s5 + $0x28] sm:$0xff]   ;;  %v797_v12 = vsub.s32 1, %v1629_v33  ;;  %vm1478_vm1 = vmmov 0   ;;  %vm928_vm4 = vcmask 1024  }
  0x49   :  { %885 = vmatprep.subr.bf16.mxu0 %v1415_v24  ;;  %1315 = vmatpush3.bf16.msra.mxu1 %v1431_v2  ;;  %v1437_v9 = vld [vmem:[%s1853_s5 + $0x30] sm:$0xff]   ;;  %v789_v11 = vld [vmem:[%s1852_s4] sm:$0x3]  ;;  %v1438_v13 = vld [vmem:[%s1853_s5 + $0x38] sm:$0xff]   ;;  %s1479_s4 = smov 127   ;;  %vm967_vm5 = vcmask 1039360  }
  0x4a   :  { %1316 = vmatprep.subr.bf16.mxu1 %v1477_v3  ;;  %v794_v14 = vrot.slane %v789_v11, %v793_v10  ;;  %v798_v15 = vrot.slane %v789_v11, %v797_v12  ;;  %1330 = vmatprep.mubr.msk.bf16.mxu1 %vm1478_vm1, %v1477_v3  ;;  %vm1060_vm6 = vcmask 58392   ;;  %vm1058_vm7 = vcmask 17408   ;;  %s1482_s0 = smov [#allocation2]  }
  0x4b   :  { %vm1077_vm8 = vcmask 99392   ;;  %vm1071_vm9 = vcmask 33792   ;;  %s1113_s16 = sshll.u32 %s1482_s0, 4  ;;  %s1114_s16 = int_to_ptr.vmem [resolvable:$true] %s1113_s16 }
  0x4c   :  { %886 = vmatpush1.bf16.msra.mxu0 %v1413_v25  ;;  %s1451_s17 = scalar_lea.vmem %s1114_s16, 32  ;;  %p1456_p1 = scmp.lt.s32.totalorder %s1114_s16, %s1114_s16 }
  0x4d   :  { %887 = vmatprep.subr.bf16.mxu0 %v1418_v26  ;;  %1317 = vmatpush3.bf16.msra.mxu1 %v1432_v4  ;;  %p1452_p0 = scmp.ne.s32.totalorder %s1114_s16, %s1451_s17  ;;  %p1457_p2 = scmp.lt.s32.totalorder %s1451_s17, %s1451_s17 }
  0x4e   :  { %1318 = vmatprep.subr.bf16.mxu1 %v1477_v3 }
  0x4f   :  { %p1458_p3 = por %p1457_p2, %p1456_p1 }
  0x50   :  { %888 = vmatpush1.bf16.msra.mxu0 %v1416_v27 }
  0x51   :  { %889 = vmatprep.subr.bf16.mxu0 %v1421_v28  ;;  %1319 = vmatpush3.bf16.msra.mxu1 %v1433_v5  ;;  %p1459_p4 = pnand %p1458_p3, %p1452_p0 }
  0x52   :  { %1320 = vmatprep.subr.bf16.mxu1 %v1477_v3 }
  0x54   :  { %890 = vmatpush1.bf16.msra.mxu0 %v1419_v29 }
  0x55   :  { %891 = vmatprep.subr.bf16.mxu0 %v1424_v30  ;;  %1321 = vmatpush3.bf16.msra.mxu1 %v1434_v6 }
  0x56   :  { %1322 = vmatprep.subr.bf16.mxu1 %v1477_v3 }
  0x58   :  { %892 = vmatpush1.bf16.msra.mxu0 %v1422_v31 }
  0x59   :  { %893 = vmatprep.subr.bf16.mxu0 %v1427_v32  ;;  %1323 = vmatpush3.bf16.msra.mxu1 %v1435_v7 }
  0x5a   :  { %1324 = vmatprep.subr.bf16.mxu1 %v1477_v3 }
  0x5c   :  { %894 = vmatpush1.bf16.msra.mxu0 %v1425_v34 }
  0x5d   :  { %895 = vmatprep.subr.bf16.mxu0 %v1430_v35  ;;  %1325 = vmatpush3.bf16.msra.mxu1 %v1436_v8 }
  0x5e   :  { %1326 = vmatprep.subr.bf16.mxu1 %v1477_v3 }
  0x60   :  { %896 = vmatpush1.bf16.msra.mxu0 %v1428_v36  ;;  %v1208_v36 = vld [vmem:[%s1854_s6] ss:$0 sm:$0xff]  ;;  %s1480_s6 = smov 125  }
  0x61   :  { %1327 = vmatpush3.bf16.msra.mxu1 %v1437_v9 }
  0x62   :  { %1328 = vmatprep.subr.bf16.mxu1 %v1477_v3 }
  0x65   :  { %1329 = vmatpush3.bf16.msra.mxu1 %v1438_v13 }
  0xf6   :  { %v1233_v38 = vpop.f32.mrb[0].mxu0 }
  0xf7   :  { %v1234_v40 = vpop.f32.mrb[1].mxu0  ;;  %v1255_v41 = vpop.f32.mrb[0].mxu1 }
  0xf8   :  { %v1235_v42 = vadd.f32 %v1234_v40, %v1233_v38  ;;  %v1236_v43 = vpop.f32.mrb[2].mxu0  ;;  %v1256_v44 = vpop.f32.mrb[1].mxu1 }
  0xf9   :  { %v1237_v45 = vpop.f32.mrb[3].mxu0  ;;  %v1257_v47 = vadd.f32 %v1256_v44, %v1255_v41  ;;  %v1258_v48 = vpop.f32.mrb[2].mxu1 }
  0xfa   :  { %v644_v46 = vadd.f32 %v1235_v42, %v1127_v39  ;;  %v1259_v49 = vpop.f32.mrb[3].mxu1 }
  0xfc   :  { %v684_v50 = vadd.f32 %v1257_v47, %v644_v46 }
 0x116   :  { %v1277_v51 = vpop.f32.mrb[4].mxu0 }
 0x117   :  { %v1278_v52 = vpop.f32.mrb[5].mxu0  ;;  %v1299_v53 = vpop.f32.mrb[4].mxu1 }
 0x118   :  { %v1279_v54 = vadd.f32 %v1278_v52, %v1277_v51  ;;  %v1280_v55 = vpop.f32.mrb[6].mxu0  ;;  %v1300_v56 = vpop.f32.mrb[5].mxu1 }
 0x119   :  { %v1281_v57 = vpop.f32.mrb[7].mxu0  ;;  %v1301_v59 = vadd.f32 %v1300_v56, %v1299_v53  ;;  %v1302_v60 = vpop.f32.mrb[6].mxu1 }
 0x11a   :  { %v724_v58 = vadd.f32 %v1279_v54, %v684_v50  ;;  %v1303_v61 = vpop.f32.mrb[7].mxu1 }
 0x11c   :  { %v764_v62 = vadd.f32 %v1301_v59, %v724_v58 }
 0x11e   :  { %vm769_vm0 = vcmp.ge.f32.partialorder %v764_v62, 0.0  ;;  %v770_v63 = vmul.f32 0.1, %v764_v62 }
 0x120   :  { %v771_v0 = vsel %vm769_vm0, %v764_v62, %v770_v63 }
 0x121   :  { %v772_v1 = vpack.c.bf16 %v771_v0, %v771_v0 }
 0x123   :  { %914 = vmatmul.mubr.bf16.vlgmr.msra.gmra.mrb[8].mxu0 %v772_v1 }
 0x1f6   :  { %v915_v16 = vpop.f32.mrb[8].mxu0 }
 0x1f7   :  { %v916_v17 = vadd.f32 %v915_v16, %v794_v14  ;;  %v917_v18 = vpop.f32.mrb[9].mxu0 }
 0x1f8   :  { %v918_v19 = vadd.f32 %v917_v18, %v798_v15  ;;  %v919_v20 = vpop.f32.mrb[10].mxu0 }
 0x1f9   :  { %v922_v21 = vsub.f32 0.0, %v916_v17  ;;  %v920_v22 = vpop.f32.mrb[11].mxu0  ;;  %vm930_vm2 = vcmp.ge.f32.partialorder %v916_v17, 0.0  ;;  %v932_v23 = vmul.f32 0.1, %v916_v17 }
 0x1fa   :  { %vm931_vm3 = vcmp.ge.f32.partialorder %v918_v19, 0.0  ;;  %v933_v33 = vmul.f32 0.1, %v918_v19 }
 0x1fb   :  { %v923_v24 = vmul.f32 1.442695, %v922_v21  ;;  %v934_v25 = vsel %vm930_vm2, %v916_v17, %v932_v23 }
 0x1fc   :  { %v936_v26 = vpack.c.bf16 %v934_v25, %v934_v25  ;;  %v935_v27 = vsel %vm931_vm3, %v918_v19, %v933_v33 }
 0x1fd   :  { %1439 = vpow2.f32 %v923_v24  ;;  %v937_v28 = vpack.c.bf16 %v935_v27, %v935_v27 }
 0x1fe   :  { %963 = vrot.lane.b32.xlu0 %v936_v26, %s1479_s4 }
 0x202   :  { %965 = vrot.lane.b32.xlu0 %v937_v28, %s1479_s4 }
 0x207   :  { %v1440_v29 = vpop.eup %1439 }
 0x208   :  { %v925_v30 = vadd.f32 1.0, %v1440_v29 }
 0x20a   :  { %1441 = vrcp.f32 %v925_v30 }
 0x214   :  { %v1442_v31 = vpop.eup %1441 }
 0x215   :  { %929 = vst.msk [vmem:[%s1855_s7] sm:$0x3] %vm928_vm4, %v1442_v31  ;;  %s1481_s7 = smov 120  }
 0x270   :  { %v964_v32 = vpop.permute.xlu0 %963 }
 0x274   :  { %v966_v34 = vpop.permute.xlu0 %965 }
 0x275   :  { %v968_v35 = vsel %vm967_vm5, %v964_v32, %v966_v34 }
 0x276   :  { %1331 = vmatmul.mubr.bf16.vlgmr.msra.gmra.mrb[8].mxu1 %v968_v35 }
 0x349   :  { %v1052_v37 = vpop.f32.mrb[8].mxu1 }
 0x34a   :  { %v1053_v38 = vadd.f32 %v1208_v36, %v1052_v37  ;;  %v1332_v39 = vpop.f32.mrb[9].mxu1 }
 0x34b   :  { %v1055_v40 = vpop.f32.mrb[10].mxu1 }
 0x34c   :  { %v1333_v41 = vpop.f32.mrb[11].mxu1  ;;  %v1061_v42 = vsel %vm1060_vm6, %v1053_v38, -inf  ;;  %1059 = vst.msk [vmem:[#allocation2] sm:$0x3] %vm1058_vm7, %v1053_v38  ;;  %v1078_v43 = vsel %vm1077_vm8, %v1053_v38, -inf }
 0x34d   :  { %1062 = vmax.xlane.f32.xlu1 %v1061_v42 }
 0x351   :  { %1079 = vmax.xlane.f32.xlu1 %v1078_v43 }
 0x3da   :  { %v1063_v44 = vpop.xlane.xlu1 %1062 }
 0x3db   :  { %v1064_v45 = vsub.f32 %v1053_v38, %v1063_v44 }
 0x3dd   :  { %v1065_v46 = vmul.f32 1.442695, %v1064_v45 }
 0x3de   :  { %v1080_v47 = vpop.xlane.xlu1 %1079 }
 0x3df   :  { %1443 = vpow2.f32 %v1065_v46  ;;  %v1081_v48 = vsub.f32 %v1053_v38, %v1080_v47 }
 0x3e1   :  { %v1082_v49 = vmul.f32 1.442695, %v1081_v48 }
 0x3e3   :  { %1445 = vpow2.f32 %v1082_v49 }
 0x3e9   :  { %v1444_v50 = vpop.eup %1443 }
 0x3ea   :  { %1068 = vrot.lane.b32.xlu0 %v1444_v50, %s1480_s6 }
 0x3ed   :  { %v1446_v51 = vpop.eup %1445 }
 0x3ee   :  { %1085 = vrot.lane.b32.xlu1 %v1446_v51, %s1481_s7 }
 0x45c   :  { %v1069_v52 = vpop.permute.xlu0 %1068 }
 0x45d   :  { %v1072_v53 = vsel %vm1071_vm9, %v1069_v52, 0.0 }
 0x45e   :  { %1073 = vadd.xlane.f32.xlu0 %v1072_v53 }
 0x460   :  { %v1086_v54 = vpop.permute.xlu1 %1085 }
 0x461   :  { %v1088_v55 = vsel %vm1071_vm9, %v1086_v54, 0.0 }
 0x462   :  { %1089 = vadd.xlane.f32.xlu1 %v1088_v55 }
 0x4eb   :  { %v1074_v56 = vpop.xlane.xlu0 %1073 }
 0x4ec   :  { %1447 = vrcp.f32 %v1074_v56 }
 0x4ef   :  { %v1090_v57 = vpop.xlane.xlu1 %1089 }
 0x4f0   :  { %1449 = vrcp.f32 %v1090_v57 }
 0x4f1   :  { %1462 = shalt.err (!%p1459_p4)
}
 0x4f2   :  { %s1463_s3 = scalar_lea.hbm %s1856_s8, 32 }
 0x4f3   :  { %p1464_p5 = scmp.ne.s32.totalorder %s1856_s8, %s1463_s3  ;;  %p1467_p6 = scmp.lt.u32.totalorder %s1463_s3, %s1856_s8 }
 0x4f5   :  { %p1469_p7 = pnand %p1467_p6, %p1464_p5 }
 0x4f7   :  { %1472 = shalt.err (!%p1469_p7)
}
 0x4f8   :  { %1116 = dma.vmem_to_hbm [thread:$0]  %s1114_s16, 32, %s1856_s8, [#allocation3]   ;;  %v1448_v58 = vpop.eup %1447  ;;  %vm1101_vm10 = vcmask 39936   ;;  %vm1103_vm11 = vcmask 74752  }
 0x4f9   :  { %v1076_v59 = vmul.f32 %v1448_v58, %v1444_v50 }
 0x4fa   :  { %v1450_v60 = vpop.eup %1449 }
 0x4fb   :  { %1094 = vrot.lane.b32.xlu0 %v1076_v59, %s1480_s6  ;;  %v1092_v61 = vmul.f32 %v1450_v60, %v1446_v51 }
 0x4fd   :  { %1098 = vrot.lane.b32.xlu1 %v1092_v61, %s1480_s6 }
 0x56d   :  { %v1095_v62 = vpop.permute.xlu0 %1094 }
 0x56f   :  { %v1099_v63 = vpop.permute.xlu1 %1098 }
 0x570   :  { %v1102_v0 = vsel %vm1101_vm10, %v1095_v62, %v1099_v63 }
 0x571   :  { %1104 = vst.msk [vmem:[%s1857_s9] sm:$0x3] %vm1103_vm11, %v1102_v0 }
 0x572   :  { %1473 = dma.done.wait [#allocation3], 32  }
 0x573   :  { %1474 = vsyncadd [#allocation3], 4294967264 }
 0x574   :  { %1126 = vsyncpa [#allocation3], 1 }

</bundles_post_ra>
